<compile_context>
chip_gen: v6e
topology: v6e:2x2x1
jax: 0.10.0
libtpu: 0.0.40
codegen_flags: <defaults>
</compile_context>

<pallas_src>
import functools

import jax
import jax.numpy as jnp
from jax import lax
from jax.experimental import pallas as pl
from jax.experimental.pallas import tpu as pltpu

LEAKY_SLOPE = 0.2   # nn.LeakyReLU(0.2)
BN_EPS = 1e-5       # nn.BatchNorm2d default eps


def _leaky(v):
    return jnp.where(v > 0, v, LEAKY_SLOPE * v)


# --------------------------- fully fused bottleneck kernel ---------------------------
def _bottleneck_kernel(x_ref, mask_ref, w1_ref, b1_ref, w2_ref, b2_ref,
                       w3_ref, b3p_ref, wp_ref, o_ref, *, W):
    # x_ref   : (N, Cin, H*W)      VMEM   lane-dense NCHW (spatial flattened to lanes)
    # mask_ref: (9, H*W)           VMEM   0/1 border masks for the 3x3 taps (row = ky*3+kx)
    # w1_ref  : (width*Cin,)       SMEM   1x1 conv weights, BN1 scale folded
    # b1_ref  : (width,)           SMEM   BN1 shift
    # w2_ref  : (width*width*9,)   SMEM   3x3 conv weights, BN2 scale folded
    # b2_ref  : (width,)           SMEM   BN2 shift
    # w3_ref  : (Cout, width)      VMEM   final 1x1 conv weights, BN3 scale folded
    # b3p_ref : (Cout, 1)          VMEM   BN3 shift + projection bias
    # wp_ref  : (Cout, Cin)        VMEM   projection 1x1 conv weights
    # o_ref   : (N, Cout, H*W)     VMEM
    N, cin, HW = x_ref.shape
    width = b1_ref.shape[0]
    cout = o_ref.shape[1]
    f32 = jnp.float32

    for n in range(N):                                   # N is tiny; fully unrolled
        # ---- stage 1: 1x1 conv (+folded BN) + LeakyReLU -> width rows of (1, HW) ----
        x_rows = [x_ref[n, pl.ds(ci, 1), :] for ci in range(cin)]    # live only here
        h1 = []
        for co in range(width):
            acc = jnp.full((1, HW), b1_ref[co], dtype=f32)
            for ci in range(cin):
                acc = acc + w1_ref[co * cin + ci] * x_rows[ci]       # 256-lane VPU FMA
            h1.append(_leaky(acc))

        # ---- stage 2: 3x3 conv, pad=1, stride=1 (+folded BN) + LeakyReLU ----
        # tap(ci, ky, kx)[p] = h1[ci][p + dy*W + dx] (zero outside the image), built
        # as a lane-roll (XLU) of the in-register h1 row times a precomputed border
        # mask.  Only one tap row is live at a time.
        acc2 = [jnp.full((1, HW), b2_ref[co], dtype=f32) for co in range(width)]
        for ky in range(3):
            for kx in range(3):
                dy, dx = ky - 1, kx - 1
                if dy == 0 and dx == 0:
                    m, shift = None, 0
                else:
                    m = mask_ref[pl.ds(ky * 3 + kx, 1), :]           # (1, HW)
                    shift = (-(dy * W + dx)) % HW                    # roll so tap[p] = h1[p + s]
                for ci in range(width):
                    if m is None:
                        tap = h1[ci]
                    else:
                        tap = m * pltpu.roll(h1[ci], shift=shift, axis=1)
                    for co in range(width):
                        widx = ((co * width + ci) * 3 + ky) * 3 + kx
                        acc2[co] = acc2[co] + w2_ref[widx] * tap
        h2 = [_leaky(a) for a in acc2]

        # ---- stage 3: final 1x1 + BN, projection 1x1 (+bias), residual, LeakyReLU ----
        # Accumulate a dense (Cout, HW) slab -> one unmasked full-tile store per image.
        acc3 = jnp.broadcast_to(b3p_ref[...], (cout, HW))
        for ci in range(width):
            acc3 = acc3 + w3_ref[:, ci:ci + 1] * jnp.broadcast_to(h2[ci], (cout, HW))
        for ci in range(cin):
            xr = x_ref[n, pl.ds(ci, 1), :]                           # reload; x not pinned
            acc3 = acc3 + wp_ref[:, ci:ci + 1] * jnp.broadcast_to(xr, (cout, HW))
        o_ref[n, :, :] = _leaky(acc3).astype(o_ref.dtype)


# ------------------------------- forward wrapper -------------------------------
def bottleneck_forward(x_nchw, p):
    N, cin, H, W = x_nchw.shape
    width = p["w1"].shape[0]
    cout = p["w3"].shape[0]
    HW = H * W
    f32 = jnp.float32

    # Fold the inference-mode BatchNorm scale into the conv weights; the shift
    # becomes a per-channel bias.
    w1f = (p["w1"] * p["bn1_scale"][:, None]).reshape(-1).astype(f32)      # SMEM scalars
    b1 = p["bn1_shift"].astype(f32)
    w2f = (p["w2"] * p["bn2_scale"][:, None, None, None]).reshape(-1).astype(f32)
    b2 = p["bn2_shift"].astype(f32)
    w3v = (p["w3"] * p["bn3_scale"][:, None]).astype(f32)                  # (Cout, width) VMEM
    b3p = (p["bn3_shift"] + p["bp"]).astype(f32)[:, None]                  # (Cout, 1) VMEM
    wpv = p["wp"].astype(f32)                                              # (Cout, Cin) VMEM

    # Precomputed 0/1 border masks for the 9 stencil taps (row = ky*3 + kx).
    yy, xx = jnp.meshgrid(jnp.arange(H), jnp.arange(W), indexing="ij")
    rows = []
    for ky in range(3):
        for kx in range(3):
            dy, dx = ky - 1, kx - 1
            valid = ((yy + dy >= 0) & (yy + dy < H) &
                     (xx + dx >= 0) & (xx + dx < W))
            rows.append(valid.reshape(-1))
    masks = jnp.stack(rows).astype(f32)                                    # (9, HW)

    # Free, contiguous reshape of NCHW: spatial becomes the 256-wide lane dim.
    x_flat = x_nchw.reshape(N, cin, HW).astype(f32)

    vmem = lambda: pl.BlockSpec(memory_space=pltpu.MemorySpace.VMEM)
    smem = lambda: pl.BlockSpec(memory_space=pltpu.MemorySpace.SMEM)

    out_flat = pl.pallas_call(
        functools.partial(_bottleneck_kernel, W=W),
        out_shape=jax.ShapeDtypeStruct((N, cout, HW), f32),
        in_specs=[vmem(), vmem(),                    # x, tap masks
                  smem(), smem(), smem(), smem(),    # w1, b1, w2, b2
                  vmem(), vmem(), vmem()],           # w3, b3+bp, wp
        out_specs=vmem(),
    )(x_flat, masks, w1f, b1, w2f, b2, w3v, b3p, wpv)
    return out_flat.reshape(N, cout, H, W)


# ------------------------------ pure-JAX reference -----------------------------
def bottleneck_reference(x, p):
    def bc(v):
        return v[None, :, None, None]
    h = jnp.einsum("nchw,oc->nohw", x, p["w1"])
    h = _leaky(h * bc(p["bn1_scale"]) + bc(p["bn1_shift"]))
    h = lax.conv_general_dilated(h, p["w2"], (1, 1), ((1, 1), (1, 1)),
                                 dimension_numbers=("NCHW", "OIHW", "NCHW"))
    h = _leaky(h * bc(p["bn2_scale"]) + bc(p["bn2_shift"]))
    y = jnp.einsum("nchw,oc->nohw", h, p["w3"])
    y = y * bc(p["bn3_scale"]) + bc(p["bn3_shift"])
    xp = jnp.einsum("nchw,oc->nohw", x, p["wp"]) + bc(p["bp"])
    return _leaky(y + xp)


if __name__ == "__main__":
    N, Cin, Cout, H, W = 2, 4, 8, 16, 16
    width = (Cin + Cout) // 4          # Bottleneck default width = 3

    key = jax.random.PRNGKey(0)
    keys = jax.random.split(key, 18)

    def bn_fold(kg, kb, km, kv, c):
        gamma = jax.random.uniform(kg, (c,), minval=0.5, maxval=1.5)
        beta = 0.1 * jax.random.normal(kb, (c,))
        mean = 0.1 * jax.random.normal(km, (c,))
        var = jax.random.uniform(kv, (c,), minval=0.5, maxval=1.5)
        scale = gamma / jnp.sqrt(var + BN_EPS)
        shift = beta - mean * scale
        return scale.astype(jnp.float32), shift.astype(jnp.float32)

    bn1_scale, bn1_shift = bn_fold(keys[1], keys[2], keys[3], keys[4], width)
    bn2_scale, bn2_shift = bn_fold(keys[6], keys[7], keys[8], keys[9], width)
    bn3_scale, bn3_shift = bn_fold(keys[11], keys[12], keys[13], keys[14], Cout)

    params = {
        # PyTorch Conv2d weight layouts: (outC, inC[, kH, kW])
        "w1": (0.3 * jax.random.normal(keys[0], (width, Cin))).astype(jnp.float32),
        "bn1_scale": bn1_scale, "bn1_shift": bn1_shift,
        "w2": (0.2 * jax.random.normal(keys[5], (width, width, 3, 3))).astype(jnp.float32),
        "bn2_scale": bn2_scale, "bn2_shift": bn2_shift,
        "w3": (0.3 * jax.random.normal(keys[10], (Cout, width))).astype(jnp.float32),
        "bn3_scale": bn3_scale, "bn3_shift": bn3_shift,
        "wp": (0.3 * jax.random.normal(keys[15], (Cout, Cin))).astype(jnp.float32),
        "bp": (0.1 * jax.random.normal(keys[16], (Cout,))).astype(jnp.float32),
    }

    x = jax.random.normal(keys[17], (N, Cin, H, W), dtype=jnp.float32)

    out = jax.block_until_ready(bottleneck_forward(x, params))
    ref = bottleneck_reference(x, params)

    assert out.shape == (N, Cout, H, W), out.shape
    assert jnp.allclose(out, ref, atol=1e-4, rtol=1e-4), "mismatch vs reference"

    print("KERNEL_OK")
</pallas_src>

<mosaic_0001>
module attributes {stable_mosaic.version = 11 : i64} {
  func.func @_bottleneck_kernel(%arg0: memref<2x4x256xf32, #tpu.memory_space<vmem>>, %arg1: memref<9x256xf32, #tpu.memory_space<vmem>>, %arg2: memref<12xf32, #tpu.memory_space<smem>>, %arg3: memref<3xf32, #tpu.memory_space<smem>>, %arg4: memref<81xf32, #tpu.memory_space<smem>>, %arg5: memref<3xf32, #tpu.memory_space<smem>>, %arg6: memref<8x3xf32, #tpu.memory_space<vmem>>, %arg7: memref<8x1xf32, #tpu.memory_space<vmem>>, %arg8: memref<8x4xf32, #tpu.memory_space<vmem>>, %arg9: memref<2x8x256xf32, #tpu.memory_space<vmem>>) attributes {dimension_semantics = [], scalar_prefetch = 0 : i64, scratch_operands = 0 : i64, tpu.core_type = #tpu.core_type<tc>} {
    %c0 = arith.constant 0 : index
    %c0_0 = arith.constant 0 : index
    %c0_1 = arith.constant 0 : index
    %0 = vector.load %arg0[%c0, %c0_0, %c0_1] : memref<2x4x256xf32, #tpu.memory_space<vmem>>, vector<1x1x256xf32>
    %1 = vector.shape_cast %0 : vector<1x1x256xf32> to vector<1x256xf32>
    %c0_2 = arith.constant 0 : index
    %c1 = arith.constant 1 : index
    %c0_3 = arith.constant 0 : index
    %2 = vector.load %arg0[%c0_2, %c1, %c0_3] : memref<2x4x256xf32, #tpu.memory_space<vmem>>, vector<1x1x256xf32>
    %3 = vector.shape_cast %2 : vector<1x1x256xf32> to vector<1x256xf32>
    %c0_4 = arith.constant 0 : index
    %c2 = arith.constant 2 : index
    %c0_5 = arith.constant 0 : index
    %4 = vector.load %arg0[%c0_4, %c2, %c0_5] : memref<2x4x256xf32, #tpu.memory_space<vmem>>, vector<1x1x256xf32>
    %5 = vector.shape_cast %4 : vector<1x1x256xf32> to vector<1x256xf32>
    %c0_6 = arith.constant 0 : index
    %c3 = arith.constant 3 : index
    %c0_7 = arith.constant 0 : index
    %6 = vector.load %arg0[%c0_6, %c3, %c0_7] : memref<2x4x256xf32, #tpu.memory_space<vmem>>, vector<1x1x256xf32>
    %7 = vector.shape_cast %6 : vector<1x1x256xf32> to vector<1x256xf32>
    %c0_8 = arith.constant 0 : index
    %8 = memref.load %arg3[%c0_8] : memref<3xf32, #tpu.memory_space<smem>>
    %9 = vector.broadcast %8 : f32 to vector<1x256xf32>
    %c0_9 = arith.constant 0 : index
    %10 = memref.load %arg2[%c0_9] : memref<12xf32, #tpu.memory_space<smem>>
    %11 = vector.broadcast %10 : f32 to vector<1x256xf32>
    %12 = arith.mulf %11, %1 : vector<1x256xf32>
    %13 = arith.addf %9, %12 : vector<1x256xf32>
    %c1_10 = arith.constant 1 : index
    %14 = memref.load %arg2[%c1_10] : memref<12xf32, #tpu.memory_space<smem>>
    %15 = vector.broadcast %14 : f32 to vector<1x256xf32>
    %16 = arith.mulf %15, %3 : vector<1x256xf32>
    %17 = arith.addf %13, %16 : vector<1x256xf32>
    %c2_11 = arith.constant 2 : index
    %18 = memref.load %arg2[%c2_11] : memref<12xf32, #tpu.memory_space<smem>>
    %19 = vector.broadcast %18 : f32 to vector<1x256xf32>
    %20 = arith.mulf %19, %5 : vector<1x256xf32>
    %21 = arith.addf %17, %20 : vector<1x256xf32>
    %c3_12 = arith.constant 3 : index
    %22 = memref.load %arg2[%c3_12] : memref<12xf32, #tpu.memory_space<smem>>
    %23 = vector.broadcast %22 : f32 to vector<1x256xf32>
    %24 = arith.mulf %23, %7 : vector<1x256xf32>
    %25 = arith.addf %21, %24 : vector<1x256xf32>
    %cst = arith.constant 0.000000e+00 : f32
    %26 = vector.broadcast %cst : f32 to vector<1x256xf32>
    %27 = arith.cmpf ogt, %25, %26 : vector<1x256xf32>
    %cst_13 = arith.constant 2.000000e-01 : f32
    %28 = vector.broadcast %cst_13 : f32 to vector<1x256xf32>
    %29 = arith.mulf %28, %25 : vector<1x256xf32>
    %30 = arith.select %27, %25, %29 : vector<1x256xi1>, vector<1x256xf32>
    %c1_14 = arith.constant 1 : index
    %31 = memref.load %arg3[%c1_14] : memref<3xf32, #tpu.memory_space<smem>>
    %32 = vector.broadcast %31 : f32 to vector<1x256xf32>
    %c4 = arith.constant 4 : index
    %33 = memref.load %arg2[%c4] : memref<12xf32, #tpu.memory_space<smem>>
    %34 = vector.broadcast %33 : f32 to vector<1x256xf32>
    %35 = arith.mulf %34, %1 : vector<1x256xf32>
    %36 = arith.addf %32, %35 : vector<1x256xf32>
    %c5 = arith.constant 5 : index
    %37 = memref.load %arg2[%c5] : memref<12xf32, #tpu.memory_space<smem>>
    %38 = vector.broadcast %37 : f32 to vector<1x256xf32>
    %39 = arith.mulf %38, %3 : vector<1x256xf32>
    %40 = arith.addf %36, %39 : vector<1x256xf32>
    %c6 = arith.constant 6 : index
    %41 = memref.load %arg2[%c6] : memref<12xf32, #tpu.memory_space<smem>>
    %42 = vector.broadcast %41 : f32 to vector<1x256xf32>
    %43 = arith.mulf %42, %5 : vector<1x256xf32>
    %44 = arith.addf %40, %43 : vector<1x256xf32>
    %c7 = arith.constant 7 : index
    %45 = memref.load %arg2[%c7] : memref<12xf32, #tpu.memory_space<smem>>
    %46 = vector.broadcast %45 : f32 to vector<1x256xf32>
    %47 = arith.mulf %46, %7 : vector<1x256xf32>
    %48 = arith.addf %44, %47 : vector<1x256xf32>
    %cst_15 = arith.constant 0.000000e+00 : f32
    %49 = vector.broadcast %cst_15 : f32 to vector<1x256xf32>
    %50 = arith.cmpf ogt, %48, %49 : vector<1x256xf32>
    %cst_16 = arith.constant 2.000000e-01 : f32
    %51 = vector.broadcast %cst_16 : f32 to vector<1x256xf32>
    %52 = arith.mulf %51, %48 : vector<1x256xf32>
    %53 = arith.select %50, %48, %52 : vector<1x256xi1>, vector<1x256xf32>
    %c2_17 = arith.constant 2 : index
    %54 = memref.load %arg3[%c2_17] : memref<3xf32, #tpu.memory_space<smem>>
    %55 = vector.broadcast %54 : f32 to vector<1x256xf32>
    %c8 = arith.constant 8 : index
    %56 = memref.load %arg2[%c8] : memref<12xf32, #tpu.memory_space<smem>>
    %57 = vector.broadcast %56 : f32 to vector<1x256xf32>
    %58 = arith.mulf %57, %1 : vector<1x256xf32>
    %59 = arith.addf %55, %58 : vector<1x256xf32>
    %c9 = arith.constant 9 : index
    %60 = memref.load %arg2[%c9] : memref<12xf32, #tpu.memory_space<smem>>
    %61 = vector.broadcast %60 : f32 to vector<1x256xf32>
    %62 = arith.mulf %61, %3 : vector<1x256xf32>
    %63 = arith.addf %59, %62 : vector<1x256xf32>
    %c10 = arith.constant 10 : index
    %64 = memref.load %arg2[%c10] : memref<12xf32, #tpu.memory_space<smem>>
    %65 = vector.broadcast %64 : f32 to vector<1x256xf32>
    %66 = arith.mulf %65, %5 : vector<1x256xf32>
    %67 = arith.addf %63, %66 : vector<1x256xf32>
    %c11 = arith.constant 11 : index
    %68 = memref.load %arg2[%c11] : memref<12xf32, #tpu.memory_space<smem>>
    %69 = vector.broadcast %68 : f32 to vector<1x256xf32>
    %70 = arith.mulf %69, %7 : vector<1x256xf32>
    %71 = arith.addf %67, %70 : vector<1x256xf32>
    %cst_18 = arith.constant 0.000000e+00 : f32
    %72 = vector.broadcast %cst_18 : f32 to vector<1x256xf32>
    %73 = arith.cmpf ogt, %71, %72 : vector<1x256xf32>
    %cst_19 = arith.constant 2.000000e-01 : f32
    %74 = vector.broadcast %cst_19 : f32 to vector<1x256xf32>
    %75 = arith.mulf %74, %71 : vector<1x256xf32>
    %76 = arith.select %73, %71, %75 : vector<1x256xi1>, vector<1x256xf32>
    %c0_20 = arith.constant 0 : index
    %77 = memref.load %arg5[%c0_20] : memref<3xf32, #tpu.memory_space<smem>>
    %78 = vector.broadcast %77 : f32 to vector<1x256xf32>
    %c1_21 = arith.constant 1 : index
    %79 = memref.load %arg5[%c1_21] : memref<3xf32, #tpu.memory_space<smem>>
    %80 = vector.broadcast %79 : f32 to vector<1x256xf32>
    %c2_22 = arith.constant 2 : index
    %81 = memref.load %arg5[%c2_22] : memref<3xf32, #tpu.memory_space<smem>>
    %82 = vector.broadcast %81 : f32 to vector<1x256xf32>
    %c0_23 = arith.constant 0 : index
    %c0_24 = arith.constant 0 : index
    %83 = vector.load %arg1[%c0_23, %c0_24] : memref<9x256xf32, #tpu.memory_space<vmem>>, vector<1x256xf32>
    %c17_i32 = arith.constant 17 : i32
    %84 = tpu.dynamic_rotate %30 by %c17_i32 dim 1 : vector<1x256xf32>, i32 -> vector<1x256xf32>
    %85 = arith.mulf %83, %84 : vector<1x256xf32>
    %c0_25 = arith.constant 0 : index
    %86 = memref.load %arg4[%c0_25] : memref<81xf32, #tpu.memory_space<smem>>
    %87 = vector.broadcast %86 : f32 to vector<1x256xf32>
    %88 = arith.mulf %87, %85 : vector<1x256xf32>
    %89 = arith.addf %78, %88 : vector<1x256xf32>
    %c27 = arith.constant 27 : index
    %90 = memref.load %arg4[%c27] : memref<81xf32, #tpu.memory_space<smem>>
    %91 = vector.broadcast %90 : f32 to vector<1x256xf32>
    %92 = arith.mulf %91, %85 : vector<1x256xf32>
    %93 = arith.addf %80, %92 : vector<1x256xf32>
    %c54 = arith.constant 54 : index
    %94 = memref.load %arg4[%c54] : memref<81xf32, #tpu.memory_space<smem>>
    %95 = vector.broadcast %94 : f32 to vector<1x256xf32>
    %96 = arith.mulf %95, %85 : vector<1x256xf32>
    %97 = arith.addf %82, %96 : vector<1x256xf32>
    %c17_i32_26 = arith.constant 17 : i32
    %98 = tpu.dynamic_rotate %53 by %c17_i32_26 dim 1 : vector<1x256xf32>, i32 -> vector<1x256xf32>
    %99 = arith.mulf %83, %98 : vector<1x256xf32>
    %c9_27 = arith.constant 9 : index
    %100 = memref.load %arg4[%c9_27] : memref<81xf32, #tpu.memory_space<smem>>
    %101 = vector.broadcast %100 : f32 to vector<1x256xf32>
    %102 = arith.mulf %101, %99 : vector<1x256xf32>
    %103 = arith.addf %89, %102 : vector<1x256xf32>
    %c36 = arith.constant 36 : index
    %104 = memref.load %arg4[%c36] : memref<81xf32, #tpu.memory_space<smem>>
    %105 = vector.broadcast %104 : f32 to vector<1x256xf32>
    %106 = arith.mulf %105, %99 : vector<1x256xf32>
    %107 = arith.addf %93, %106 : vector<1x256xf32>
    %c63 = arith.constant 63 : index
    %108 = memref.load %arg4[%c63] : memref<81xf32, #tpu.memory_space<smem>>
    %109 = vector.broadcast %108 : f32 to vector<1x256xf32>
    %110 = arith.mulf %109, %99 : vector<1x256xf32>
    %111 = arith.addf %97, %110 : vector<1x256xf32>
    %c17_i32_28 = arith.constant 17 : i32
    %112 = tpu.dynamic_rotate %76 by %c17_i32_28 dim 1 : vector<1x256xf32>, i32 -> vector<1x256xf32>
    %113 = arith.mulf %83, %112 : vector<1x256xf32>
    %c18 = arith.constant 18 : index
    %114 = memref.load %arg4[%c18] : memref<81xf32, #tpu.memory_space<smem>>
    %115 = vector.broadcast %114 : f32 to vector<1x256xf32>
    %116 = arith.mulf %115, %113 : vector<1x256xf32>
    %117 = arith.addf %103, %116 : vector<1x256xf32>
    %c45 = arith.constant 45 : index
    %118 = memref.load %arg4[%c45] : memref<81xf32, #tpu.memory_space<smem>>
    %119 = vector.broadcast %118 : f32 to vector<1x256xf32>
    %120 = arith.mulf %119, %113 : vector<1x256xf32>
    %121 = arith.addf %107, %120 : vector<1x256xf32>
    %c72 = arith.constant 72 : index
    %122 = memref.load %arg4[%c72] : memref<81xf32, #tpu.memory_space<smem>>
    %123 = vector.broadcast %122 : f32 to vector<1x256xf32>
    %124 = arith.mulf %123, %113 : vector<1x256xf32>
    %125 = arith.addf %111, %124 : vector<1x256xf32>
    %c1_29 = arith.constant 1 : index
    %c0_30 = arith.constant 0 : index
    %126 = vector.load %arg1[%c1_29, %c0_30] : memref<9x256xf32, #tpu.memory_space<vmem>>, vector<1x256xf32>
    %c16_i32 = arith.constant 16 : i32
    %127 = tpu.dynamic_rotate %30 by %c16_i32 dim 1 : vector<1x256xf32>, i32 -> vector<1x256xf32>
    %128 = arith.mulf %126, %127 : vector<1x256xf32>
    %c1_31 = arith.constant 1 : index
    %129 = memref.load %arg4[%c1_31] : memref<81xf32, #tpu.memory_space<smem>>
    %130 = vector.broadcast %129 : f32 to vector<1x256xf32>
    %131 = arith.mulf %130, %128 : vector<1x256xf32>
    %132 = arith.addf %117, %131 : vector<1x256xf32>
    %c28 = arith.constant 28 : index
    %133 = memref.load %arg4[%c28] : memref<81xf32, #tpu.memory_space<smem>>
    %134 = vector.broadcast %133 : f32 to vector<1x256xf32>
    %135 = arith.mulf %134, %128 : vector<1x256xf32>
    %136 = arith.addf %121, %135 : vector<1x256xf32>
    %c55 = arith.constant 55 : index
    %137 = memref.load %arg4[%c55] : memref<81xf32, #tpu.memory_space<smem>>
    %138 = vector.broadcast %137 : f32 to vector<1x256xf32>
    %139 = arith.mulf %138, %128 : vector<1x256xf32>
    %140 = arith.addf %125, %139 : vector<1x256xf32>
    %c16_i32_32 = arith.constant 16 : i32
    %141 = tpu.dynamic_rotate %53 by %c16_i32_32 dim 1 : vector<1x256xf32>, i32 -> vector<1x256xf32>
    %142 = arith.mulf %126, %141 : vector<1x256xf32>
    %c10_33 = arith.constant 10 : index
    %143 = memref.load %arg4[%c10_33] : memref<81xf32, #tpu.memory_space<smem>>
    %144 = vector.broadcast %143 : f32 to vector<1x256xf32>
    %145 = arith.mulf %144, %142 : vector<1x256xf32>
    %146 = arith.addf %132, %145 : vector<1x256xf32>
    %c37 = arith.constant 37 : index
    %147 = memref.load %arg4[%c37] : memref<81xf32, #tpu.memory_space<smem>>
    %148 = vector.broadcast %147 : f32 to vector<1x256xf32>
    %149 = arith.mulf %148, %142 : vector<1x256xf32>
    %150 = arith.addf %136, %149 : vector<1x256xf32>
    %c64 = arith.constant 64 : index
    %151 = memref.load %arg4[%c64] : memref<81xf32, #tpu.memory_space<smem>>
    %152 = vector.broadcast %151 : f32 to vector<1x256xf32>
    %153 = arith.mulf %152, %142 : vector<1x256xf32>
    %154 = arith.addf %140, %153 : vector<1x256xf32>
    %c16_i32_34 = arith.constant 16 : i32
    %155 = tpu.dynamic_rotate %76 by %c16_i32_34 dim 1 : vector<1x256xf32>, i32 -> vector<1x256xf32>
    %156 = arith.mulf %126, %155 : vector<1x256xf32>
    %c19 = arith.constant 19 : index
    %157 = memref.load %arg4[%c19] : memref<81xf32, #tpu.memory_space<smem>>
    %158 = vector.broadcast %157 : f32 to vector<1x256xf32>
    %159 = arith.mulf %158, %156 : vector<1x256xf32>
    %160 = arith.addf %146, %159 : vector<1x256xf32>
    %c46 = arith.constant 46 : index
    %161 = memref.load %arg4[%c46] : memref<81xf32, #tpu.memory_space<smem>>
    %162 = vector.broadcast %161 : f32 to vector<1x256xf32>
    %163 = arith.mulf %162, %156 : vector<1x256xf32>
    %164 = arith.addf %150, %163 : vector<1x256xf32>
    %c73 = arith.constant 73 : index
    %165 = memref.load %arg4[%c73] : memref<81xf32, #tpu.memory_space<smem>>
    %166 = vector.broadcast %165 : f32 to vector<1x256xf32>
    %167 = arith.mulf %166, %156 : vector<1x256xf32>
    %168 = arith.addf %154, %167 : vector<1x256xf32>
    %c2_35 = arith.constant 2 : index
    %c0_36 = arith.constant 0 : index
    %169 = vector.load %arg1[%c2_35, %c0_36] : memref<9x256xf32, #tpu.memory_space<vmem>>, vector<1x256xf32>
    %c15_i32 = arith.constant 15 : i32
    %170 = tpu.dynamic_rotate %30 by %c15_i32 dim 1 : vector<1x256xf32>, i32 -> vector<1x256xf32>
    %171 = arith.mulf %169, %170 : vector<1x256xf32>
    %c2_37 = arith.constant 2 : index
    %172 = memref.load %arg4[%c2_37] : memref<81xf32, #tpu.memory_space<smem>>
    %173 = vector.broadcast %172 : f32 to vector<1x256xf32>
    %174 = arith.mulf %173, %171 : vector<1x256xf32>
    %175 = arith.addf %160, %174 : vector<1x256xf32>
    %c29 = arith.constant 29 : index
    %176 = memref.load %arg4[%c29] : memref<81xf32, #tpu.memory_space<smem>>
    %177 = vector.broadcast %176 : f32 to vector<1x256xf32>
    %178 = arith.mulf %177, %171 : vector<1x256xf32>
    %179 = arith.addf %164, %178 : vector<1x256xf32>
    %c56 = arith.constant 56 : index
    %180 = memref.load %arg4[%c56] : memref<81xf32, #tpu.memory_space<smem>>
    %181 = vector.broadcast %180 : f32 to vector<1x256xf32>
    %182 = arith.mulf %181, %171 : vector<1x256xf32>
    %183 = arith.addf %168, %182 : vector<1x256xf32>
    %c15_i32_38 = arith.constant 15 : i32
    %184 = tpu.dynamic_rotate %53 by %c15_i32_38 dim 1 : vector<1x256xf32>, i32 -> vector<1x256xf32>
    %185 = arith.mulf %169, %184 : vector<1x256xf32>
    %c11_39 = arith.constant 11 : index
    %186 = memref.load %arg4[%c11_39] : memref<81xf32, #tpu.memory_space<smem>>
    %187 = vector.broadcast %186 : f32 to vector<1x256xf32>
    %188 = arith.mulf %187, %185 : vector<1x256xf32>
    %189 = arith.addf %175, %188 : vector<1x256xf32>
    %c38 = arith.constant 38 : index
    %190 = memref.load %arg4[%c38] : memref<81xf32, #tpu.memory_space<smem>>
    %191 = vector.broadcast %190 : f32 to vector<1x256xf32>
    %192 = arith.mulf %191, %185 : vector<1x256xf32>
    %193 = arith.addf %179, %192 : vector<1x256xf32>
    %c65 = arith.constant 65 : index
    %194 = memref.load %arg4[%c65] : memref<81xf32, #tpu.memory_space<smem>>
    %195 = vector.broadcast %194 : f32 to vector<1x256xf32>
    %196 = arith.mulf %195, %185 : vector<1x256xf32>
    %197 = arith.addf %183, %196 : vector<1x256xf32>
    %c15_i32_40 = arith.constant 15 : i32
    %198 = tpu.dynamic_rotate %76 by %c15_i32_40 dim 1 : vector<1x256xf32>, i32 -> vector<1x256xf32>
    %199 = arith.mulf %169, %198 : vector<1x256xf32>
    %c20 = arith.constant 20 : index
    %200 = memref.load %arg4[%c20] : memref<81xf32, #tpu.memory_space<smem>>
    %201 = vector.broadcast %200 : f32 to vector<1x256xf32>
    %202 = arith.mulf %201, %199 : vector<1x256xf32>
    %203 = arith.addf %189, %202 : vector<1x256xf32>
    %c47 = arith.constant 47 : index
    %204 = memref.load %arg4[%c47] : memref<81xf32, #tpu.memory_space<smem>>
    %205 = vector.broadcast %204 : f32 to vector<1x256xf32>
    %206 = arith.mulf %205, %199 : vector<1x256xf32>
    %207 = arith.addf %193, %206 : vector<1x256xf32>
    %c74 = arith.constant 74 : index
    %208 = memref.load %arg4[%c74] : memref<81xf32, #tpu.memory_space<smem>>
    %209 = vector.broadcast %208 : f32 to vector<1x256xf32>
    %210 = arith.mulf %209, %199 : vector<1x256xf32>
    %211 = arith.addf %197, %210 : vector<1x256xf32>
    %c3_41 = arith.constant 3 : index
    %c0_42 = arith.constant 0 : index
    %212 = vector.load %arg1[%c3_41, %c0_42] : memref<9x256xf32, #tpu.memory_space<vmem>>, vector<1x256xf32>
    %c1_i32 = arith.constant 1 : i32
    %213 = tpu.dynamic_rotate %30 by %c1_i32 dim 1 : vector<1x256xf32>, i32 -> vector<1x256xf32>
    %214 = arith.mulf %212, %213 : vector<1x256xf32>
    %c3_43 = arith.constant 3 : index
    %215 = memref.load %arg4[%c3_43] : memref<81xf32, #tpu.memory_space<smem>>
    %216 = vector.broadcast %215 : f32 to vector<1x256xf32>
    %217 = arith.mulf %216, %214 : vector<1x256xf32>
    %218 = arith.addf %203, %217 : vector<1x256xf32>
    %c30 = arith.constant 30 : index
    %219 = memref.load %arg4[%c30] : memref<81xf32, #tpu.memory_space<smem>>
    %220 = vector.broadcast %219 : f32 to vector<1x256xf32>
    %221 = arith.mulf %220, %214 : vector<1x256xf32>
    %222 = arith.addf %207, %221 : vector<1x256xf32>
    %c57 = arith.constant 57 : index
    %223 = memref.load %arg4[%c57] : memref<81xf32, #tpu.memory_space<smem>>
    %224 = vector.broadcast %223 : f32 to vector<1x256xf32>
    %225 = arith.mulf %224, %214 : vector<1x256xf32>
    %226 = arith.addf %211, %225 : vector<1x256xf32>
    %c1_i32_44 = arith.constant 1 : i32
    %227 = tpu.dynamic_rotate %53 by %c1_i32_44 dim 1 : vector<1x256xf32>, i32 -> vector<1x256xf32>
    %228 = arith.mulf %212, %227 : vector<1x256xf32>
    %c12 = arith.constant 12 : index
    %229 = memref.load %arg4[%c12] : memref<81xf32, #tpu.memory_space<smem>>
    %230 = vector.broadcast %229 : f32 to vector<1x256xf32>
    %231 = arith.mulf %230, %228 : vector<1x256xf32>
    %232 = arith.addf %218, %231 : vector<1x256xf32>
    %c39 = arith.constant 39 : index
    %233 = memref.load %arg4[%c39] : memref<81xf32, #tpu.memory_space<smem>>
    %234 = vector.broadcast %233 : f32 to vector<1x256xf32>
    %235 = arith.mulf %234, %228 : vector<1x256xf32>
    %236 = arith.addf %222, %235 : vector<1x256xf32>
    %c66 = arith.constant 66 : index
    %237 = memref.load %arg4[%c66] : memref<81xf32, #tpu.memory_space<smem>>
    %238 = vector.broadcast %237 : f32 to vector<1x256xf32>
    %239 = arith.mulf %238, %228 : vector<1x256xf32>
    %240 = arith.addf %226, %239 : vector<1x256xf32>
    %c1_i32_45 = arith.constant 1 : i32
    %241 = tpu.dynamic_rotate %76 by %c1_i32_45 dim 1 : vector<1x256xf32>, i32 -> vector<1x256xf32>
    %242 = arith.mulf %212, %241 : vector<1x256xf32>
    %c21 = arith.constant 21 : index
    %243 = memref.load %arg4[%c21] : memref<81xf32, #tpu.memory_space<smem>>
    %244 = vector.broadcast %243 : f32 to vector<1x256xf32>
    %245 = arith.mulf %244, %242 : vector<1x256xf32>
    %246 = arith.addf %232, %245 : vector<1x256xf32>
    %c48 = arith.constant 48 : index
    %247 = memref.load %arg4[%c48] : memref<81xf32, #tpu.memory_space<smem>>
    %248 = vector.broadcast %247 : f32 to vector<1x256xf32>
    %249 = arith.mulf %248, %242 : vector<1x256xf32>
    %250 = arith.addf %236, %249 : vector<1x256xf32>
    %c75 = arith.constant 75 : index
    %251 = memref.load %arg4[%c75] : memref<81xf32, #tpu.memory_space<smem>>
    %252 = vector.broadcast %251 : f32 to vector<1x256xf32>
    %253 = arith.mulf %252, %242 : vector<1x256xf32>
    %254 = arith.addf %240, %253 : vector<1x256xf32>
    %c4_46 = arith.constant 4 : index
    %255 = memref.load %arg4[%c4_46] : memref<81xf32, #tpu.memory_space<smem>>
    %256 = vector.broadcast %255 : f32 to vector<1x256xf32>
    %257 = arith.mulf %256, %30 : vector<1x256xf32>
    %258 = arith.addf %246, %257 : vector<1x256xf32>
    %c31 = arith.constant 31 : index
    %259 = memref.load %arg4[%c31] : memref<81xf32, #tpu.memory_space<smem>>
    %260 = vector.broadcast %259 : f32 to vector<1x256xf32>
    %261 = arith.mulf %260, %30 : vector<1x256xf32>
    %262 = arith.addf %250, %261 : vector<1x256xf32>
    %c58 = arith.constant 58 : index
    %263 = memref.load %arg4[%c58] : memref<81xf32, #tpu.memory_space<smem>>
    %264 = vector.broadcast %263 : f32 to vector<1x256xf32>
    %265 = arith.mulf %264, %30 : vector<1x256xf32>
    %266 = arith.addf %254, %265 : vector<1x256xf32>
    %c13 = arith.constant 13 : index
    %267 = memref.load %arg4[%c13] : memref<81xf32, #tpu.memory_space<smem>>
    %268 = vector.broadcast %267 : f32 to vector<1x256xf32>
    %269 = arith.mulf %268, %53 : vector<1x256xf32>
    %270 = arith.addf %258, %269 : vector<1x256xf32>
    %c40 = arith.constant 40 : index
    %271 = memref.load %arg4[%c40] : memref<81xf32, #tpu.memory_space<smem>>
    %272 = vector.broadcast %271 : f32 to vector<1x256xf32>
    %273 = arith.mulf %272, %53 : vector<1x256xf32>
    %274 = arith.addf %262, %273 : vector<1x256xf32>
    %c67 = arith.constant 67 : index
    %275 = memref.load %arg4[%c67] : memref<81xf32, #tpu.memory_space<smem>>
    %276 = vector.broadcast %275 : f32 to vector<1x256xf32>
    %277 = arith.mulf %276, %53 : vector<1x256xf32>
    %278 = arith.addf %266, %277 : vector<1x256xf32>
    %c22 = arith.constant 22 : index
    %279 = memref.load %arg4[%c22] : memref<81xf32, #tpu.memory_space<smem>>
    %280 = vector.broadcast %279 : f32 to vector<1x256xf32>
    %281 = arith.mulf %280, %76 : vector<1x256xf32>
    %282 = arith.addf %270, %281 : vector<1x256xf32>
    %c49 = arith.constant 49 : index
    %283 = memref.load %arg4[%c49] : memref<81xf32, #tpu.memory_space<smem>>
    %284 = vector.broadcast %283 : f32 to vector<1x256xf32>
    %285 = arith.mulf %284, %76 : vector<1x256xf32>
    %286 = arith.addf %274, %285 : vector<1x256xf32>
    %c76 = arith.constant 76 : index
    %287 = memref.load %arg4[%c76] : memref<81xf32, #tpu.memory_space<smem>>
    %288 = vector.broadcast %287 : f32 to vector<1x256xf32>
    %289 = arith.mulf %288, %76 : vector<1x256xf32>
    %290 = arith.addf %278, %289 : vector<1x256xf32>
    %c5_47 = arith.constant 5 : index
    %c0_48 = arith.constant 0 : index
    %291 = vector.load %arg1[%c5_47, %c0_48] : memref<9x256xf32, #tpu.memory_space<vmem>>, vector<1x256xf32>
    %c255_i32 = arith.constant 255 : i32
    %292 = tpu.dynamic_rotate %30 by %c255_i32 dim 1 : vector<1x256xf32>, i32 -> vector<1x256xf32>
    %293 = arith.mulf %291, %292 : vector<1x256xf32>
    %c5_49 = arith.constant 5 : index
    %294 = memref.load %arg4[%c5_49] : memref<81xf32, #tpu.memory_space<smem>>
    %295 = vector.broadcast %294 : f32 to vector<1x256xf32>
    %296 = arith.mulf %295, %293 : vector<1x256xf32>
    %297 = arith.addf %282, %296 : vector<1x256xf32>
    %c32 = arith.constant 32 : index
    %298 = memref.load %arg4[%c32] : memref<81xf32, #tpu.memory_space<smem>>
    %299 = vector.broadcast %298 : f32 to vector<1x256xf32>
    %300 = arith.mulf %299, %293 : vector<1x256xf32>
    %301 = arith.addf %286, %300 : vector<1x256xf32>
    %c59 = arith.constant 59 : index
    %302 = memref.load %arg4[%c59] : memref<81xf32, #tpu.memory_space<smem>>
    %303 = vector.broadcast %302 : f32 to vector<1x256xf32>
    %304 = arith.mulf %303, %293 : vector<1x256xf32>
    %305 = arith.addf %290, %304 : vector<1x256xf32>
    %c255_i32_50 = arith.constant 255 : i32
    %306 = tpu.dynamic_rotate %53 by %c255_i32_50 dim 1 : vector<1x256xf32>, i32 -> vector<1x256xf32>
    %307 = arith.mulf %291, %306 : vector<1x256xf32>
    %c14 = arith.constant 14 : index
    %308 = memref.load %arg4[%c14] : memref<81xf32, #tpu.memory_space<smem>>
    %309 = vector.broadcast %308 : f32 to vector<1x256xf32>
    %310 = arith.mulf %309, %307 : vector<1x256xf32>
    %311 = arith.addf %297, %310 : vector<1x256xf32>
    %c41 = arith.constant 41 : index
    %312 = memref.load %arg4[%c41] : memref<81xf32, #tpu.memory_space<smem>>
    %313 = vector.broadcast %312 : f32 to vector<1x256xf32>
    %314 = arith.mulf %313, %307 : vector<1x256xf32>
    %315 = arith.addf %301, %314 : vector<1x256xf32>
    %c68 = arith.constant 68 : index
    %316 = memref.load %arg4[%c68] : memref<81xf32, #tpu.memory_space<smem>>
    %317 = vector.broadcast %316 : f32 to vector<1x256xf32>
    %318 = arith.mulf %317, %307 : vector<1x256xf32>
    %319 = arith.addf %305, %318 : vector<1x256xf32>
    %c255_i32_51 = arith.constant 255 : i32
    %320 = tpu.dynamic_rotate %76 by %c255_i32_51 dim 1 : vector<1x256xf32>, i32 -> vector<1x256xf32>
    %321 = arith.mulf %291, %320 : vector<1x256xf32>
    %c23 = arith.constant 23 : index
    %322 = memref.load %arg4[%c23] : memref<81xf32, #tpu.memory_space<smem>>
    %323 = vector.broadcast %322 : f32 to vector<1x256xf32>
    %324 = arith.mulf %323, %321 : vector<1x256xf32>
    %325 = arith.addf %311, %324 : vector<1x256xf32>
    %c50 = arith.constant 50 : index
    %326 = memref.load %arg4[%c50] : memref<81xf32, #tpu.memory_space<smem>>
    %327 = vector.broadcast %326 : f32 to vector<1x256xf32>
    %328 = arith.mulf %327, %321 : vector<1x256xf32>
    %329 = arith.addf %315, %328 : vector<1x256xf32>
    %c77 = arith.constant 77 : index
    %330 = memref.load %arg4[%c77] : memref<81xf32, #tpu.memory_space<smem>>
    %331 = vector.broadcast %330 : f32 to vector<1x256xf32>
    %332 = arith.mulf %331, %321 : vector<1x256xf32>
    %333 = arith.addf %319, %332 : vector<1x256xf32>
    %c6_52 = arith.constant 6 : index
    %c0_53 = arith.constant 0 : index
    %334 = vector.load %arg1[%c6_52, %c0_53] : memref<9x256xf32, #tpu.memory_space<vmem>>, vector<1x256xf32>
    %c241_i32 = arith.constant 241 : i32
    %335 = tpu.dynamic_rotate %30 by %c241_i32 dim 1 : vector<1x256xf32>, i32 -> vector<1x256xf32>
    %336 = arith.mulf %334, %335 : vector<1x256xf32>
    %c6_54 = arith.constant 6 : index
    %337 = memref.load %arg4[%c6_54] : memref<81xf32, #tpu.memory_space<smem>>
    %338 = vector.broadcast %337 : f32 to vector<1x256xf32>
    %339 = arith.mulf %338, %336 : vector<1x256xf32>
    %340 = arith.addf %325, %339 : vector<1x256xf32>
    %c33 = arith.constant 33 : index
    %341 = memref.load %arg4[%c33] : memref<81xf32, #tpu.memory_space<smem>>
    %342 = vector.broadcast %341 : f32 to vector<1x256xf32>
    %343 = arith.mulf %342, %336 : vector<1x256xf32>
    %344 = arith.addf %329, %343 : vector<1x256xf32>
    %c60 = arith.constant 60 : index
    %345 = memref.load %arg4[%c60] : memref<81xf32, #tpu.memory_space<smem>>
    %346 = vector.broadcast %345 : f32 to vector<1x256xf32>
    %347 = arith.mulf %346, %336 : vector<1x256xf32>
    %348 = arith.addf %333, %347 : vector<1x256xf32>
    %c241_i32_55 = arith.constant 241 : i32
    %349 = tpu.dynamic_rotate %53 by %c241_i32_55 dim 1 : vector<1x256xf32>, i32 -> vector<1x256xf32>
    %350 = arith.mulf %334, %349 : vector<1x256xf32>
    %c15 = arith.constant 15 : index
    %351 = memref.load %arg4[%c15] : memref<81xf32, #tpu.memory_space<smem>>
    %352 = vector.broadcast %351 : f32 to vector<1x256xf32>
    %353 = arith.mulf %352, %350 : vector<1x256xf32>
    %354 = arith.addf %340, %353 : vector<1x256xf32>
    %c42 = arith.constant 42 : index
    %355 = memref.load %arg4[%c42] : memref<81xf32, #tpu.memory_space<smem>>
    %356 = vector.broadcast %355 : f32 to vector<1x256xf32>
    %357 = arith.mulf %356, %350 : vector<1x256xf32>
    %358 = arith.addf %344, %357 : vector<1x256xf32>
    %c69 = arith.constant 69 : index
    %359 = memref.load %arg4[%c69] : memref<81xf32, #tpu.memory_space<smem>>
    %360 = vector.broadcast %359 : f32 to vector<1x256xf32>
    %361 = arith.mulf %360, %350 : vector<1x256xf32>
    %362 = arith.addf %348, %361 : vector<1x256xf32>
    %c241_i32_56 = arith.constant 241 : i32
    %363 = tpu.dynamic_rotate %76 by %c241_i32_56 dim 1 : vector<1x256xf32>, i32 -> vector<1x256xf32>
    %364 = arith.mulf %334, %363 : vector<1x256xf32>
    %c24 = arith.constant 24 : index
    %365 = memref.load %arg4[%c24] : memref<81xf32, #tpu.memory_space<smem>>
    %366 = vector.broadcast %365 : f32 to vector<1x256xf32>
    %367 = arith.mulf %366, %364 : vector<1x256xf32>
    %368 = arith.addf %354, %367 : vector<1x256xf32>
    %c51 = arith.constant 51 : index
    %369 = memref.load %arg4[%c51] : memref<81xf32, #tpu.memory_space<smem>>
    %370 = vector.broadcast %369 : f32 to vector<1x256xf32>
    %371 = arith.mulf %370, %364 : vector<1x256xf32>
    %372 = arith.addf %358, %371 : vector<1x256xf32>
    %c78 = arith.constant 78 : index
    %373 = memref.load %arg4[%c78] : memref<81xf32, #tpu.memory_space<smem>>
    %374 = vector.broadcast %373 : f32 to vector<1x256xf32>
    %375 = arith.mulf %374, %364 : vector<1x256xf32>
    %376 = arith.addf %362, %375 : vector<1x256xf32>
    %c7_57 = arith.constant 7 : index
    %c0_58 = arith.constant 0 : index
    %377 = vector.load %arg1[%c7_57, %c0_58] : memref<9x256xf32, #tpu.memory_space<vmem>>, vector<1x256xf32>
    %c240_i32 = arith.constant 240 : i32
    %378 = tpu.dynamic_rotate %30 by %c240_i32 dim 1 : vector<1x256xf32>, i32 -> vector<1x256xf32>
    %379 = arith.mulf %377, %378 : vector<1x256xf32>
    %c7_59 = arith.constant 7 : index
    %380 = memref.load %arg4[%c7_59] : memref<81xf32, #tpu.memory_space<smem>>
    %381 = vector.broadcast %380 : f32 to vector<1x256xf32>
    %382 = arith.mulf %381, %379 : vector<1x256xf32>
    %383 = arith.addf %368, %382 : vector<1x256xf32>
    %c34 = arith.constant 34 : index
    %384 = memref.load %arg4[%c34] : memref<81xf32, #tpu.memory_space<smem>>
    %385 = vector.broadcast %384 : f32 to vector<1x256xf32>
    %386 = arith.mulf %385, %379 : vector<1x256xf32>
    %387 = arith.addf %372, %386 : vector<1x256xf32>
    %c61 = arith.constant 61 : index
    %388 = memref.load %arg4[%c61] : memref<81xf32, #tpu.memory_space<smem>>
    %389 = vector.broadcast %388 : f32 to vector<1x256xf32>
    %390 = arith.mulf %389, %379 : vector<1x256xf32>
    %391 = arith.addf %376, %390 : vector<1x256xf32>
    %c240_i32_60 = arith.constant 240 : i32
    %392 = tpu.dynamic_rotate %53 by %c240_i32_60 dim 1 : vector<1x256xf32>, i32 -> vector<1x256xf32>
    %393 = arith.mulf %377, %392 : vector<1x256xf32>
    %c16 = arith.constant 16 : index
    %394 = memref.load %arg4[%c16] : memref<81xf32, #tpu.memory_space<smem>>
    %395 = vector.broadcast %394 : f32 to vector<1x256xf32>
    %396 = arith.mulf %395, %393 : vector<1x256xf32>
    %397 = arith.addf %383, %396 : vector<1x256xf32>
    %c43 = arith.constant 43 : index
    %398 = memref.load %arg4[%c43] : memref<81xf32, #tpu.memory_space<smem>>
    %399 = vector.broadcast %398 : f32 to vector<1x256xf32>
    %400 = arith.mulf %399, %393 : vector<1x256xf32>
    %401 = arith.addf %387, %400 : vector<1x256xf32>
    %c70 = arith.constant 70 : index
    %402 = memref.load %arg4[%c70] : memref<81xf32, #tpu.memory_space<smem>>
    %403 = vector.broadcast %402 : f32 to vector<1x256xf32>
    %404 = arith.mulf %403, %393 : vector<1x256xf32>
    %405 = arith.addf %391, %404 : vector<1x256xf32>
    %c240_i32_61 = arith.constant 240 : i32
    %406 = tpu.dynamic_rotate %76 by %c240_i32_61 dim 1 : vector<1x256xf32>, i32 -> vector<1x256xf32>
    %407 = arith.mulf %377, %406 : vector<1x256xf32>
    %c25 = arith.constant 25 : index
    %408 = memref.load %arg4[%c25] : memref<81xf32, #tpu.memory_space<smem>>
    %409 = vector.broadcast %408 : f32 to vector<1x256xf32>
    %410 = arith.mulf %409, %407 : vector<1x256xf32>
    %411 = arith.addf %397, %410 : vector<1x256xf32>
    %c52 = arith.constant 52 : index
    %412 = memref.load %arg4[%c52] : memref<81xf32, #tpu.memory_space<smem>>
    %413 = vector.broadcast %412 : f32 to vector<1x256xf32>
    %414 = arith.mulf %413, %407 : vector<1x256xf32>
    %415 = arith.addf %401, %414 : vector<1x256xf32>
    %c79 = arith.constant 79 : index
    %416 = memref.load %arg4[%c79] : memref<81xf32, #tpu.memory_space<smem>>
    %417 = vector.broadcast %416 : f32 to vector<1x256xf32>
    %418 = arith.mulf %417, %407 : vector<1x256xf32>
    %419 = arith.addf %405, %418 : vector<1x256xf32>
    %c8_62 = arith.constant 8 : index
    %c0_63 = arith.constant 0 : index
    %420 = vector.load %arg1[%c8_62, %c0_63] : memref<9x256xf32, #tpu.memory_space<vmem>>, vector<1x256xf32>
    %c239_i32 = arith.constant 239 : i32
    %421 = tpu.dynamic_rotate %30 by %c239_i32 dim 1 : vector<1x256xf32>, i32 -> vector<1x256xf32>
    %422 = arith.mulf %420, %421 : vector<1x256xf32>
    %c8_64 = arith.constant 8 : index
    %423 = memref.load %arg4[%c8_64] : memref<81xf32, #tpu.memory_space<smem>>
    %424 = vector.broadcast %423 : f32 to vector<1x256xf32>
    %425 = arith.mulf %424, %422 : vector<1x256xf32>
    %426 = arith.addf %411, %425 : vector<1x256xf32>
    %c35 = arith.constant 35 : index
    %427 = memref.load %arg4[%c35] : memref<81xf32, #tpu.memory_space<smem>>
    %428 = vector.broadcast %427 : f32 to vector<1x256xf32>
    %429 = arith.mulf %428, %422 : vector<1x256xf32>
    %430 = arith.addf %415, %429 : vector<1x256xf32>
    %c62 = arith.constant 62 : index
    %431 = memref.load %arg4[%c62] : memref<81xf32, #tpu.memory_space<smem>>
    %432 = vector.broadcast %431 : f32 to vector<1x256xf32>
    %433 = arith.mulf %432, %422 : vector<1x256xf32>
    %434 = arith.addf %419, %433 : vector<1x256xf32>
    %c239_i32_65 = arith.constant 239 : i32
    %435 = tpu.dynamic_rotate %53 by %c239_i32_65 dim 1 : vector<1x256xf32>, i32 -> vector<1x256xf32>
    %436 = arith.mulf %420, %435 : vector<1x256xf32>
    %c17 = arith.constant 17 : index
    %437 = memref.load %arg4[%c17] : memref<81xf32, #tpu.memory_space<smem>>
    %438 = vector.broadcast %437 : f32 to vector<1x256xf32>
    %439 = arith.mulf %438, %436 : vector<1x256xf32>
    %440 = arith.addf %426, %439 : vector<1x256xf32>
    %c44 = arith.constant 44 : index
    %441 = memref.load %arg4[%c44] : memref<81xf32, #tpu.memory_space<smem>>
    %442 = vector.broadcast %441 : f32 to vector<1x256xf32>
    %443 = arith.mulf %442, %436 : vector<1x256xf32>
    %444 = arith.addf %430, %443 : vector<1x256xf32>
    %c71 = arith.constant 71 : index
    %445 = memref.load %arg4[%c71] : memref<81xf32, #tpu.memory_space<smem>>
    %446 = vector.broadcast %445 : f32 to vector<1x256xf32>
    %447 = arith.mulf %446, %436 : vector<1x256xf32>
    %448 = arith.addf %434, %447 : vector<1x256xf32>
    %c239_i32_66 = arith.constant 239 : i32
    %449 = tpu.dynamic_rotate %76 by %c239_i32_66 dim 1 : vector<1x256xf32>, i32 -> vector<1x256xf32>
    %450 = arith.mulf %420, %449 : vector<1x256xf32>
    %c26 = arith.constant 26 : index
    %451 = memref.load %arg4[%c26] : memref<81xf32, #tpu.memory_space<smem>>
    %452 = vector.broadcast %451 : f32 to vector<1x256xf32>
    %453 = arith.mulf %452, %450 : vector<1x256xf32>
    %454 = arith.addf %440, %453 : vector<1x256xf32>
    %c53 = arith.constant 53 : index
    %455 = memref.load %arg4[%c53] : memref<81xf32, #tpu.memory_space<smem>>
    %456 = vector.broadcast %455 : f32 to vector<1x256xf32>
    %457 = arith.mulf %456, %450 : vector<1x256xf32>
    %458 = arith.addf %444, %457 : vector<1x256xf32>
    %c80 = arith.constant 80 : index
    %459 = memref.load %arg4[%c80] : memref<81xf32, #tpu.memory_space<smem>>
    %460 = vector.broadcast %459 : f32 to vector<1x256xf32>
    %461 = arith.mulf %460, %450 : vector<1x256xf32>
    %462 = arith.addf %448, %461 : vector<1x256xf32>
    %cst_67 = arith.constant 0.000000e+00 : f32
    %463 = vector.broadcast %cst_67 : f32 to vector<1x256xf32>
    %464 = arith.cmpf ogt, %454, %463 : vector<1x256xf32>
    %cst_68 = arith.constant 2.000000e-01 : f32
    %465 = vector.broadcast %cst_68 : f32 to vector<1x256xf32>
    %466 = arith.mulf %465, %454 : vector<1x256xf32>
    %467 = arith.select %464, %454, %466 : vector<1x256xi1>, vector<1x256xf32>
    %cst_69 = arith.constant 0.000000e+00 : f32
    %468 = vector.broadcast %cst_69 : f32 to vector<1x256xf32>
    %469 = arith.cmpf ogt, %458, %468 : vector<1x256xf32>
    %cst_70 = arith.constant 2.000000e-01 : f32
    %470 = vector.broadcast %cst_70 : f32 to vector<1x256xf32>
    %471 = arith.mulf %470, %458 : vector<1x256xf32>
    %472 = arith.select %469, %458, %471 : vector<1x256xi1>, vector<1x256xf32>
    %cst_71 = arith.constant 0.000000e+00 : f32
    %473 = vector.broadcast %cst_71 : f32 to vector<1x256xf32>
    %474 = arith.cmpf ogt, %462, %473 : vector<1x256xf32>
    %cst_72 = arith.constant 2.000000e-01 : f32
    %475 = vector.broadcast %cst_72 : f32 to vector<1x256xf32>
    %476 = arith.mulf %475, %462 : vector<1x256xf32>
    %477 = arith.select %474, %462, %476 : vector<1x256xi1>, vector<1x256xf32>
    %c0_73 = arith.constant 0 : index
    %c0_74 = arith.constant 0 : index
    %478 = vector.load %arg7[%c0_73, %c0_74] : memref<8x1xf32, #tpu.memory_space<vmem>>, vector<8x1xf32>
    %479 = vector.shape_cast %478 : vector<8x1xf32> to vector<8x1xf32>
    %480 = vector.broadcast %479 : vector<8x1xf32> to vector<8x256xf32>
    %c0_75 = arith.constant 0 : index
    %c0_76 = arith.constant 0 : index
    %481 = vector.load %arg6[%c0_75, %c0_76] : memref<8x3xf32, #tpu.memory_space<vmem>>, vector<8x1xf32>
    %482 = vector.shape_cast %467 : vector<1x256xf32> to vector<1x256xf32>
    %483 = vector.broadcast %482 : vector<1x256xf32> to vector<8x256xf32>
    %484 = vector.broadcast %481 : vector<8x1xf32> to vector<8x256xf32>
    %485 = arith.mulf %484, %483 : vector<8x256xf32>
    %486 = arith.addf %480, %485 : vector<8x256xf32>
    %c0_77 = arith.constant 0 : index
    %c1_78 = arith.constant 1 : index
    %487 = vector.load %arg6[%c0_77, %c1_78] : memref<8x3xf32, #tpu.memory_space<vmem>>, vector<8x1xf32>
    %488 = vector.shape_cast %472 : vector<1x256xf32> to vector<1x256xf32>
    %489 = vector.broadcast %488 : vector<1x256xf32> to vector<8x256xf32>
    %490 = vector.broadcast %487 : vector<8x1xf32> to vector<8x256xf32>
    %491 = arith.mulf %490, %489 : vector<8x256xf32>
    %492 = arith.addf %486, %491 : vector<8x256xf32>
    %c0_79 = arith.constant 0 : index
    %c2_80 = arith.constant 2 : index
    %493 = vector.load %arg6[%c0_79, %c2_80] : memref<8x3xf32, #tpu.memory_space<vmem>>, vector<8x1xf32>
    %494 = vector.shape_cast %477 : vector<1x256xf32> to vector<1x256xf32>
    %495 = vector.broadcast %494 : vector<1x256xf32> to vector<8x256xf32>
    %496 = vector.broadcast %493 : vector<8x1xf32> to vector<8x256xf32>
    %497 = arith.mulf %496, %495 : vector<8x256xf32>
    %498 = arith.addf %492, %497 : vector<8x256xf32>
    %c0_81 = arith.constant 0 : index
    %c0_82 = arith.constant 0 : index
    %c0_83 = arith.constant 0 : index
    %499 = vector.load %arg0[%c0_81, %c0_82, %c0_83] : memref<2x4x256xf32, #tpu.memory_space<vmem>>, vector<1x1x256xf32>
    %500 = vector.shape_cast %499 : vector<1x1x256xf32> to vector<1x256xf32>
    %c0_84 = arith.constant 0 : index
    %c0_85 = arith.constant 0 : index
    %501 = vector.load %arg8[%c0_84, %c0_85] : memref<8x4xf32, #tpu.memory_space<vmem>>, vector<8x1xf32>
    %502 = vector.shape_cast %500 : vector<1x256xf32> to vector<1x256xf32>
    %503 = vector.broadcast %502 : vector<1x256xf32> to vector<8x256xf32>
    %504 = vector.broadcast %501 : vector<8x1xf32> to vector<8x256xf32>
    %505 = arith.mulf %504, %503 : vector<8x256xf32>
    %506 = arith.addf %498, %505 : vector<8x256xf32>
    %c0_86 = arith.constant 0 : index
    %c1_87 = arith.constant 1 : index
    %c0_88 = arith.constant 0 : index
    %507 = vector.load %arg0[%c0_86, %c1_87, %c0_88] : memref<2x4x256xf32, #tpu.memory_space<vmem>>, vector<1x1x256xf32>
    %508 = vector.shape_cast %507 : vector<1x1x256xf32> to vector<1x256xf32>
    %c0_89 = arith.constant 0 : index
    %c1_90 = arith.constant 1 : index
    %509 = vector.load %arg8[%c0_89, %c1_90] : memref<8x4xf32, #tpu.memory_space<vmem>>, vector<8x1xf32>
    %510 = vector.shape_cast %508 : vector<1x256xf32> to vector<1x256xf32>
    %511 = vector.broadcast %510 : vector<1x256xf32> to vector<8x256xf32>
    %512 = vector.broadcast %509 : vector<8x1xf32> to vector<8x256xf32>
    %513 = arith.mulf %512, %511 : vector<8x256xf32>
    %514 = arith.addf %506, %513 : vector<8x256xf32>
    %c0_91 = arith.constant 0 : index
    %c2_92 = arith.constant 2 : index
    %c0_93 = arith.constant 0 : index
    %515 = vector.load %arg0[%c0_91, %c2_92, %c0_93] : memref<2x4x256xf32, #tpu.memory_space<vmem>>, vector<1x1x256xf32>
    %516 = vector.shape_cast %515 : vector<1x1x256xf32> to vector<1x256xf32>
    %c0_94 = arith.constant 0 : index
    %c2_95 = arith.constant 2 : index
    %517 = vector.load %arg8[%c0_94, %c2_95] : memref<8x4xf32, #tpu.memory_space<vmem>>, vector<8x1xf32>
    %518 = vector.shape_cast %516 : vector<1x256xf32> to vector<1x256xf32>
    %519 = vector.broadcast %518 : vector<1x256xf32> to vector<8x256xf32>
    %520 = vector.broadcast %517 : vector<8x1xf32> to vector<8x256xf32>
    %521 = arith.mulf %520, %519 : vector<8x256xf32>
    %522 = arith.addf %514, %521 : vector<8x256xf32>
    %c0_96 = arith.constant 0 : index
    %c3_97 = arith.constant 3 : index
    %c0_98 = arith.constant 0 : index
    %523 = vector.load %arg0[%c0_96, %c3_97, %c0_98] : memref<2x4x256xf32, #tpu.memory_space<vmem>>, vector<1x1x256xf32>
    %524 = vector.shape_cast %523 : vector<1x1x256xf32> to vector<1x256xf32>
    %c0_99 = arith.constant 0 : index
    %c3_100 = arith.constant 3 : index
    %525 = vector.load %arg8[%c0_99, %c3_100] : memref<8x4xf32, #tpu.memory_space<vmem>>, vector<8x1xf32>
    %526 = vector.shape_cast %524 : vector<1x256xf32> to vector<1x256xf32>
    %527 = vector.broadcast %526 : vector<1x256xf32> to vector<8x256xf32>
    %528 = vector.broadcast %525 : vector<8x1xf32> to vector<8x256xf32>
    %529 = arith.mulf %528, %527 : vector<8x256xf32>
    %530 = arith.addf %522, %529 : vector<8x256xf32>
    %cst_101 = arith.constant 0.000000e+00 : f32
    %531 = vector.broadcast %cst_101 : f32 to vector<8x256xf32>
    %532 = arith.cmpf ogt, %530, %531 : vector<8x256xf32>
    %cst_102 = arith.constant 2.000000e-01 : f32
    %533 = vector.broadcast %cst_102 : f32 to vector<8x256xf32>
    %534 = arith.mulf %533, %530 : vector<8x256xf32>
    %535 = arith.select %532, %530, %534 : vector<8x256xi1>, vector<8x256xf32>
    %c0_103 = arith.constant 0 : index
    %c0_104 = arith.constant 0 : index
    %c0_105 = arith.constant 0 : index
    %536 = vector.load %arg9[%c0_103, %c0_104, %c0_105] : memref<2x8x256xf32, #tpu.memory_space<vmem>>, vector<1x8x256xf32>
    %537 = vector.shape_cast %536 : vector<1x8x256xf32> to vector<8x256xf32>
    %538 = vector.shape_cast %535 : vector<8x256xf32> to vector<1x8x256xf32>
    tpu.vector_store %arg9[%c0_103, %c0_104, %c0_105], %538 {strides = array<i32>} : memref<2x8x256xf32, #tpu.memory_space<vmem>>, vector<1x8x256xf32>,
    %c1_106 = arith.constant 1 : index
    %c0_107 = arith.constant 0 : index
    %c0_108 = arith.constant 0 : index
    %539 = vector.load %arg0[%c1_106, %c0_107, %c0_108] : memref<2x4x256xf32, #tpu.memory_space<vmem>>, vector<1x1x256xf32>
    %540 = vector.shape_cast %539 : vector<1x1x256xf32> to vector<1x256xf32>
    %c1_109 = arith.constant 1 : index
    %c1_110 = arith.constant 1 : index
    %c0_111 = arith.constant 0 : index
    %541 = vector.load %arg0[%c1_109, %c1_110, %c0_111] : memref<2x4x256xf32, #tpu.memory_space<vmem>>, vector<1x1x256xf32>
    %542 = vector.shape_cast %541 : vector<1x1x256xf32> to vector<1x256xf32>
    %c1_112 = arith.constant 1 : index
    %c2_113 = arith.constant 2 : index
    %c0_114 = arith.constant 0 : index
    %543 = vector.load %arg0[%c1_112, %c2_113, %c0_114] : memref<2x4x256xf32, #tpu.memory_space<vmem>>, vector<1x1x256xf32>
    %544 = vector.shape_cast %543 : vector<1x1x256xf32> to vector<1x256xf32>
    %c1_115 = arith.constant 1 : index
    %c3_116 = arith.constant 3 : index
    %c0_117 = arith.constant 0 : index
    %545 = vector.load %arg0[%c1_115, %c3_116, %c0_117] : memref<2x4x256xf32, #tpu.memory_space<vmem>>, vector<1x1x256xf32>
    %546 = vector.shape_cast %545 : vector<1x1x256xf32> to vector<1x256xf32>
    %c0_118 = arith.constant 0 : index
    %547 = memref.load %arg3[%c0_118] : memref<3xf32, #tpu.memory_space<smem>>
    %548 = vector.broadcast %547 : f32 to vector<1x256xf32>
    %c0_119 = arith.constant 0 : index
    %549 = memref.load %arg2[%c0_119] : memref<12xf32, #tpu.memory_space<smem>>
    %550 = vector.broadcast %549 : f32 to vector<1x256xf32>
    %551 = arith.mulf %550, %540 : vector<1x256xf32>
    %552 = arith.addf %548, %551 : vector<1x256xf32>
    %c1_120 = arith.constant 1 : index
    %553 = memref.load %arg2[%c1_120] : memref<12xf32, #tpu.memory_space<smem>>
    %554 = vector.broadcast %553 : f32 to vector<1x256xf32>
    %555 = arith.mulf %554, %542 : vector<1x256xf32>
    %556 = arith.addf %552, %555 : vector<1x256xf32>
    %c2_121 = arith.constant 2 : index
    %557 = memref.load %arg2[%c2_121] : memref<12xf32, #tpu.memory_space<smem>>
    %558 = vector.broadcast %557 : f32 to vector<1x256xf32>
    %559 = arith.mulf %558, %544 : vector<1x256xf32>
    %560 = arith.addf %556, %559 : vector<1x256xf32>
    %c3_122 = arith.constant 3 : index
    %561 = memref.load %arg2[%c3_122] : memref<12xf32, #tpu.memory_space<smem>>
    %562 = vector.broadcast %561 : f32 to vector<1x256xf32>
    %563 = arith.mulf %562, %546 : vector<1x256xf32>
    %564 = arith.addf %560, %563 : vector<1x256xf32>
    %cst_123 = arith.constant 0.000000e+00 : f32
    %565 = vector.broadcast %cst_123 : f32 to vector<1x256xf32>
    %566 = arith.cmpf ogt, %564, %565 : vector<1x256xf32>
    %cst_124 = arith.constant 2.000000e-01 : f32
    %567 = vector.broadcast %cst_124 : f32 to vector<1x256xf32>
    %568 = arith.mulf %567, %564 : vector<1x256xf32>
    %569 = arith.select %566, %564, %568 : vector<1x256xi1>, vector<1x256xf32>
    %c1_125 = arith.constant 1 : index
    %570 = memref.load %arg3[%c1_125] : memref<3xf32, #tpu.memory_space<smem>>
    %571 = vector.broadcast %570 : f32 to vector<1x256xf32>
    %c4_126 = arith.constant 4 : index
    %572 = memref.load %arg2[%c4_126] : memref<12xf32, #tpu.memory_space<smem>>
    %573 = vector.broadcast %572 : f32 to vector<1x256xf32>
    %574 = arith.mulf %573, %540 : vector<1x256xf32>
    %575 = arith.addf %571, %574 : vector<1x256xf32>
    %c5_127 = arith.constant 5 : index
    %576 = memref.load %arg2[%c5_127] : memref<12xf32, #tpu.memory_space<smem>>
    %577 = vector.broadcast %576 : f32 to vector<1x256xf32>
    %578 = arith.mulf %577, %542 : vector<1x256xf32>
    %579 = arith.addf %575, %578 : vector<1x256xf32>
    %c6_128 = arith.constant 6 : index
    %580 = memref.load %arg2[%c6_128] : memref<12xf32, #tpu.memory_space<smem>>
    %581 = vector.broadcast %580 : f32 to vector<1x256xf32>
    %582 = arith.mulf %581, %544 : vector<1x256xf32>
    %583 = arith.addf %579, %582 : vector<1x256xf32>
    %c7_129 = arith.constant 7 : index
    %584 = memref.load %arg2[%c7_129] : memref<12xf32, #tpu.memory_space<smem>>
    %585 = vector.broadcast %584 : f32 to vector<1x256xf32>
    %586 = arith.mulf %585, %546 : vector<1x256xf32>
    %587 = arith.addf %583, %586 : vector<1x256xf32>
    %cst_130 = arith.constant 0.000000e+00 : f32
    %588 = vector.broadcast %cst_130 : f32 to vector<1x256xf32>
    %589 = arith.cmpf ogt, %587, %588 : vector<1x256xf32>
    %cst_131 = arith.constant 2.000000e-01 : f32
    %590 = vector.broadcast %cst_131 : f32 to vector<1x256xf32>
    %591 = arith.mulf %590, %587 : vector<1x256xf32>
    %592 = arith.select %589, %587, %591 : vector<1x256xi1>, vector<1x256xf32>
    %c2_132 = arith.constant 2 : index
    %593 = memref.load %arg3[%c2_132] : memref<3xf32, #tpu.memory_space<smem>>
    %594 = vector.broadcast %593 : f32 to vector<1x256xf32>
    %c8_133 = arith.constant 8 : index
    %595 = memref.load %arg2[%c8_133] : memref<12xf32, #tpu.memory_space<smem>>
    %596 = vector.broadcast %595 : f32 to vector<1x256xf32>
    %597 = arith.mulf %596, %540 : vector<1x256xf32>
    %598 = arith.addf %594, %597 : vector<1x256xf32>
    %c9_134 = arith.constant 9 : index
    %599 = memref.load %arg2[%c9_134] : memref<12xf32, #tpu.memory_space<smem>>
    %600 = vector.broadcast %599 : f32 to vector<1x256xf32>
    %601 = arith.mulf %600, %542 : vector<1x256xf32>
    %602 = arith.addf %598, %601 : vector<1x256xf32>
    %c10_135 = arith.constant 10 : index
    %603 = memref.load %arg2[%c10_135] : memref<12xf32, #tpu.memory_space<smem>>
    %604 = vector.broadcast %603 : f32 to vector<1x256xf32>
    %605 = arith.mulf %604, %544 : vector<1x256xf32>
    %606 = arith.addf %602, %605 : vector<1x256xf32>
    %c11_136 = arith.constant 11 : index
    %607 = memref.load %arg2[%c11_136] : memref<12xf32, #tpu.memory_space<smem>>
    %608 = vector.broadcast %607 : f32 to vector<1x256xf32>
    %609 = arith.mulf %608, %546 : vector<1x256xf32>
    %610 = arith.addf %606, %609 : vector<1x256xf32>
    %cst_137 = arith.constant 0.000000e+00 : f32
    %611 = vector.broadcast %cst_137 : f32 to vector<1x256xf32>
    %612 = arith.cmpf ogt, %610, %611 : vector<1x256xf32>
    %cst_138 = arith.constant 2.000000e-01 : f32
    %613 = vector.broadcast %cst_138 : f32 to vector<1x256xf32>
    %614 = arith.mulf %613, %610 : vector<1x256xf32>
    %615 = arith.select %612, %610, %614 : vector<1x256xi1>, vector<1x256xf32>
    %c0_139 = arith.constant 0 : index
    %616 = memref.load %arg5[%c0_139] : memref<3xf32, #tpu.memory_space<smem>>
    %617 = vector.broadcast %616 : f32 to vector<1x256xf32>
    %c1_140 = arith.constant 1 : index
    %618 = memref.load %arg5[%c1_140] : memref<3xf32, #tpu.memory_space<smem>>
    %619 = vector.broadcast %618 : f32 to vector<1x256xf32>
    %c2_141 = arith.constant 2 : index
    %620 = memref.load %arg5[%c2_141] : memref<3xf32, #tpu.memory_space<smem>>
    %621 = vector.broadcast %620 : f32 to vector<1x256xf32>
    %c0_142 = arith.constant 0 : index
    %c0_143 = arith.constant 0 : index
    %622 = vector.load %arg1[%c0_142, %c0_143] : memref<9x256xf32, #tpu.memory_space<vmem>>, vector<1x256xf32>
    %c17_i32_144 = arith.constant 17 : i32
    %623 = tpu.dynamic_rotate %569 by %c17_i32_144 dim 1 : vector<1x256xf32>, i32 -> vector<1x256xf32>
    %624 = arith.mulf %622, %623 : vector<1x256xf32>
    %c0_145 = arith.constant 0 : index
    %625 = memref.load %arg4[%c0_145] : memref<81xf32, #tpu.memory_space<smem>>
    %626 = vector.broadcast %625 : f32 to vector<1x256xf32>
    %627 = arith.mulf %626, %624 : vector<1x256xf32>
    %628 = arith.addf %617, %627 : vector<1x256xf32>
    %c27_146 = arith.constant 27 : index
    %629 = memref.load %arg4[%c27_146] : memref<81xf32, #tpu.memory_space<smem>>
    %630 = vector.broadcast %629 : f32 to vector<1x256xf32>
    %631 = arith.mulf %630, %624 : vector<1x256xf32>
    %632 = arith.addf %619, %631 : vector<1x256xf32>
    %c54_147 = arith.constant 54 : index
    %633 = memref.load %arg4[%c54_147] : memref<81xf32, #tpu.memory_space<smem>>
    %634 = vector.broadcast %633 : f32 to vector<1x256xf32>
    %635 = arith.mulf %634, %624 : vector<1x256xf32>
    %636 = arith.addf %621, %635 : vector<1x256xf32>
    %c17_i32_148 = arith.constant 17 : i32
    %637 = tpu.dynamic_rotate %592 by %c17_i32_148 dim 1 : vector<1x256xf32>, i32 -> vector<1x256xf32>
    %638 = arith.mulf %622, %637 : vector<1x256xf32>
    %c9_149 = arith.constant 9 : index
    %639 = memref.load %arg4[%c9_149] : memref<81xf32, #tpu.memory_space<smem>>
    %640 = vector.broadcast %639 : f32 to vector<1x256xf32>
    %641 = arith.mulf %640, %638 : vector<1x256xf32>
    %642 = arith.addf %628, %641 : vector<1x256xf32>
    %c36_150 = arith.constant 36 : index
    %643 = memref.load %arg4[%c36_150] : memref<81xf32, #tpu.memory_space<smem>>
    %644 = vector.broadcast %643 : f32 to vector<1x256xf32>
    %645 = arith.mulf %644, %638 : vector<1x256xf32>
    %646 = arith.addf %632, %645 : vector<1x256xf32>
    %c63_151 = arith.constant 63 : index
    %647 = memref.load %arg4[%c63_151] : memref<81xf32, #tpu.memory_space<smem>>
    %648 = vector.broadcast %647 : f32 to vector<1x256xf32>
    %649 = arith.mulf %648, %638 : vector<1x256xf32>
    %650 = arith.addf %636, %649 : vector<1x256xf32>
    %c17_i32_152 = arith.constant 17 : i32
    %651 = tpu.dynamic_rotate %615 by %c17_i32_152 dim 1 : vector<1x256xf32>, i32 -> vector<1x256xf32>
    %652 = arith.mulf %622, %651 : vector<1x256xf32>
    %c18_153 = arith.constant 18 : index
    %653 = memref.load %arg4[%c18_153] : memref<81xf32, #tpu.memory_space<smem>>
    %654 = vector.broadcast %653 : f32 to vector<1x256xf32>
    %655 = arith.mulf %654, %652 : vector<1x256xf32>
    %656 = arith.addf %642, %655 : vector<1x256xf32>
    %c45_154 = arith.constant 45 : index
    %657 = memref.load %arg4[%c45_154] : memref<81xf32, #tpu.memory_space<smem>>
    %658 = vector.broadcast %657 : f32 to vector<1x256xf32>
    %659 = arith.mulf %658, %652 : vector<1x256xf32>
    %660 = arith.addf %646, %659 : vector<1x256xf32>
    %c72_155 = arith.constant 72 : index
    %661 = memref.load %arg4[%c72_155] : memref<81xf32, #tpu.memory_space<smem>>
    %662 = vector.broadcast %661 : f32 to vector<1x256xf32>
    %663 = arith.mulf %662, %652 : vector<1x256xf32>
    %664 = arith.addf %650, %663 : vector<1x256xf32>
    %c1_156 = arith.constant 1 : index
    %c0_157 = arith.constant 0 : index
    %665 = vector.load %arg1[%c1_156, %c0_157] : memref<9x256xf32, #tpu.memory_space<vmem>>, vector<1x256xf32>
    %c16_i32_158 = arith.constant 16 : i32
    %666 = tpu.dynamic_rotate %569 by %c16_i32_158 dim 1 : vector<1x256xf32>, i32 -> vector<1x256xf32>
    %667 = arith.mulf %665, %666 : vector<1x256xf32>
    %c1_159 = arith.constant 1 : index
    %668 = memref.load %arg4[%c1_159] : memref<81xf32, #tpu.memory_space<smem>>
    %669 = vector.broadcast %668 : f32 to vector<1x256xf32>
    %670 = arith.mulf %669, %667 : vector<1x256xf32>
    %671 = arith.addf %656, %670 : vector<1x256xf32>
    %c28_160 = arith.constant 28 : index
    %672 = memref.load %arg4[%c28_160] : memref<81xf32, #tpu.memory_space<smem>>
    %673 = vector.broadcast %672 : f32 to vector<1x256xf32>
    %674 = arith.mulf %673, %667 : vector<1x256xf32>
    %675 = arith.addf %660, %674 : vector<1x256xf32>
    %c55_161 = arith.constant 55 : index
    %676 = memref.load %arg4[%c55_161] : memref<81xf32, #tpu.memory_space<smem>>
    %677 = vector.broadcast %676 : f32 to vector<1x256xf32>
    %678 = arith.mulf %677, %667 : vector<1x256xf32>
    %679 = arith.addf %664, %678 : vector<1x256xf32>
    %c16_i32_162 = arith.constant 16 : i32
    %680 = tpu.dynamic_rotate %592 by %c16_i32_162 dim 1 : vector<1x256xf32>, i32 -> vector<1x256xf32>
    %681 = arith.mulf %665, %680 : vector<1x256xf32>
    %c10_163 = arith.constant 10 : index
    %682 = memref.load %arg4[%c10_163] : memref<81xf32, #tpu.memory_space<smem>>
    %683 = vector.broadcast %682 : f32 to vector<1x256xf32>
    %684 = arith.mulf %683, %681 : vector<1x256xf32>
    %685 = arith.addf %671, %684 : vector<1x256xf32>
    %c37_164 = arith.constant 37 : index
    %686 = memref.load %arg4[%c37_164] : memref<81xf32, #tpu.memory_space<smem>>
    %687 = vector.broadcast %686 : f32 to vector<1x256xf32>
    %688 = arith.mulf %687, %681 : vector<1x256xf32>
    %689 = arith.addf %675, %688 : vector<1x256xf32>
    %c64_165 = arith.constant 64 : index
    %690 = memref.load %arg4[%c64_165] : memref<81xf32, #tpu.memory_space<smem>>
    %691 = vector.broadcast %690 : f32 to vector<1x256xf32>
    %692 = arith.mulf %691, %681 : vector<1x256xf32>
    %693 = arith.addf %679, %692 : vector<1x256xf32>
    %c16_i32_166 = arith.constant 16 : i32
    %694 = tpu.dynamic_rotate %615 by %c16_i32_166 dim 1 : vector<1x256xf32>, i32 -> vector<1x256xf32>
    %695 = arith.mulf %665, %694 : vector<1x256xf32>
    %c19_167 = arith.constant 19 : index
    %696 = memref.load %arg4[%c19_167] : memref<81xf32, #tpu.memory_space<smem>>
    %697 = vector.broadcast %696 : f32 to vector<1x256xf32>
    %698 = arith.mulf %697, %695 : vector<1x256xf32>
    %699 = arith.addf %685, %698 : vector<1x256xf32>
    %c46_168 = arith.constant 46 : index
    %700 = memref.load %arg4[%c46_168] : memref<81xf32, #tpu.memory_space<smem>>
    %701 = vector.broadcast %700 : f32 to vector<1x256xf32>
    %702 = arith.mulf %701, %695 : vector<1x256xf32>
    %703 = arith.addf %689, %702 : vector<1x256xf32>
    %c73_169 = arith.constant 73 : index
    %704 = memref.load %arg4[%c73_169] : memref<81xf32, #tpu.memory_space<smem>>
    %705 = vector.broadcast %704 : f32 to vector<1x256xf32>
    %706 = arith.mulf %705, %695 : vector<1x256xf32>
    %707 = arith.addf %693, %706 : vector<1x256xf32>
    %c2_170 = arith.constant 2 : index
    %c0_171 = arith.constant 0 : index
    %708 = vector.load %arg1[%c2_170, %c0_171] : memref<9x256xf32, #tpu.memory_space<vmem>>, vector<1x256xf32>
    %c15_i32_172 = arith.constant 15 : i32
    %709 = tpu.dynamic_rotate %569 by %c15_i32_172 dim 1 : vector<1x256xf32>, i32 -> vector<1x256xf32>
    %710 = arith.mulf %708, %709 : vector<1x256xf32>
    %c2_173 = arith.constant 2 : index
    %711 = memref.load %arg4[%c2_173] : memref<81xf32, #tpu.memory_space<smem>>
    %712 = vector.broadcast %711 : f32 to vector<1x256xf32>
    %713 = arith.mulf %712, %710 : vector<1x256xf32>
    %714 = arith.addf %699, %713 : vector<1x256xf32>
    %c29_174 = arith.constant 29 : index
    %715 = memref.load %arg4[%c29_174] : memref<81xf32, #tpu.memory_space<smem>>
    %716 = vector.broadcast %715 : f32 to vector<1x256xf32>
    %717 = arith.mulf %716, %710 : vector<1x256xf32>
    %718 = arith.addf %703, %717 : vector<1x256xf32>
    %c56_175 = arith.constant 56 : index
    %719 = memref.load %arg4[%c56_175] : memref<81xf32, #tpu.memory_space<smem>>
    %720 = vector.broadcast %719 : f32 to vector<1x256xf32>
    %721 = arith.mulf %720, %710 : vector<1x256xf32>
    %722 = arith.addf %707, %721 : vector<1x256xf32>
    %c15_i32_176 = arith.constant 15 : i32
    %723 = tpu.dynamic_rotate %592 by %c15_i32_176 dim 1 : vector<1x256xf32>, i32 -> vector<1x256xf32>
    %724 = arith.mulf %708, %723 : vector<1x256xf32>
    %c11_177 = arith.constant 11 : index
    %725 = memref.load %arg4[%c11_177] : memref<81xf32, #tpu.memory_space<smem>>
    %726 = vector.broadcast %725 : f32 to vector<1x256xf32>
    %727 = arith.mulf %726, %724 : vector<1x256xf32>
    %728 = arith.addf %714, %727 : vector<1x256xf32>
    %c38_178 = arith.constant 38 : index
    %729 = memref.load %arg4[%c38_178] : memref<81xf32, #tpu.memory_space<smem>>
    %730 = vector.broadcast %729 : f32 to vector<1x256xf32>
    %731 = arith.mulf %730, %724 : vector<1x256xf32>
    %732 = arith.addf %718, %731 : vector<1x256xf32>
    %c65_179 = arith.constant 65 : index
    %733 = memref.load %arg4[%c65_179] : memref<81xf32, #tpu.memory_space<smem>>
    %734 = vector.broadcast %733 : f32 to vector<1x256xf32>
    %735 = arith.mulf %734, %724 : vector<1x256xf32>
    %736 = arith.addf %722, %735 : vector<1x256xf32>
    %c15_i32_180 = arith.constant 15 : i32
    %737 = tpu.dynamic_rotate %615 by %c15_i32_180 dim 1 : vector<1x256xf32>, i32 -> vector<1x256xf32>
    %738 = arith.mulf %708, %737 : vector<1x256xf32>
    %c20_181 = arith.constant 20 : index
    %739 = memref.load %arg4[%c20_181] : memref<81xf32, #tpu.memory_space<smem>>
    %740 = vector.broadcast %739 : f32 to vector<1x256xf32>
    %741 = arith.mulf %740, %738 : vector<1x256xf32>
    %742 = arith.addf %728, %741 : vector<1x256xf32>
    %c47_182 = arith.constant 47 : index
    %743 = memref.load %arg4[%c47_182] : memref<81xf32, #tpu.memory_space<smem>>
    %744 = vector.broadcast %743 : f32 to vector<1x256xf32>
    %745 = arith.mulf %744, %738 : vector<1x256xf32>
    %746 = arith.addf %732, %745 : vector<1x256xf32>
    %c74_183 = arith.constant 74 : index
    %747 = memref.load %arg4[%c74_183] : memref<81xf32, #tpu.memory_space<smem>>
    %748 = vector.broadcast %747 : f32 to vector<1x256xf32>
    %749 = arith.mulf %748, %738 : vector<1x256xf32>
    %750 = arith.addf %736, %749 : vector<1x256xf32>
    %c3_184 = arith.constant 3 : index
    %c0_185 = arith.constant 0 : index
    %751 = vector.load %arg1[%c3_184, %c0_185] : memref<9x256xf32, #tpu.memory_space<vmem>>, vector<1x256xf32>
    %c1_i32_186 = arith.constant 1 : i32
    %752 = tpu.dynamic_rotate %569 by %c1_i32_186 dim 1 : vector<1x256xf32>, i32 -> vector<1x256xf32>
    %753 = arith.mulf %751, %752 : vector<1x256xf32>
    %c3_187 = arith.constant 3 : index
    %754 = memref.load %arg4[%c3_187] : memref<81xf32, #tpu.memory_space<smem>>
    %755 = vector.broadcast %754 : f32 to vector<1x256xf32>
    %756 = arith.mulf %755, %753 : vector<1x256xf32>
    %757 = arith.addf %742, %756 : vector<1x256xf32>
    %c30_188 = arith.constant 30 : index
    %758 = memref.load %arg4[%c30_188] : memref<81xf32, #tpu.memory_space<smem>>
    %759 = vector.broadcast %758 : f32 to vector<1x256xf32>
    %760 = arith.mulf %759, %753 : vector<1x256xf32>
    %761 = arith.addf %746, %760 : vector<1x256xf32>
    %c57_189 = arith.constant 57 : index
    %762 = memref.load %arg4[%c57_189] : memref<81xf32, #tpu.memory_space<smem>>
    %763 = vector.broadcast %762 : f32 to vector<1x256xf32>
    %764 = arith.mulf %763, %753 : vector<1x256xf32>
    %765 = arith.addf %750, %764 : vector<1x256xf32>
    %c1_i32_190 = arith.constant 1 : i32
    %766 = tpu.dynamic_rotate %592 by %c1_i32_190 dim 1 : vector<1x256xf32>, i32 -> vector<1x256xf32>
    %767 = arith.mulf %751, %766 : vector<1x256xf32>
    %c12_191 = arith.constant 12 : index
    %768 = memref.load %arg4[%c12_191] : memref<81xf32, #tpu.memory_space<smem>>
    %769 = vector.broadcast %768 : f32 to vector<1x256xf32>
    %770 = arith.mulf %769, %767 : vector<1x256xf32>
    %771 = arith.addf %757, %770 : vector<1x256xf32>
    %c39_192 = arith.constant 39 : index
    %772 = memref.load %arg4[%c39_192] : memref<81xf32, #tpu.memory_space<smem>>
    %773 = vector.broadcast %772 : f32 to vector<1x256xf32>
    %774 = arith.mulf %773, %767 : vector<1x256xf32>
    %775 = arith.addf %761, %774 : vector<1x256xf32>
    %c66_193 = arith.constant 66 : index
    %776 = memref.load %arg4[%c66_193] : memref<81xf32, #tpu.memory_space<smem>>
    %777 = vector.broadcast %776 : f32 to vector<1x256xf32>
    %778 = arith.mulf %777, %767 : vector<1x256xf32>
    %779 = arith.addf %765, %778 : vector<1x256xf32>
    %c1_i32_194 = arith.constant 1 : i32
    %780 = tpu.dynamic_rotate %615 by %c1_i32_194 dim 1 : vector<1x256xf32>, i32 -> vector<1x256xf32>
    %781 = arith.mulf %751, %780 : vector<1x256xf32>
    %c21_195 = arith.constant 21 : index
    %782 = memref.load %arg4[%c21_195] : memref<81xf32, #tpu.memory_space<smem>>
    %783 = vector.broadcast %782 : f32 to vector<1x256xf32>
    %784 = arith.mulf %783, %781 : vector<1x256xf32>
    %785 = arith.addf %771, %784 : vector<1x256xf32>
    %c48_196 = arith.constant 48 : index
    %786 = memref.load %arg4[%c48_196] : memref<81xf32, #tpu.memory_space<smem>>
    %787 = vector.broadcast %786 : f32 to vector<1x256xf32>
    %788 = arith.mulf %787, %781 : vector<1x256xf32>
    %789 = arith.addf %775, %788 : vector<1x256xf32>
    %c75_197 = arith.constant 75 : index
    %790 = memref.load %arg4[%c75_197] : memref<81xf32, #tpu.memory_space<smem>>
    %791 = vector.broadcast %790 : f32 to vector<1x256xf32>
    %792 = arith.mulf %791, %781 : vector<1x256xf32>
    %793 = arith.addf %779, %792 : vector<1x256xf32>
    %c4_198 = arith.constant 4 : index
    %794 = memref.load %arg4[%c4_198] : memref<81xf32, #tpu.memory_space<smem>>
    %795 = vector.broadcast %794 : f32 to vector<1x256xf32>
    %796 = arith.mulf %795, %569 : vector<1x256xf32>
    %797 = arith.addf %785, %796 : vector<1x256xf32>
    %c31_199 = arith.constant 31 : index
    %798 = memref.load %arg4[%c31_199] : memref<81xf32, #tpu.memory_space<smem>>
    %799 = vector.broadcast %798 : f32 to vector<1x256xf32>
    %800 = arith.mulf %799, %569 : vector<1x256xf32>
    %801 = arith.addf %789, %800 : vector<1x256xf32>
    %c58_200 = arith.constant 58 : index
    %802 = memref.load %arg4[%c58_200] : memref<81xf32, #tpu.memory_space<smem>>
    %803 = vector.broadcast %802 : f32 to vector<1x256xf32>
    %804 = arith.mulf %803, %569 : vector<1x256xf32>
    %805 = arith.addf %793, %804 : vector<1x256xf32>
    %c13_201 = arith.constant 13 : index
    %806 = memref.load %arg4[%c13_201] : memref<81xf32, #tpu.memory_space<smem>>
    %807 = vector.broadcast %806 : f32 to vector<1x256xf32>
    %808 = arith.mulf %807, %592 : vector<1x256xf32>
    %809 = arith.addf %797, %808 : vector<1x256xf32>
    %c40_202 = arith.constant 40 : index
    %810 = memref.load %arg4[%c40_202] : memref<81xf32, #tpu.memory_space<smem>>
    %811 = vector.broadcast %810 : f32 to vector<1x256xf32>
    %812 = arith.mulf %811, %592 : vector<1x256xf32>
    %813 = arith.addf %801, %812 : vector<1x256xf32>
    %c67_203 = arith.constant 67 : index
    %814 = memref.load %arg4[%c67_203] : memref<81xf32, #tpu.memory_space<smem>>
    %815 = vector.broadcast %814 : f32 to vector<1x256xf32>
    %816 = arith.mulf %815, %592 : vector<1x256xf32>
    %817 = arith.addf %805, %816 : vector<1x256xf32>
    %c22_204 = arith.constant 22 : index
    %818 = memref.load %arg4[%c22_204] : memref<81xf32, #tpu.memory_space<smem>>
    %819 = vector.broadcast %818 : f32 to vector<1x256xf32>
    %820 = arith.mulf %819, %615 : vector<1x256xf32>
    %821 = arith.addf %809, %820 : vector<1x256xf32>
    %c49_205 = arith.constant 49 : index
    %822 = memref.load %arg4[%c49_205] : memref<81xf32, #tpu.memory_space<smem>>
    %823 = vector.broadcast %822 : f32 to vector<1x256xf32>
    %824 = arith.mulf %823, %615 : vector<1x256xf32>
    %825 = arith.addf %813, %824 : vector<1x256xf32>
    %c76_206 = arith.constant 76 : index
    %826 = memref.load %arg4[%c76_206] : memref<81xf32, #tpu.memory_space<smem>>
    %827 = vector.broadcast %826 : f32 to vector<1x256xf32>
    %828 = arith.mulf %827, %615 : vector<1x256xf32>
    %829 = arith.addf %817, %828 : vector<1x256xf32>
    %c5_207 = arith.constant 5 : index
    %c0_208 = arith.constant 0 : index
    %830 = vector.load %arg1[%c5_207, %c0_208] : memref<9x256xf32, #tpu.memory_space<vmem>>, vector<1x256xf32>
    %c255_i32_209 = arith.constant 255 : i32
    %831 = tpu.dynamic_rotate %569 by %c255_i32_209 dim 1 : vector<1x256xf32>, i32 -> vector<1x256xf32>
    %832 = arith.mulf %830, %831 : vector<1x256xf32>
    %c5_210 = arith.constant 5 : index
    %833 = memref.load %arg4[%c5_210] : memref<81xf32, #tpu.memory_space<smem>>
    %834 = vector.broadcast %833 : f32 to vector<1x256xf32>
    %835 = arith.mulf %834, %832 : vector<1x256xf32>
    %836 = arith.addf %821, %835 : vector<1x256xf32>
    %c32_211 = arith.constant 32 : index
    %837 = memref.load %arg4[%c32_211] : memref<81xf32, #tpu.memory_space<smem>>
    %838 = vector.broadcast %837 : f32 to vector<1x256xf32>
    %839 = arith.mulf %838, %832 : vector<1x256xf32>
    %840 = arith.addf %825, %839 : vector<1x256xf32>
    %c59_212 = arith.constant 59 : index
    %841 = memref.load %arg4[%c59_212] : memref<81xf32, #tpu.memory_space<smem>>
    %842 = vector.broadcast %841 : f32 to vector<1x256xf32>
    %843 = arith.mulf %842, %832 : vector<1x256xf32>
    %844 = arith.addf %829, %843 : vector<1x256xf32>
    %c255_i32_213 = arith.constant 255 : i32
    %845 = tpu.dynamic_rotate %592 by %c255_i32_213 dim 1 : vector<1x256xf32>, i32 -> vector<1x256xf32>
    %846 = arith.mulf %830, %845 : vector<1x256xf32>
    %c14_214 = arith.constant 14 : index
    %847 = memref.load %arg4[%c14_214] : memref<81xf32, #tpu.memory_space<smem>>
    %848 = vector.broadcast %847 : f32 to vector<1x256xf32>
    %849 = arith.mulf %848, %846 : vector<1x256xf32>
    %850 = arith.addf %836, %849 : vector<1x256xf32>
    %c41_215 = arith.constant 41 : index
    %851 = memref.load %arg4[%c41_215] : memref<81xf32, #tpu.memory_space<smem>>
    %852 = vector.broadcast %851 : f32 to vector<1x256xf32>
    %853 = arith.mulf %852, %846 : vector<1x256xf32>
    %854 = arith.addf %840, %853 : vector<1x256xf32>
    %c68_216 = arith.constant 68 : index
    %855 = memref.load %arg4[%c68_216] : memref<81xf32, #tpu.memory_space<smem>>
    %856 = vector.broadcast %855 : f32 to vector<1x256xf32>
    %857 = arith.mulf %856, %846 : vector<1x256xf32>
    %858 = arith.addf %844, %857 : vector<1x256xf32>
    %c255_i32_217 = arith.constant 255 : i32
    %859 = tpu.dynamic_rotate %615 by %c255_i32_217 dim 1 : vector<1x256xf32>, i32 -> vector<1x256xf32>
    %860 = arith.mulf %830, %859 : vector<1x256xf32>
    %c23_218 = arith.constant 23 : index
    %861 = memref.load %arg4[%c23_218] : memref<81xf32, #tpu.memory_space<smem>>
    %862 = vector.broadcast %861 : f32 to vector<1x256xf32>
    %863 = arith.mulf %862, %860 : vector<1x256xf32>
    %864 = arith.addf %850, %863 : vector<1x256xf32>
    %c50_219 = arith.constant 50 : index
    %865 = memref.load %arg4[%c50_219] : memref<81xf32, #tpu.memory_space<smem>>
    %866 = vector.broadcast %865 : f32 to vector<1x256xf32>
    %867 = arith.mulf %866, %860 : vector<1x256xf32>
    %868 = arith.addf %854, %867 : vector<1x256xf32>
    %c77_220 = arith.constant 77 : index
    %869 = memref.load %arg4[%c77_220] : memref<81xf32, #tpu.memory_space<smem>>
    %870 = vector.broadcast %869 : f32 to vector<1x256xf32>
    %871 = arith.mulf %870, %860 : vector<1x256xf32>
    %872 = arith.addf %858, %871 : vector<1x256xf32>
    %c6_221 = arith.constant 6 : index
    %c0_222 = arith.constant 0 : index
    %873 = vector.load %arg1[%c6_221, %c0_222] : memref<9x256xf32, #tpu.memory_space<vmem>>, vector<1x256xf32>
    %c241_i32_223 = arith.constant 241 : i32
    %874 = tpu.dynamic_rotate %569 by %c241_i32_223 dim 1 : vector<1x256xf32>, i32 -> vector<1x256xf32>
    %875 = arith.mulf %873, %874 : vector<1x256xf32>
    %c6_224 = arith.constant 6 : index
    %876 = memref.load %arg4[%c6_224] : memref<81xf32, #tpu.memory_space<smem>>
    %877 = vector.broadcast %876 : f32 to vector<1x256xf32>
    %878 = arith.mulf %877, %875 : vector<1x256xf32>
    %879 = arith.addf %864, %878 : vector<1x256xf32>
    %c33_225 = arith.constant 33 : index
    %880 = memref.load %arg4[%c33_225] : memref<81xf32, #tpu.memory_space<smem>>
    %881 = vector.broadcast %880 : f32 to vector<1x256xf32>
    %882 = arith.mulf %881, %875 : vector<1x256xf32>
    %883 = arith.addf %868, %882 : vector<1x256xf32>
    %c60_226 = arith.constant 60 : index
    %884 = memref.load %arg4[%c60_226] : memref<81xf32, #tpu.memory_space<smem>>
    %885 = vector.broadcast %884 : f32 to vector<1x256xf32>
    %886 = arith.mulf %885, %875 : vector<1x256xf32>
    %887 = arith.addf %872, %886 : vector<1x256xf32>
    %c241_i32_227 = arith.constant 241 : i32
    %888 = tpu.dynamic_rotate %592 by %c241_i32_227 dim 1 : vector<1x256xf32>, i32 -> vector<1x256xf32>
    %889 = arith.mulf %873, %888 : vector<1x256xf32>
    %c15_228 = arith.constant 15 : index
    %890 = memref.load %arg4[%c15_228] : memref<81xf32, #tpu.memory_space<smem>>
    %891 = vector.broadcast %890 : f32 to vector<1x256xf32>
    %892 = arith.mulf %891, %889 : vector<1x256xf32>
    %893 = arith.addf %879, %892 : vector<1x256xf32>
    %c42_229 = arith.constant 42 : index
    %894 = memref.load %arg4[%c42_229] : memref<81xf32, #tpu.memory_space<smem>>
    %895 = vector.broadcast %894 : f32 to vector<1x256xf32>
    %896 = arith.mulf %895, %889 : vector<1x256xf32>
    %897 = arith.addf %883, %896 : vector<1x256xf32>
    %c69_230 = arith.constant 69 : index
    %898 = memref.load %arg4[%c69_230] : memref<81xf32, #tpu.memory_space<smem>>
    %899 = vector.broadcast %898 : f32 to vector<1x256xf32>
    %900 = arith.mulf %899, %889 : vector<1x256xf32>
    %901 = arith.addf %887, %900 : vector<1x256xf32>
    %c241_i32_231 = arith.constant 241 : i32
    %902 = tpu.dynamic_rotate %615 by %c241_i32_231 dim 1 : vector<1x256xf32>, i32 -> vector<1x256xf32>
    %903 = arith.mulf %873, %902 : vector<1x256xf32>
    %c24_232 = arith.constant 24 : index
    %904 = memref.load %arg4[%c24_232] : memref<81xf32, #tpu.memory_space<smem>>
    %905 = vector.broadcast %904 : f32 to vector<1x256xf32>
    %906 = arith.mulf %905, %903 : vector<1x256xf32>
    %907 = arith.addf %893, %906 : vector<1x256xf32>
    %c51_233 = arith.constant 51 : index
    %908 = memref.load %arg4[%c51_233] : memref<81xf32, #tpu.memory_space<smem>>
    %909 = vector.broadcast %908 : f32 to vector<1x256xf32>
    %910 = arith.mulf %909, %903 : vector<1x256xf32>
    %911 = arith.addf %897, %910 : vector<1x256xf32>
    %c78_234 = arith.constant 78 : index
    %912 = memref.load %arg4[%c78_234] : memref<81xf32, #tpu.memory_space<smem>>
    %913 = vector.broadcast %912 : f32 to vector<1x256xf32>
    %914 = arith.mulf %913, %903 : vector<1x256xf32>
    %915 = arith.addf %901, %914 : vector<1x256xf32>
    %c7_235 = arith.constant 7 : index
    %c0_236 = arith.constant 0 : index
    %916 = vector.load %arg1[%c7_235, %c0_236] : memref<9x256xf32, #tpu.memory_space<vmem>>, vector<1x256xf32>
    %c240_i32_237 = arith.constant 240 : i32
    %917 = tpu.dynamic_rotate %569 by %c240_i32_237 dim 1 : vector<1x256xf32>, i32 -> vector<1x256xf32>
    %918 = arith.mulf %916, %917 : vector<1x256xf32>
    %c7_238 = arith.constant 7 : index
    %919 = memref.load %arg4[%c7_238] : memref<81xf32, #tpu.memory_space<smem>>
    %920 = vector.broadcast %919 : f32 to vector<1x256xf32>
    %921 = arith.mulf %920, %918 : vector<1x256xf32>
    %922 = arith.addf %907, %921 : vector<1x256xf32>
    %c34_239 = arith.constant 34 : index
    %923 = memref.load %arg4[%c34_239] : memref<81xf32, #tpu.memory_space<smem>>
    %924 = vector.broadcast %923 : f32 to vector<1x256xf32>
    %925 = arith.mulf %924, %918 : vector<1x256xf32>
    %926 = arith.addf %911, %925 : vector<1x256xf32>
    %c61_240 = arith.constant 61 : index
    %927 = memref.load %arg4[%c61_240] : memref<81xf32, #tpu.memory_space<smem>>
    %928 = vector.broadcast %927 : f32 to vector<1x256xf32>
    %929 = arith.mulf %928, %918 : vector<1x256xf32>
    %930 = arith.addf %915, %929 : vector<1x256xf32>
    %c240_i32_241 = arith.constant 240 : i32
    %931 = tpu.dynamic_rotate %592 by %c240_i32_241 dim 1 : vector<1x256xf32>, i32 -> vector<1x256xf32>
    %932 = arith.mulf %916, %931 : vector<1x256xf32>
    %c16_242 = arith.constant 16 : index
    %933 = memref.load %arg4[%c16_242] : memref<81xf32, #tpu.memory_space<smem>>
    %934 = vector.broadcast %933 : f32 to vector<1x256xf32>
    %935 = arith.mulf %934, %932 : vector<1x256xf32>
    %936 = arith.addf %922, %935 : vector<1x256xf32>
    %c43_243 = arith.constant 43 : index
    %937 = memref.load %arg4[%c43_243] : memref<81xf32, #tpu.memory_space<smem>>
    %938 = vector.broadcast %937 : f32 to vector<1x256xf32>
    %939 = arith.mulf %938, %932 : vector<1x256xf32>
    %940 = arith.addf %926, %939 : vector<1x256xf32>
    %c70_244 = arith.constant 70 : index
    %941 = memref.load %arg4[%c70_244] : memref<81xf32, #tpu.memory_space<smem>>
    %942 = vector.broadcast %941 : f32 to vector<1x256xf32>
    %943 = arith.mulf %942, %932 : vector<1x256xf32>
    %944 = arith.addf %930, %943 : vector<1x256xf32>
    %c240_i32_245 = arith.constant 240 : i32
    %945 = tpu.dynamic_rotate %615 by %c240_i32_245 dim 1 : vector<1x256xf32>, i32 -> vector<1x256xf32>
    %946 = arith.mulf %916, %945 : vector<1x256xf32>
    %c25_246 = arith.constant 25 : index
    %947 = memref.load %arg4[%c25_246] : memref<81xf32, #tpu.memory_space<smem>>
    %948 = vector.broadcast %947 : f32 to vector<1x256xf32>
    %949 = arith.mulf %948, %946 : vector<1x256xf32>
    %950 = arith.addf %936, %949 : vector<1x256xf32>
    %c52_247 = arith.constant 52 : index
    %951 = memref.load %arg4[%c52_247] : memref<81xf32, #tpu.memory_space<smem>>
    %952 = vector.broadcast %951 : f32 to vector<1x256xf32>
    %953 = arith.mulf %952, %946 : vector<1x256xf32>
    %954 = arith.addf %940, %953 : vector<1x256xf32>
    %c79_248 = arith.constant 79 : index
    %955 = memref.load %arg4[%c79_248] : memref<81xf32, #tpu.memory_space<smem>>
    %956 = vector.broadcast %955 : f32 to vector<1x256xf32>
    %957 = arith.mulf %956, %946 : vector<1x256xf32>
    %958 = arith.addf %944, %957 : vector<1x256xf32>
    %c8_249 = arith.constant 8 : index
    %c0_250 = arith.constant 0 : index
    %959 = vector.load %arg1[%c8_249, %c0_250] : memref<9x256xf32, #tpu.memory_space<vmem>>, vector<1x256xf32>
    %c239_i32_251 = arith.constant 239 : i32
    %960 = tpu.dynamic_rotate %569 by %c239_i32_251 dim 1 : vector<1x256xf32>, i32 -> vector<1x256xf32>
    %961 = arith.mulf %959, %960 : vector<1x256xf32>
    %c8_252 = arith.constant 8 : index
    %962 = memref.load %arg4[%c8_252] : memref<81xf32, #tpu.memory_space<smem>>
    %963 = vector.broadcast %962 : f32 to vector<1x256xf32>
    %964 = arith.mulf %963, %961 : vector<1x256xf32>
    %965 = arith.addf %950, %964 : vector<1x256xf32>
    %c35_253 = arith.constant 35 : index
    %966 = memref.load %arg4[%c35_253] : memref<81xf32, #tpu.memory_space<smem>>
    %967 = vector.broadcast %966 : f32 to vector<1x256xf32>
    %968 = arith.mulf %967, %961 : vector<1x256xf32>
    %969 = arith.addf %954, %968 : vector<1x256xf32>
    %c62_254 = arith.constant 62 : index
    %970 = memref.load %arg4[%c62_254] : memref<81xf32, #tpu.memory_space<smem>>
    %971 = vector.broadcast %970 : f32 to vector<1x256xf32>
    %972 = arith.mulf %971, %961 : vector<1x256xf32>
    %973 = arith.addf %958, %972 : vector<1x256xf32>
    %c239_i32_255 = arith.constant 239 : i32
    %974 = tpu.dynamic_rotate %592 by %c239_i32_255 dim 1 : vector<1x256xf32>, i32 -> vector<1x256xf32>
    %975 = arith.mulf %959, %974 : vector<1x256xf32>
    %c17_256 = arith.constant 17 : index
    %976 = memref.load %arg4[%c17_256] : memref<81xf32, #tpu.memory_space<smem>>
    %977 = vector.broadcast %976 : f32 to vector<1x256xf32>
    %978 = arith.mulf %977, %975 : vector<1x256xf32>
    %979 = arith.addf %965, %978 : vector<1x256xf32>
    %c44_257 = arith.constant 44 : index
    %980 = memref.load %arg4[%c44_257] : memref<81xf32, #tpu.memory_space<smem>>
    %981 = vector.broadcast %980 : f32 to vector<1x256xf32>
    %982 = arith.mulf %981, %975 : vector<1x256xf32>
    %983 = arith.addf %969, %982 : vector<1x256xf32>
    %c71_258 = arith.constant 71 : index
    %984 = memref.load %arg4[%c71_258] : memref<81xf32, #tpu.memory_space<smem>>
    %985 = vector.broadcast %984 : f32 to vector<1x256xf32>
    %986 = arith.mulf %985, %975 : vector<1x256xf32>
    %987 = arith.addf %973, %986 : vector<1x256xf32>
    %c239_i32_259 = arith.constant 239 : i32
    %988 = tpu.dynamic_rotate %615 by %c239_i32_259 dim 1 : vector<1x256xf32>, i32 -> vector<1x256xf32>
    %989 = arith.mulf %959, %988 : vector<1x256xf32>
    %c26_260 = arith.constant 26 : index
    %990 = memref.load %arg4[%c26_260] : memref<81xf32, #tpu.memory_space<smem>>
    %991 = vector.broadcast %990 : f32 to vector<1x256xf32>
    %992 = arith.mulf %991, %989 : vector<1x256xf32>
    %993 = arith.addf %979, %992 : vector<1x256xf32>
    %c53_261 = arith.constant 53 : index
    %994 = memref.load %arg4[%c53_261] : memref<81xf32, #tpu.memory_space<smem>>
    %995 = vector.broadcast %994 : f32 to vector<1x256xf32>
    %996 = arith.mulf %995, %989 : vector<1x256xf32>
    %997 = arith.addf %983, %996 : vector<1x256xf32>
    %c80_262 = arith.constant 80 : index
    %998 = memref.load %arg4[%c80_262] : memref<81xf32, #tpu.memory_space<smem>>
    %999 = vector.broadcast %998 : f32 to vector<1x256xf32>
    %1000 = arith.mulf %999, %989 : vector<1x256xf32>
    %1001 = arith.addf %987, %1000 : vector<1x256xf32>
    %cst_263 = arith.constant 0.000000e+00 : f32
    %1002 = vector.broadcast %cst_263 : f32 to vector<1x256xf32>
    %1003 = arith.cmpf ogt, %993, %1002 : vector<1x256xf32>
    %cst_264 = arith.constant 2.000000e-01 : f32
    %1004 = vector.broadcast %cst_264 : f32 to vector<1x256xf32>
    %1005 = arith.mulf %1004, %993 : vector<1x256xf32>
    %1006 = arith.select %1003, %993, %1005 : vector<1x256xi1>, vector<1x256xf32>
    %cst_265 = arith.constant 0.000000e+00 : f32
    %1007 = vector.broadcast %cst_265 : f32 to vector<1x256xf32>
    %1008 = arith.cmpf ogt, %997, %1007 : vector<1x256xf32>
    %cst_266 = arith.constant 2.000000e-01 : f32
    %1009 = vector.broadcast %cst_266 : f32 to vector<1x256xf32>
    %1010 = arith.mulf %1009, %997 : vector<1x256xf32>
    %1011 = arith.select %1008, %997, %1010 : vector<1x256xi1>, vector<1x256xf32>
    %cst_267 = arith.constant 0.000000e+00 : f32
    %1012 = vector.broadcast %cst_267 : f32 to vector<1x256xf32>
    %1013 = arith.cmpf ogt, %1001, %1012 : vector<1x256xf32>
    %cst_268 = arith.constant 2.000000e-01 : f32
    %1014 = vector.broadcast %cst_268 : f32 to vector<1x256xf32>
    %1015 = arith.mulf %1014, %1001 : vector<1x256xf32>
    %1016 = arith.select %1013, %1001, %1015 : vector<1x256xi1>, vector<1x256xf32>
    %c0_269 = arith.constant 0 : index
    %c0_270 = arith.constant 0 : index
    %1017 = vector.load %arg7[%c0_269, %c0_270] : memref<8x1xf32, #tpu.memory_space<vmem>>, vector<8x1xf32>
    %1018 = vector.shape_cast %1017 : vector<8x1xf32> to vector<8x1xf32>
    %1019 = vector.broadcast %1018 : vector<8x1xf32> to vector<8x256xf32>
    %c0_271 = arith.constant 0 : index
    %c0_272 = arith.constant 0 : index
    %1020 = vector.load %arg6[%c0_271, %c0_272] : memref<8x3xf32, #tpu.memory_space<vmem>>, vector<8x1xf32>
    %1021 = vector.shape_cast %1006 : vector<1x256xf32> to vector<1x256xf32>
    %1022 = vector.broadcast %1021 : vector<1x256xf32> to vector<8x256xf32>
    %1023 = vector.broadcast %1020 : vector<8x1xf32> to vector<8x256xf32>
    %1024 = arith.mulf %1023, %1022 : vector<8x256xf32>
    %1025 = arith.addf %1019, %1024 : vector<8x256xf32>
    %c0_273 = arith.constant 0 : index
    %c1_274 = arith.constant 1 : index
    %1026 = vector.load %arg6[%c0_273, %c1_274] : memref<8x3xf32, #tpu.memory_space<vmem>>, vector<8x1xf32>
    %1027 = vector.shape_cast %1011 : vector<1x256xf32> to vector<1x256xf32>
    %1028 = vector.broadcast %1027 : vector<1x256xf32> to vector<8x256xf32>
    %1029 = vector.broadcast %1026 : vector<8x1xf32> to vector<8x256xf32>
    %1030 = arith.mulf %1029, %1028 : vector<8x256xf32>
    %1031 = arith.addf %1025, %1030 : vector<8x256xf32>
    %c0_275 = arith.constant 0 : index
    %c2_276 = arith.constant 2 : index
    %1032 = vector.load %arg6[%c0_275, %c2_276] : memref<8x3xf32, #tpu.memory_space<vmem>>, vector<8x1xf32>
    %1033 = vector.shape_cast %1016 : vector<1x256xf32> to vector<1x256xf32>
    %1034 = vector.broadcast %1033 : vector<1x256xf32> to vector<8x256xf32>
    %1035 = vector.broadcast %1032 : vector<8x1xf32> to vector<8x256xf32>
    %1036 = arith.mulf %1035, %1034 : vector<8x256xf32>
    %1037 = arith.addf %1031, %1036 : vector<8x256xf32>
    %c1_277 = arith.constant 1 : index
    %c0_278 = arith.constant 0 : index
    %c0_279 = arith.constant 0 : index
    %1038 = vector.load %arg0[%c1_277, %c0_278, %c0_279] : memref<2x4x256xf32, #tpu.memory_space<vmem>>, vector<1x1x256xf32>
    %1039 = vector.shape_cast %1038 : vector<1x1x256xf32> to vector<1x256xf32>
    %c0_280 = arith.constant 0 : index
    %c0_281 = arith.constant 0 : index
    %1040 = vector.load %arg8[%c0_280, %c0_281] : memref<8x4xf32, #tpu.memory_space<vmem>>, vector<8x1xf32>
    %1041 = vector.shape_cast %1039 : vector<1x256xf32> to vector<1x256xf32>
    %1042 = vector.broadcast %1041 : vector<1x256xf32> to vector<8x256xf32>
    %1043 = vector.broadcast %1040 : vector<8x1xf32> to vector<8x256xf32>
    %1044 = arith.mulf %1043, %1042 : vector<8x256xf32>
    %1045 = arith.addf %1037, %1044 : vector<8x256xf32>
    %c1_282 = arith.constant 1 : index
    %c1_283 = arith.constant 1 : index
    %c0_284 = arith.constant 0 : index
    %1046 = vector.load %arg0[%c1_282, %c1_283, %c0_284] : memref<2x4x256xf32, #tpu.memory_space<vmem>>, vector<1x1x256xf32>
    %1047 = vector.shape_cast %1046 : vector<1x1x256xf32> to vector<1x256xf32>
    %c0_285 = arith.constant 0 : index
    %c1_286 = arith.constant 1 : index
    %1048 = vector.load %arg8[%c0_285, %c1_286] : memref<8x4xf32, #tpu.memory_space<vmem>>, vector<8x1xf32>
    %1049 = vector.shape_cast %1047 : vector<1x256xf32> to vector<1x256xf32>
    %1050 = vector.broadcast %1049 : vector<1x256xf32> to vector<8x256xf32>
    %1051 = vector.broadcast %1048 : vector<8x1xf32> to vector<8x256xf32>
    %1052 = arith.mulf %1051, %1050 : vector<8x256xf32>
    %1053 = arith.addf %1045, %1052 : vector<8x256xf32>
    %c1_287 = arith.constant 1 : index
    %c2_288 = arith.constant 2 : index
    %c0_289 = arith.constant 0 : index
    %1054 = vector.load %arg0[%c1_287, %c2_288, %c0_289] : memref<2x4x256xf32, #tpu.memory_space<vmem>>, vector<1x1x256xf32>
    %1055 = vector.shape_cast %1054 : vector<1x1x256xf32> to vector<1x256xf32>
    %c0_290 = arith.constant 0 : index
    %c2_291 = arith.constant 2 : index
    %1056 = vector.load %arg8[%c0_290, %c2_291] : memref<8x4xf32, #tpu.memory_space<vmem>>, vector<8x1xf32>
    %1057 = vector.shape_cast %1055 : vector<1x256xf32> to vector<1x256xf32>
    %1058 = vector.broadcast %1057 : vector<1x256xf32> to vector<8x256xf32>
    %1059 = vector.broadcast %1056 : vector<8x1xf32> to vector<8x256xf32>
    %1060 = arith.mulf %1059, %1058 : vector<8x256xf32>
    %1061 = arith.addf %1053, %1060 : vector<8x256xf32>
    %c1_292 = arith.constant 1 : index
    %c3_293 = arith.constant 3 : index
    %c0_294 = arith.constant 0 : index
    %1062 = vector.load %arg0[%c1_292, %c3_293, %c0_294] : memref<2x4x256xf32, #tpu.memory_space<vmem>>, vector<1x1x256xf32>
    %1063 = vector.shape_cast %1062 : vector<1x1x256xf32> to vector<1x256xf32>
    %c0_295 = arith.constant 0 : index
    %c3_296 = arith.constant 3 : index
    %1064 = vector.load %arg8[%c0_295, %c3_296] : memref<8x4xf32, #tpu.memory_space<vmem>>, vector<8x1xf32>
    %1065 = vector.shape_cast %1063 : vector<1x256xf32> to vector<1x256xf32>
    %1066 = vector.broadcast %1065 : vector<1x256xf32> to vector<8x256xf32>
    %1067 = vector.broadcast %1064 : vector<8x1xf32> to vector<8x256xf32>
    %1068 = arith.mulf %1067, %1066 : vector<8x256xf32>
    %1069 = arith.addf %1061, %1068 : vector<8x256xf32>
    %cst_297 = arith.constant 0.000000e+00 : f32
    %1070 = vector.broadcast %cst_297 : f32 to vector<8x256xf32>
    %1071 = arith.cmpf ogt, %1069, %1070 : vector<8x256xf32>
    %cst_298 = arith.constant 2.000000e-01 : f32
    %1072 = vector.broadcast %cst_298 : f32 to vector<8x256xf32>
    %1073 = arith.mulf %1072, %1069 : vector<8x256xf32>
    %1074 = arith.select %1071, %1069, %1073 : vector<8x256xi1>, vector<8x256xf32>
    %c1_299 = arith.constant 1 : index
    %c0_300 = arith.constant 0 : index
    %c0_301 = arith.constant 0 : index
    %1075 = vector.load %arg9[%c1_299, %c0_300, %c0_301] : memref<2x8x256xf32, #tpu.memory_space<vmem>>, vector<1x8x256xf32>
    %1076 = vector.shape_cast %1075 : vector<1x8x256xf32> to vector<8x256xf32>
    %1077 = vector.shape_cast %1074 : vector<8x256xf32> to vector<1x8x256xf32>
    tpu.vector_store %arg9[%c1_299, %c0_300, %c0_301], %1077 {strides = array<i32>} : memref<2x8x256xf32, #tpu.memory_space<vmem>>, vector<1x8x256xf32>,
    return
  }
}

</mosaic_0001>

<bundles_post_ra>
// kernel: tpu_custom_call.1
= control target key start
LH: loop header
LB: loop body
LE: loop exit
PB: predicated region body
PF: predicated region fallthrough
CT: control target
= control target key end

     0   :  { %s4469_s0 = inlined_call_operand.hbm [shape: f32[2,4,256], index: 0, kind: input, shape index: {}]   ;;  %s4470_s1 = inlined_call_operand.vmem [shape: f32[9,256], index: 1, kind: input, shape index: {}]   ;;  %s4471_s2 = inlined_call_operand.hbm [shape: f32[12], index: 2, kind: input, shape index: {}]   ;;  %s4472_s3 = inlined_call_operand.hbm [shape: f32[3], index: 3, kind: input, shape index: {}]   ;;  %s4473_s4 = inlined_call_operand.hbm [shape: f32[81], index: 4, kind: input, shape index: {}]   ;;  %s4474_s5 = inlined_call_operand.vmem [shape: f32[3], index: 5, kind: input, shape index: {}]   ;;  %s4475_s6 = inlined_call_operand.vmem [shape: f32[8,3], index: 6, kind: input, shape index: {}]   ;;  %s4476_s7 = inlined_call_operand.vmem [shape: f32[8,1], index: 7, kind: input, shape index: {}]   ;;  %s4477_s8 = inlined_call_operand.vmem [shape: f32[8,4], index: 8, kind: input, shape index: {}]   ;;  %s4478_s9 = inlined_call_operand.hbm [shape: f32[2,8,256], index: 9, kind: output, shape index: {}]  }
   0x1   :  { %4492 = sst [smem:[#allocation18_spill]] %s4477_s8 }
   0x2   :  { %4493 = sst [smem:[#allocation19_spill]] %s4478_s9 }
   0x3   :  { %14 = vsyncpa [#allocation3], 0 }
   0x4   :  { %15 = vsyncpa [#allocation5], 0 }
   0x5   :  { %16 = vsyncpa [#allocation9], 0 }
   0x6   :  { %17 = vsyncpa [#allocation6], 0 }
   0x7   :  { %18 = vsyncpa [#allocation4], 0  ;;  %s2865_s30 = smov [#allocation8]   ;;  %s2866_s12 = smov [#allocation2]  }
   0x8   :  { %48 = dma.hbm_to_smem %s4472_s3, 16, %s2865_s30, [#allocation9]  }
   0x9   :  { %s24_s13 = sshll.u32 %s2866_s12, 4  ;;  %s25_s13 = int_to_ptr.vmem [resolvable:$true] %s24_s13 }
   0xa   :  { %s2795_s14 = scalar_lea.vmem %s25_s13, 256  ;;  %p2800_p1 = scmp.lt.s32.totalorder %s25_s13, %s25_s13 }
   0xb   :  { %p2796_p0 = scmp.ne.s32.totalorder %s25_s13, %s2795_s14  ;;  %p2801_p2 = scmp.lt.s32.totalorder %s2795_s14, %s2795_s14 }
   0xd   :  { %p2802_p3 = por %p2801_p2, %p2800_p1 }
   0xf   :  { %p2803_p4 = pnand %p2802_p3, %p2796_p0 }
  0x11   :  { %2806 = shalt.err (!%p2803_p4)
}
  0x12   :  { %s2867_s15 = smov 128   ;;  %s2868_s16 = smov 8  }
  0x13   :  { %30 = dma.hbm_to_vmem [thread:$0]  %s4469_s0, 256, %s25_s13, [#allocation3], %s2867_s15, %s2867_s15, %s2868_s16  }
  0x14   :  { %s2869_s19 = smov [#allocation7]   ;;  %s2870_s3 = smov [#allocation10]  }
  0x15   :  { %40 = dma.hbm_to_smem %s4471_s2, 16, %s2869_s19, [#allocation5]  }
  0x16   :  { %56 = dma.hbm_to_smem %s4473_s4, 16, %s2870_s3, [#allocation9]  }
  0x17   :  { %s63_s26 = sshll.u32 %s4474_s5, 4  ;;  %s64_s26 = int_to_ptr.vmem [resolvable:$true] %s63_s26 }
  0x18   :  { %s2823_s27 = scalar_lea.vmem %s64_s26, 16  ;;  %p2828_p6 = scmp.lt.s32.totalorder %s64_s26, %s64_s26 }
  0x19   :  { %p2824_p5 = scmp.ne.s32.totalorder %s64_s26, %s2823_s27  ;;  %p2829_p7 = scmp.lt.s32.totalorder %s2823_s27, %s2823_s27 }
  0x1b   :  { %p2830_p8 = por %p2829_p7, %p2828_p6 }
  0x1d   :  { %p2831_p9 = pnand %p2830_p8, %p2824_p5 }
  0x1f   :  { %2834 = shalt.err (!%p2831_p9)
}
  0x20   :  { %s2871_s0 = smov [#allocation11]  }
  0x21   :  { %66 = dma.vmem_to_smem %s64_s26, 16, %s2871_s0, [#allocation6]  }
  0x22   :  { %2855 = dma.done.wait [#allocation3], 256  }
  0x23   :  { %2856 = vsyncadd [#allocation3], 4294967040 }
  0x24   :  { %2857 = dma.done.wait [#allocation5], 16  }
  0x25   :  { %2858 = vsyncadd [#allocation5], 4294967280 }
  0x26   :  { %2859 = dma.done.wait [#allocation9], 32  }
  0x27   :  { %2860 = vsyncadd [#allocation9], 4294967264 }
  0x28   :  { %2861 = dma.done.wait [#allocation6], 16  }
  0x29   :  { %2862 = vsyncadd [#allocation6], 4294967280 }
  0x2a   :  { %88 = sfence }
  0x2b   :  { %s2952_s2 = sld [smem:[#allocation8 + $0x1]]  ;;  %v167_v0 = vlaneseq  ;;  %v2872_v1 = vmov 0   ;;  %v2956_v2 = vld [vmem:[#allocation2] ss:$4 sm:$0x3]  ;;  %s2873_s19 = smov 17  }
  0x2c   :  { %s2537_s4 = sld [smem:[#allocation7 + $0x4]]  ;;  %2760 = vset.pattern.permute.xlu1 %v2872_v1  ;;  %2759 = vset.pattern.permute.xlu0 %v2872_v1  ;;  %v2960_v3 = vld [vmem:[#allocation2 + $0x1] ss:$4 sm:$0x3]  ;;  %s4489_s20 = smov 16  }
  0x2d   :  { %s2538_s5 = sld [smem:[#allocation7 + $0x5]]  ;;  %v2964_v4 = vld [vmem:[#allocation2 + $0x2] ss:$4 sm:$0x3]  ;;  %v2967_v5 = vshrl.u32 %v167_v0, 7  ;;  %s4490_s21 = smov 15  }
  0x2e   :  { %s2958_s28 = sld [smem:[#allocation7 + $0x6]]  ;;  %v2971_v6 = vld [vmem:[#allocation2 + $0x3] ss:$4 sm:$0x3]  ;;  %s4487_s3 = smov 1  }
  0x2f   :  { %s2962_s29 = sld [smem:[#allocation7 + $0x7]]  ;;  %v2978_v9 = vld [vmem:[#allocation2 + $0x8] ss:$4 sm:$0x3]  ;;  %v2989_v16 = vsub.s32 0, %v2967_v5  ;;  %v3001_v24 = vsub.s32 1, %v2967_v5 }
  0x30   :  { %s2969_s30 = sld [smem:[#allocation8]]  ;;  %v2983_v12 = vld [vmem:[#allocation2 + $0x9] ss:$4 sm:$0x3]  ;;  %s4485_s22 = smov 127  }
  0x31   :  { %s2973_s10 = sld [smem:[#allocation7]]  ;;  %v118_v7 = vstv %s2952_s2  ;;  %v1312_v25 = vld [vmem:[#allocation2 + $0xa] ss:$4 sm:$0x3]  ;;  %s4483_s23 = smov 113  }
  0x32   :  { %v120_v8 = vstv %s2537_s4  ;;  %s2976_s11 = sld [smem:[#allocation7 + $0x1]]  ;;  %v1314_v28 = vld [vmem:[#allocation2 + $0xb] ss:$4 sm:$0x3]  ;;  %s4481_s24 = smov 112  }
  0x33   :  { %v121_v10 = vmul.f32 %v120_v8, %v2956_v2  ;;  %v124_v11 = vstv %s2538_s5  ;;  %s2981_s12 = sld [smem:[#allocation7 + $0x2]]  ;;  %v1340_v13 = vmul.f32 %v2978_v9, %v120_v8  ;;  %s4479_s25 = smov 111  }
  0x34   :  { %v125_v14 = vmul.f32 %v124_v11, %v2960_v3  ;;  %v128_v15 = vstv %s2958_s28  ;;  %s2991_s13 = sld [smem:[#allocation7 + $0x3]]  ;;  %v1344_v17 = vmul.f32 %v2983_v12, %v124_v11 }
  0x35   :  { %v122_v18 = vadd.f32 %v121_v10, %v118_v7  ;;  %v129_v19 = vmul.f32 %v128_v15, %v2964_v4  ;;  %v132_v20 = vstv %s2962_s29  ;;  %s2996_s14 = sld [smem:[#allocation8 + $0x2]]  ;;  %v1341_v21 = vadd.f32 %v1340_v13, %v118_v7 }
  0x36   :  { %v133_v22 = vmul.f32 %v132_v20, %v2971_v6  ;;  %v97_v23 = vstv %s2969_s30  ;;  %s3003_s15 = sld [smem:[#allocation7 + $0x8]]  ;;  %v1348_v30 = vmul.f32 %v1312_v25, %v128_v15  ;;  %v1352_v34 = vmul.f32 %v1314_v28, %v132_v20 }
  0x37   :  { %v126_v26 = vadd.f32 %v125_v14, %v122_v18  ;;  %v99_v27 = vstv %s2973_s10  ;;  %s3006_s16 = sld [smem:[#allocation7 + $0x9]]  ;;  %v1345_v29 = vadd.f32 %v1344_v17, %v1341_v21 }
  0x38   :  { %v100_v31 = vmul.f32 %v99_v27, %v2956_v2  ;;  %v103_v32 = vstv %s2976_s11  ;;  %s3010_s17 = sld [smem:[#allocation7 + $0xa]]  ;;  %v1319_v33 = vmul.f32 %v2978_v9, %v99_v27 }
  0x39   :  { %v130_v35 = vadd.f32 %v129_v19, %v126_v26  ;;  %v104_v36 = vmul.f32 %v103_v32, %v2960_v3  ;;  %v107_v37 = vstv %s2981_s12  ;;  %s3015_s18 = sld [smem:[#allocation7 + $0xb]]  ;;  %v1323_v38 = vmul.f32 %v2983_v12, %v103_v32 }
  0x3a   :  { %v101_v39 = vadd.f32 %v100_v31, %v97_v23  ;;  %v108_v40 = vmul.f32 %v107_v37, %v2964_v4  ;;  %v111_v41 = vstv %s2991_s13  ;;  %v1320_v42 = vadd.f32 %v1319_v33, %v97_v23  ;;  %v1156_v31 = vld [vmem:[%s4476_s7] sm:$0xff]  ;;  %s3146_s4 = sld [smem:[#allocation10 + $0x9]] }
  0x3b   :  { %v134_v43 = vadd.f32 %v133_v22, %v130_v35  ;;  %v112_v44 = vmul.f32 %v111_v41, %v2971_v6  ;;  %v139_v45 = vstv %s2996_s14  ;;  %v1327_v46 = vmul.f32 %v1312_v25, %v107_v37  ;;  %s3153_s5 = sld [smem:[#allocation10 + $0x24]] }
  0x3c   :  { %v105_v47 = vadd.f32 %v104_v36, %v101_v39  ;;  %v141_v48 = vstv %s3003_s15  ;;  %v1324_v49 = vadd.f32 %v1323_v38, %v1320_v42  ;;  %v1331_v50 = vmul.f32 %v1314_v28, %v111_v41  ;;  %s3155_s28 = sld [smem:[#allocation10 + $0x3f]] }
  0x3d   :  { %vm135_vm0 = vcmp.gt.f32.partialorder %v134_v43, 0.0  ;;  %v136_v51 = vmul.f32 0.2, %v134_v43  ;;  %v142_v52 = vmul.f32 %v141_v48, %v2956_v2  ;;  %v145_v53 = vstv %s3006_s16  ;;  %s3163_s29 = sld [smem:[#allocation10]] }
  0x3e   :  { %v109_v54 = vadd.f32 %v108_v40, %v105_v47  ;;  %v146_v55 = vmul.f32 %v145_v53, %v2960_v3  ;;  %v149_v56 = vstv %s3010_s17  ;;  %v1328_v57 = vadd.f32 %v1327_v46, %v1324_v49  ;;  %s3168_s30 = sld [smem:[#allocation10 + $0x1b]] }
  0x3f   :  { %v3027_v58 = vsel %vm135_vm0, %v134_v43, %v136_v51  ;;  %v143_v59 = vadd.f32 %v142_v52, %v139_v45  ;;  %v150_v60 = vmul.f32 %v149_v56, %v2964_v4  ;;  %v153_v61 = vstv %s3015_s18  ;;  %s3176_s10 = sld [smem:[#allocation11]] }
  0x40   :  { %v3033_v62 = vrot.slane %v3027_v58, %v2989_v16  ;;  %v113_v63 = vadd.f32 %v112_v44, %v109_v54  ;;  %v154_v7 = vmul.f32 %v153_v61, %v2971_v6  ;;  %v3036_v8 = vadd.f32 %v1331_v50, %v1328_v57  ;;  %s3178_s11 = sld [smem:[#allocation11 + $0x1]] }
  0x41   :  { %v147_v2 = vadd.f32 %v146_v55, %v143_v59  ;;  %v1349_v10 = vadd.f32 %v1348_v30, %v1345_v29  ;;  %v1361_v3 = vmul.f32 %v2978_v9, %v141_v48  ;;  %v3043_v11 = vrot.slane %v3027_v58, %v3001_v24  ;;  %v1162_v30 = vld [vmem:[%s4475_s6] sm:$0xff]  ;;  %s3187_s12 = sld [smem:[#allocation11 + $0x2]] }
  0x42   :  { %228 = vrot.lane.b32.xlu1 %v3033_v62, %s2873_s19  ;;  %vm114_vm1 = vcmp.gt.f32.partialorder %v113_v63, 0.0  ;;  %v115_v4 = vmul.f32 0.2, %v113_v63  ;;  %v1365_v6 = vmul.f32 %v2983_v12, %v145_v53  ;;  %v1369_v19 = vmul.f32 %v1312_v25, %v149_v56  ;;  %s3189_s13 = sld [smem:[#allocation10 + $0x36]] }
  0x43   :  { %v151_v13 = vadd.f32 %v150_v60, %v147_v2  ;;  %v3045_v14 = vadd.f32 %v1352_v34, %v1349_v10  ;;  %v1362_v17 = vadd.f32 %v1361_v3, %v139_v45  ;;  %v1373_v20 = vmul.f32 %v1314_v28, %v153_v61  ;;  %s3197_s14 = sld [smem:[#allocation10 + $0x12]] }
  0x44   :  { %v3048_v15 = vsel %vm114_vm1, %v113_v63, %v115_v4  ;;  %v1334_v29 = vmul.f32 0.2, %v3036_v8  ;;  %vm1333_vm3 = vcmp.gt.f32.partialorder %v3036_v8, 0.0  ;;  %v2881_v35 = vmov 1   ;;  %s3202_s15 = sld [smem:[#allocation10 + $0x2d]] }
  0x45   :  { %v170_v9 = vrot.slane %v3048_v15, %v2989_v16  ;;  %v155_v18 = vadd.f32 %v154_v7, %v151_v13  ;;  %v174_v21 = vrot.slane %v3048_v15, %v3001_v24  ;;  %v1366_v12 = vadd.f32 %v1365_v6, %v1362_v17  ;;  %s3206_s16 = sld [smem:[#allocation10 + $0x48]]  ;;  %v165_v13 = vld [vmem:[%s4470_s1] ss:$8 sm:$0x3] }
  0x46   :  { %230 = vrot.lane.b32.xlu1 %v3043_v11, %s2873_s19  ;;  %v3133_v32 = vsel %vm1333_vm3, %v3036_v8, %v1334_v29  ;;  %v1355_v33 = vmul.f32 0.2, %v3045_v14  ;;  %vm1354_vm4 = vcmp.gt.f32.partialorder %v3045_v14, 0.0  ;;  %v2882_v43 = vmov 1966171168   ;;  %s3208_s17 = sld [smem:[#allocation10 + $0x1]] }
  0x47   :  { %177 = vrot.lane.b32.xlu0 %v170_v9, %s2873_s19  ;;  %vm156_vm2 = vcmp.gt.f32.partialorder %v155_v18, 0.0  ;;  %v157_v22 = vmul.f32 0.2, %v155_v18  ;;  %v1370_v26 = vadd.f32 %v1369_v19, %v1366_v12  ;;  %v3139_v34 = vrot.slane %v3133_v32, %v2989_v16  ;;  %s3212_s18 = sld [smem:[#allocation10 + $0x1c]] }
  0x48   :  { %v3143_v36 = vsel %vm1354_vm4, %v3045_v14, %v1355_v33  ;;  %v3150_v38 = vrot.slane %v3133_v32, %v3001_v24  ;;  %v190_v44 = vunpack.c.l.s4 %v2882_v43  ;;  %v3200_v46 = vand.u32 127, %v167_v0  ;;  %s3215_s26 = sld [smem:[#allocation10 + $0x37]] }
  0x49   :  { %v3057_v23 = vsel %vm156_vm2, %v155_v18, %v157_v22  ;;  %v3064_v28 = vadd.f32 %v1373_v20, %v1370_v26  ;;  %v3161_v39 = vrot.slane %v3143_v36, %v2989_v16  ;;  %v3174_v41 = vrot.slane %v3143_v36, %v3001_v24  ;;  %s3219_s27 = sld [smem:[#allocation10 + $0xa]] }
  0x4a   :  { %v273_v27 = vrot.slane %v3057_v23, %v3001_v24  ;;  %v269_v25 = vrot.slane %v3057_v23, %v2989_v16  ;;  %v191_v47 = vunpack.c.0.s8 %v190_v44  ;;  %vm183_vm6 = vcmp.lt.s32.totalorder %v3200_v46, 17  ;;  %s3224_s0 = sld [smem:[#allocation10 + $0x25]] }
  0x4b   :  { %179 = vrot.lane.b32.xlu0 %v174_v21, %s2873_s19  ;;  %v1376_v37 = vmul.f32 0.2, %v3064_v28  ;;  %vm1375_vm5 = vcmp.gt.f32.partialorder %v3064_v28, 0.0  ;;  %s3234_s2 = sld [smem:[#allocation10 + $0x13]]  ;;  %v254_v54 = vstv %s3146_s4  ;;  %v258_v55 = vstv %s3153_s5 }
  0x4c   :  { %278 = vrot.lane.b32.xlu1 %v273_v27, %s2873_s19  ;;  %v3222_v0 = vsub.s32 %v191_v47, %v2967_v5  ;;  %v262_v57 = vstv %s3155_s28  ;;  %v160_v63 = vstv %s3176_s10  ;;  %v162_v7 = vstv %s3178_s11  ;;  %s3295_s10 = sld [smem:[#allocation10 + $0x41]] }
  0x4d   :  { %v3166_v40 = vsel %vm1375_vm5, %v3064_v28, %v1376_v37  ;;  %v164_v2 = vstv %s3187_s12  ;;  %v206_v10 = vstv %s3163_s29  ;;  %v210_v3 = vstv %s3168_s30  ;;  %s3275_s29 = sld [smem:[#allocation10 + $0x38]] }
  0x4e   :  { %v3185_v42 = vrot.slane %v3166_v40, %v2989_v16  ;;  %v3195_v45 = vrot.slane %v3166_v40, %v3001_v24  ;;  %v214_v4 = vstv %s3189_s13  ;;  %v306_v6 = vstv %s3202_s15  ;;  %s3291_s30 = sld [smem:[#allocation10 + $0x26]] }
  0x4f   :  { %276 = vrot.lane.b32.xlu0 %v269_v25, %s2873_s19  ;;  %v310_v17 = vstv %s3206_s16  ;;  %vm319_vm7 = vcmp.lt.s32.totalorder %v3200_v46, 16  ;;  %v342_v20 = vstv %s3208_s17  ;;  %v350_v22 = vstv %s3215_s26  ;;  %s3302_s11 = sld [smem:[#allocation10 + $0x14]]  ;;  %s4495_s16 = smov 1  }
  0x50   :  { %317 = vrot.lane.b32.xlu1 %v174_v21, %s4489_s20  ;;  %s3310_s12 = sld [smem:[#allocation10 + $0x2f]]  ;;  %vm433_vm8 = vcmp.lt.s32.totalorder %v3200_v46, 15  ;;  %vm547_vm9 = vcmp.lt.s32.totalorder %v3200_v46, 1  ;;  %vm697_vm10 = vcmp.lt.s32.totalorder %v3200_v46, 127  ;;  %vm811_vm11 = vcmp.lt.s32.totalorder %v3200_v46, 113 }
  0x51   :  { %s3315_s13 = sld [smem:[#allocation10 + $0x4a]]  ;;  %vm925_vm12 = vcmp.lt.s32.totalorder %v3200_v46, 112  ;;  %vm1039_vm13 = vcmp.lt.s32.totalorder %v3200_v46, 111 }
  0x52   :  { %s3322_s28 = sld [smem:[#allocation10 + $0x3]] }
  0x53   :  { %315 = vrot.lane.b32.xlu0 %v170_v9, %s4489_s20  ;;  %s3327_s4 = sld [smem:[#allocation10 + $0x1e]] }
  0x54   :  { %355 = vrot.lane.b32.xlu1 %v3043_v11, %s4489_s20  ;;  %s3344_s5 = sld [smem:[#allocation10 + $0xc]] }
  0x55   :  { %s3352_s9 = sld [smem:[#allocation10 + $0x27]] }
  0x56   :  { %s3363_s15 = sld [smem:[#allocation10 + $0x15]] }
  0x57   :  { %353 = vrot.lane.b32.xlu0 %v3033_v62, %s4489_s20  ;;  %s3382_s17 = sld [smem:[#allocation10 + $0x4]] }
  0x58   :  { %392 = vrot.lane.b32.xlu1 %v273_v27, %s4489_s20  ;;  %s3399_s26 = sld [smem:[#allocation10 + $0x4b]] }
  0x59   :  { %s3409_s8 = sld [smem:[#allocation10 + $0x3a]] }
  0x5b   :  { %390 = vrot.lane.b32.xlu0 %v269_v25, %s4489_s20 }
  0x5c   :  { %431 = vrot.lane.b32.xlu1 %v174_v21, %s4490_s21 }
  0x5f   :  { %429 = vrot.lane.b32.xlu0 %v170_v9, %s4490_s21 }
  0x60   :  { %469 = vrot.lane.b32.xlu1 %v3043_v11, %s4490_s21 }
  0x63   :  { %467 = vrot.lane.b32.xlu0 %v3033_v62, %s4490_s21 }
  0x64   :  { %506 = vrot.lane.b32.xlu1 %v273_v27, %s4490_s21 }
  0x67   :  { %504 = vrot.lane.b32.xlu0 %v269_v25, %s4490_s21 }
  0x68   :  { %545 = vrot.lane.b32.xlu1 %v174_v21, %s4487_s3 }
  0x6b   :  { %543 = vrot.lane.b32.xlu0 %v170_v9, %s4487_s3 }
  0x6c   :  { %583 = vrot.lane.b32.xlu1 %v3043_v11, %s4487_s3 }
  0x6f   :  { %581 = vrot.lane.b32.xlu0 %v3033_v62, %s4487_s3 }
  0x70   :  { %620 = vrot.lane.b32.xlu1 %v273_v27, %s4487_s3 }
  0x73   :  { %618 = vrot.lane.b32.xlu0 %v269_v25, %s4487_s3  ;;  %s3282_s3 = sld [smem:[#allocation10 + $0xb]] }
  0x74   :  { %695 = vrot.lane.b32.xlu1 %v174_v21, %s4485_s22 }
  0x77   :  { %693 = vrot.lane.b32.xlu0 %v170_v9, %s4485_s22 }
  0x78   :  { %733 = vrot.lane.b32.xlu1 %v3043_v11, %s4485_s22 }
  0x7b   :  { %731 = vrot.lane.b32.xlu0 %v3033_v62, %s4485_s22 }
  0x7c   :  { %770 = vrot.lane.b32.xlu1 %v273_v27, %s4485_s22 }
  0x7f   :  { %768 = vrot.lane.b32.xlu0 %v269_v25, %s4485_s22  ;;  %s3255_s22 = sld [smem:[#allocation10 + $0x1d]] }
  0x80   :  { %809 = vrot.lane.b32.xlu1 %v174_v21, %s4483_s23 }
  0x83   :  { %807 = vrot.lane.b32.xlu0 %v170_v9, %s4483_s23 }
  0x84   :  { %847 = vrot.lane.b32.xlu1 %v3043_v11, %s4483_s23 }
  0x87   :  { %845 = vrot.lane.b32.xlu0 %v3033_v62, %s4483_s23 }
  0x88   :  { %884 = vrot.lane.b32.xlu1 %v273_v27, %s4483_s23 }
  0x8b   :  { %882 = vrot.lane.b32.xlu0 %v269_v25, %s4483_s23  ;;  %s3247_s23 = sld [smem:[#allocation10 + $0x2]] }
  0x8c   :  { %923 = vrot.lane.b32.xlu1 %v174_v21, %s4481_s24 }
  0x8f   :  { %921 = vrot.lane.b32.xlu0 %v170_v9, %s4481_s24 }
  0x90   :  { %961 = vrot.lane.b32.xlu1 %v3043_v11, %s4481_s24 }
  0x91   :  { %v456_v47 = vstv %s3247_s23  ;;  %s3515_s23 = sld [smem:[#allocation10 + $0x5]] }
  0x93   :  { %959 = vrot.lane.b32.xlu0 %v3033_v62, %s4481_s24 }
  0x94   :  { %998 = vrot.lane.b32.xlu1 %v273_v27, %s4481_s24 }
  0x97   :  { %996 = vrot.lane.b32.xlu0 %v269_v25, %s4481_s24  ;;  %s3241_s24 = sld [smem:[#allocation10 + $0x49]] }
  0x98   :  { %1037 = vrot.lane.b32.xlu1 %v174_v21, %s4479_s25  ;;  %v346_v21 = vstv %s3212_s18  ;;  %s3392_s18 = sld [smem:[#allocation10 + $0x1f]] }
  0x9b   :  { %1035 = vrot.lane.b32.xlu0 %v170_v9, %s4479_s25 }
  0x9c   :  { %1075 = vrot.lane.b32.xlu1 %v3043_v11, %s4479_s25  ;;  %v302_v11 = vstv %s3197_s14  ;;  %s3360_s14 = sld [smem:[#allocation10 + $0x42]] }
  0x9d   :  { %v424_v44 = vstv %s3241_s24  ;;  %s4496_s24 = smov 127  }
  0x9f   :  { %1073 = vrot.lane.b32.xlu0 %v3033_v62, %s4479_s25 }
  0xa0   :  { %1112 = vrot.lane.b32.xlu1 %v273_v27, %s4479_s25  ;;  %v379_v27 = vstv %s3219_s27  ;;  %s3417_s27 = sld [smem:[#allocation10 + $0xd]] }
  0xa3   :  { %1110 = vrot.lane.b32.xlu0 %v269_v25, %s4479_s25  ;;  %s3238_s25 = sld [smem:[#allocation10 + $0x2e]]  ;;  %v383_v25 = vstv %s3224_s0 }
  0xa4   :  { %1176 = vperm.xlu1 %2760, %v1162_v30   ;;  %s3445_s0 = sld [smem:[#allocation10 + $0x28]] }
  0xa7   :  { %1159 = vperm.xlu0 %2759, %v1156_v31   ;;  %v416_v31 = vstv %s3234_s2  ;;  %s3464_s2 = sld [smem:[#allocation10 + $0x16]] }
  0xa8   :  { %2761 = vset.pattern.permute.xlu1 %v2881_v35 }
  0xa9   :  { %1195 = vperm.xlu1 %2761, %v1162_v30   ;;  %v420_v43 = vstv %s3238_s25  ;;  %s3457_s25 = sld [smem:[#allocation10 + $0x43]] }
  0xab   :  { %1396 = vrot.lane.b32.xlu0 %v3139_v34, %s2873_s19 }
  0xad   :  { %1398 = vrot.lane.b32.xlu1 %v3150_v38, %s2873_s19 }
  0xae   :  { %2762 = vset.pattern.permute.xlu1 %v2872_v1 }
  0xaf   :  { %1444 = vrot.lane.b32.xlu0 %v3161_v39, %s2873_s19 }
  0xb1   :  { %1446 = vrot.lane.b32.xlu1 %v3174_v41, %s2873_s19 }
  0xb3   :  { %1492 = vrot.lane.b32.xlu0 %v3185_v42, %s2873_s19 }
  0xb4   :  { %v229_v48 = vpop.permute.xlu1 %228 }
  0xb5   :  { %1494 = vrot.lane.b32.xlu1 %v3195_v45, %s2873_s19  ;;  %s3232_s19 = sld [smem:[#allocation10 + $0x40]] }
  0xb7   :  { %1530 = vrot.lane.b32.xlu0 %v3139_v34, %s4489_s20 }
  0xb8   :  { %v231_v49 = vpop.permute.xlu1 %230 }
  0xb9   :  { %v178_v50 = vpop.permute.xlu0 %177  ;;  %1532 = vrot.lane.b32.xlu1 %v3150_v38, %s4489_s20  ;;  %v232_v51 = vsel %vm183_vm6, %v229_v48, %v231_v49  ;;  %v233_v52 = vsel %vm183_vm6, %v231_v49, %v229_v48 }
  0xba   :  { %v236_v53 = vcombine.low %v233_v52, %v232_v51  ;;  %v460_v52 = vstv %s3255_s22  ;;  %s3471_s22 = sld [smem:[#allocation10 + $0x31]] }
  0xbb   :  { %1567 = vrot.lane.b32.xlu0 %v3161_v39, %s4489_s20  ;;  %v387_v30 = vstv %s3232_s19  ;;  %s3666_s19 = sld [smem:[#allocation10 + $0x18]] }
  0xbc   :  { %v243_v5 = vrot.slane %v236_v53, %v3222_v0 }
  0xbd   :  { %v180_v56 = vpop.permute.xlu0 %179  ;;  %1569 = vrot.lane.b32.xlu1 %v3174_v41, %s4489_s20 }
  0xbe   :  { %v250_v59 = vrot.slane %v243_v5, %v3222_v0  ;;  %v184_v60 = vsel %vm183_vm6, %v178_v50, %v180_v56  ;;  %v185_v61 = vsel %vm183_vm6, %v180_v56, %v178_v50  ;;  %v279_v62 = vpop.permute.xlu1 %278 }
  0xbf   :  { %v188_v8 = vcombine.low %v185_v61, %v184_v60  ;;  %1604 = vrot.lane.b32.xlu0 %v3185_v42, %s4489_s20 }
  0xc0   :  { %v252_v28 = vmul.f32 %v250_v59, %v165_v13 }
  0xc1   :  { %v195_v14 = vrot.slane %v188_v8, %v3222_v0  ;;  %v277_v9 = vpop.permute.xlu0 %276  ;;  %1606 = vrot.lane.b32.xlu1 %v3195_v45, %s4489_s20  ;;  %s4494_s20 = smov 15  }
  0xc2   :  { %v280_v18 = vsel %vm183_vm6, %v277_v9, %v279_v62  ;;  %v318_v19 = vpop.permute.xlu1 %317  ;;  %v281_v26 = vsel %vm183_vm6, %v279_v62, %v277_v9  ;;  %v255_v60 = vmul.f32 %v254_v54, %v252_v28  ;;  %v259_v61 = vmul.f32 %v258_v55, %v252_v28  ;;  %v3332_v55 = vld [vmem:[%s4470_s1 + $0x1] ss:$8 sm:$0x3] }
  0xc3   :  { %v202_v12 = vrot.slane %v195_v14, %v3222_v0  ;;  %1642 = vrot.lane.b32.xlu0 %v3139_v34, %s4490_s21  ;;  %v284_v29 = vcombine.low %v281_v26, %v280_v18  ;;  %v263_v62 = vmul.f32 %v262_v57, %v252_v28 }
  0xc5   :  { %v204_v33 = vmul.f32 %v202_v12, %v165_v13  ;;  %v316_v37 = vpop.permute.xlu0 %315  ;;  %1644 = vrot.lane.b32.xlu1 %v3150_v38, %s4490_s21  ;;  %v291_v48 = vrot.slane %v284_v29, %v3222_v0 }
  0xc6   :  { %v320_v49 = vsel %vm319_vm7, %v316_v37, %v318_v19  ;;  %v321_v50 = vsel %vm319_vm7, %v318_v19, %v316_v37  ;;  %v356_v51 = vpop.permute.xlu1 %355 }
  0xc7   :  { %v207_v53 = vmul.f32 %v206_v10, %v204_v33  ;;  %v211_v5 = vmul.f32 %v210_v3, %v204_v33  ;;  %v215_v56 = vmul.f32 %v214_v4, %v204_v33  ;;  %v324_v59 = vcombine.low %v321_v50, %v320_v49  ;;  %1679 = vrot.lane.b32.xlu0 %v3161_v39, %s4490_s21 }
  0xc8   :  { %v298_v8 = vrot.slane %v291_v48, %v3222_v0  ;;  %v493_v49 = vstv %s3282_s3  ;;  %v497_v50 = vstv %s3291_s30  ;;  %s3526_s30 = sld [smem:[#allocation10 + $0x20]] }
  0xc9   :  { %v208_v10 = vadd.f32 %v207_v53, %v160_v63  ;;  %v212_v3 = vadd.f32 %v211_v5, %v162_v7  ;;  %v216_v4 = vadd.f32 %v215_v56, %v164_v2  ;;  %v331_v14 = vrot.slane %v324_v59, %v3222_v0  ;;  %v354_v9 = vpop.permute.xlu0 %353  ;;  %1681 = vrot.lane.b32.xlu1 %v3174_v41, %s4490_s21  ;;  %s3339_s21 = sld [smem:[#allocation10 + $0x39]] }
  0xca   :  { %v300_v54 = vmul.f32 %v298_v8, %v165_v13  ;;  %v357_v57 = vsel %vm319_vm7, %v354_v9, %v356_v51  ;;  %v358_v63 = vsel %vm319_vm7, %v356_v51, %v354_v9  ;;  %v393_v7 = vpop.permute.xlu1 %392  ;;  %v464_v2 = vstv %s3275_s29  ;;  %s3715_s29 = sld [smem:[#allocation10 + $0x3d]] }
  0xcb   :  { %v256_v18 = vadd.f32 %v255_v60, %v208_v10  ;;  %v260_v13 = vadd.f32 %v259_v61, %v212_v3  ;;  %v264_v19 = vadd.f32 %v263_v62, %v216_v4  ;;  %v338_v12 = vrot.slane %v331_v14, %v3222_v0  ;;  %1716 = vrot.lane.b32.xlu0 %v3185_v42, %s4494_s20  ;;  %s3722_s3 = sld [smem:[#allocation10 + $0x10]] }
  0xcc   :  { %v303_v26 = vmul.f32 %v302_v11, %v300_v54  ;;  %v307_v28 = vmul.f32 %v306_v6, %v300_v54  ;;  %v311_v29 = vmul.f32 %v310_v17, %v300_v54  ;;  %v361_v33 = vcombine.low %v358_v63, %v357_v57 }
  0xcd   :  { %v340_v37 = vmul.f32 %v3332_v55, %v338_v12  ;;  %v391_v48 = vpop.permute.xlu0 %390  ;;  %1718 = vrot.lane.b32.xlu1 %v3195_v45, %s4494_s20  ;;  %v501_v51 = vstv %s3295_s10  ;;  %s3375_s20 = sld [smem:[#allocation10 + $0x30]]  ;;  %v530_v10 = vstv %s3302_s11  ;;  %v574_v12 = vstv %s3327_s4 }
  0xce   :  { %v304_v11 = vadd.f32 %v303_v26, %v256_v18  ;;  %v308_v6 = vadd.f32 %v307_v28, %v260_v13  ;;  %v312_v17 = vadd.f32 %v311_v29, %v264_v19  ;;  %v368_v53 = vrot.slane %v361_v33, %v3222_v0  ;;  %v432_v5 = vpop.permute.xlu1 %431  ;;  %s3536_s10 = sld [smem:[#allocation10 + $0x3b]] }
  0xcf   :  { %v343_v56 = vmul.f32 %v342_v20, %v340_v37  ;;  %v347_v59 = vmul.f32 %v346_v21, %v340_v37  ;;  %v351_v60 = vmul.f32 %v350_v22, %v340_v37  ;;  %v394_v61 = vsel %vm319_vm7, %v391_v48, %v393_v7  ;;  %1754 = vrot.lane.b32.xlu0 %v3139_v34, %s4495_s16  ;;  %s3539_s11 = sld [smem:[#allocation10 + $0xe]] }
  0xd0   :  { %v375_v62 = vrot.slane %v368_v53, %v3222_v0  ;;  %v395_v8 = vsel %vm319_vm7, %v393_v7, %v391_v48  ;;  %v534_v20 = vstv %s3310_s12  ;;  %v538_v7 = vstv %s3315_s13  ;;  %v3422_v53 = vld [vmem:[%s4470_s1 + $0x2] ss:$8 sm:$0x3]  ;;  %s4497_s12 = smov 113   ;;  %s3550_s13 = sld [smem:[#allocation10 + $0x29]] }
  0xd1   :  { %v344_v21 = vadd.f32 %v343_v56, %v304_v11  ;;  %v348_v22 = vadd.f32 %v347_v59, %v308_v6  ;;  %v352_v3 = vadd.f32 %v351_v60, %v312_v17  ;;  %v398_v4 = vcombine.low %v395_v8, %v394_v61  ;;  %v430_v14 = vpop.permute.xlu0 %429  ;;  %1756 = vrot.lane.b32.xlu1 %v3150_v38, %s4495_s16  ;;  %s3778_s4 = sld [smem:[#allocation10 + $0x8]] }
  0xd2   :  { %v377_v9 = vmul.f32 %v3332_v55, %v375_v62  ;;  %v434_v54 = vsel %vm433_vm8, %v430_v14, %v432_v5  ;;  %v435_v57 = vsel %vm433_vm8, %v432_v5, %v430_v14  ;;  %v470_v63 = vpop.permute.xlu1 %469  ;;  %v570_v19 = vstv %s3322_s28  ;;  %s3581_s28 = sld [smem:[#allocation10 + $0x4d]] }
  0xd3   :  { %v405_v18 = vrot.slane %v398_v4, %v3222_v0  ;;  %v438_v13 = vcombine.low %v435_v57, %v434_v54  ;;  %1791 = vrot.lane.b32.xlu0 %v3161_v39, %s4495_s16  ;;  %v578_v33 = vstv %s3339_s21  ;;  %v615_v62 = vstv %s3360_s14  ;;  %s3577_s21 = sld [smem:[#allocation10 + $0x32]]  ;;  %s4498_s14 = smov 112  }
  0xd4   :  { %v380_v26 = vmul.f32 %v379_v27, %v377_v9  ;;  %v384_v28 = vmul.f32 %v383_v25, %v377_v9  ;;  %v388_v29 = vmul.f32 %v387_v30, %v377_v9  ;;  %v607_v27 = vstv %s3344_s5  ;;  %s3783_s5 = sld [smem:[#allocation10 + $0x23]] }
  0xd5   :  { %v412_v37 = vrot.slane %v405_v18, %v3222_v0  ;;  %v445_v48 = vrot.slane %v438_v13, %v3222_v0  ;;  %v468_v11 = vpop.permute.xlu0 %467  ;;  %1793 = vrot.lane.b32.xlu1 %v3174_v41, %s4495_s16  ;;  %v611_v25 = vstv %s3352_s9  ;;  %s3599_s9 = sld [smem:[#allocation10 + $0x6]] }
  0xd6   :  { %v381_v30 = vadd.f32 %v380_v26, %v344_v21  ;;  %v385_v6 = vadd.f32 %v384_v28, %v348_v22  ;;  %v389_v17 = vadd.f32 %v388_v29, %v352_v3  ;;  %v471_v5 = vsel %vm433_vm8, %v468_v11, %v470_v63  ;;  %v507_v56 = vpop.permute.xlu1 %506 }
  0xd7   :  { %v414_v59 = vmul.f32 %v3332_v55, %v412_v37  ;;  %v452_v60 = vrot.slane %v445_v48, %v3222_v0  ;;  %v472_v61 = vsel %vm433_vm8, %v470_v63, %v468_v11  ;;  %1828 = vrot.lane.b32.xlu0 %v3185_v42, %s4495_s16  ;;  %v644_v21 = vstv %s3363_s15  ;;  %s3634_s15 = sld [smem:[#allocation10 + $0x21]] }
  0xd8   :  { %v475_v8 = vcombine.low %v472_v61, %v471_v5  ;;  %v648_v22 = vstv %s3375_s20  ;;  %v656_v3 = vstv %s3382_s17  ;;  %s3570_s17 = sld [smem:[#allocation10 + $0x17]] }
  0xd9   :  { %v417_v4 = vmul.f32 %v416_v31, %v414_v59  ;;  %v421_v14 = vmul.f32 %v420_v43, %v414_v59  ;;  %v425_v55 = vmul.f32 %v424_v44, %v414_v59  ;;  %v454_v9 = vmul.f32 %v3422_v53, %v452_v60  ;;  %v505_v54 = vpop.permute.xlu0 %504  ;;  %1830 = vrot.lane.b32.xlu1 %v3195_v45, %s4495_s16  ;;  %s3559_s16 = sld [smem:[#allocation10 + $0x44]] }
  0xda   :  { %v482_v57 = vrot.slane %v475_v8, %v3222_v0  ;;  %v508_v63 = vsel %vm433_vm8, %v505_v54, %v507_v56  ;;  %v509_v31 = vsel %vm433_vm8, %v507_v56, %v505_v54  ;;  %v546_v43 = vpop.permute.xlu1 %545  ;;  %v660_v44 = vstv %s3392_s18  ;;  %s3640_s20 = sld [smem:[#allocation10 + $0x3c]] }
  0xdb   :  { %v418_v18 = vadd.f32 %v417_v4, %v381_v30  ;;  %v422_v13 = vadd.f32 %v421_v14, %v385_v6  ;;  %v426_v26 = vadd.f32 %v425_v55, %v389_v17  ;;  %v457_v28 = vmul.f32 %v456_v47, %v454_v9  ;;  %1902 = vrot.lane.b32.xlu0 %v3139_v34, %s4496_s24  ;;  %s3647_s18 = sld [smem:[#allocation10 + $0xf]] }
  0xdc   :  { %v461_v29 = vmul.f32 %v460_v52, %v454_v9  ;;  %v465_v37 = vmul.f32 %v464_v2, %v454_v9  ;;  %v489_v48 = vrot.slane %v482_v57, %v3222_v0  ;;  %v512_v11 = vcombine.low %v509_v31, %v508_v63 }
  0xdd   :  { %v458_v30 = vadd.f32 %v457_v28, %v418_v18  ;;  %v544_v5 = vpop.permute.xlu0 %543  ;;  %1904 = vrot.lane.b32.xlu1 %v3150_v38, %s4496_s24  ;;  %v652_v47 = vstv %s3399_s26  ;;  %v664_v6 = vstv %s3409_s8  ;;  %v668_v17 = vstv %s3417_s27  ;;  %s3504_s8 = sld [smem:[#allocation10 + $0x4c]] }
  0xde   :  { %v462_v52 = vadd.f32 %v461_v29, %v422_v13  ;;  %v466_v2 = vadd.f32 %v465_v37, %v426_v26  ;;  %v491_v56 = vmul.f32 %v3422_v53, %v489_v48  ;;  %v519_v59 = vrot.slane %v512_v11, %v3222_v0  ;;  %v584_v60 = vpop.permute.xlu1 %583  ;;  %v2576_v11 = vld [vmem:[%s4470_s1 + $0x3] ss:$8 sm:$0x3]  ;;  %s3653_s26 = sld [smem:[#allocation10 + $0x2a]] }
  0xdf   :  { %v548_v61 = vsel %vm547_vm9, %v544_v5, %v546_v43  ;;  %v549_v8 = vsel %vm547_vm9, %v546_v43, %v544_v5  ;;  %1939 = vrot.lane.b32.xlu0 %v3161_v39, %s4496_s24  ;;  %v3482_v4 = vmul.f32 %v656_v3, %v3048_v15  ;;  %v3485_v14 = vmul.f32 %v660_v44, %v3048_v15  ;;  %s3661_s27 = sld [smem:[#allocation10 + $0x45]] }
  0xe0   :  { %v494_v55 = vmul.f32 %v493_v49, %v491_v56  ;;  %v498_v9 = vmul.f32 %v497_v50, %v491_v56  ;;  %v502_v54 = vmul.f32 %v501_v51, %v491_v56  ;;  %v526_v57 = vrot.slane %v519_v59, %v3222_v0 }
  0xe1   :  { %v552_v63 = vcombine.low %v549_v8, %v548_v61  ;;  %v582_v31 = vpop.permute.xlu0 %581  ;;  %1941 = vrot.lane.b32.xlu1 %v3174_v41, %s4496_s24  ;;  %v3498_v3 = vmul.f32 %v664_v6, %v3048_v15  ;;  %v3501_v43 = vmul.f32 %v668_v17, %v3027_v58  ;;  %v672_v49 = vstv %s3445_s0  ;;  %s3681_s0 = sld [smem:[#allocation10 + $0x33]] }
  0xe2   :  { %v495_v50 = vadd.f32 %v494_v55, %v458_v30  ;;  %v499_v51 = vadd.f32 %v498_v9, %v462_v52  ;;  %v503_v44 = vadd.f32 %v502_v54, %v466_v2  ;;  %v528_v18 = vmul.f32 %v3422_v53, %v526_v57  ;;  %v621_v13 = vpop.permute.xlu1 %620 }
  0xe3   :  { %v559_v26 = vrot.slane %v552_v63, %v3222_v0  ;;  %v585_v15 = vsel %vm547_vm9, %v582_v31, %v584_v60  ;;  %v586_v28 = vsel %vm547_vm9, %v584_v60, %v582_v31  ;;  %1976 = vrot.lane.b32.xlu0 %v3185_v42, %s4496_s24  ;;  %v676_v29 = vstv %s3457_s25  ;;  %s3949_s25 = sld [smem:[#allocation10 + $0x38]] }
  0xe4   :  { %v531_v37 = vmul.f32 %v530_v10, %v528_v18  ;;  %v535_v53 = vmul.f32 %v534_v20, %v528_v18  ;;  %v539_v48 = vmul.f32 %v538_v7, %v528_v18  ;;  %v589_v30 = vcombine.low %v586_v28, %v585_v15 }
  0xe5   :  { %v566_v5 = vrot.slane %v559_v26, %v3222_v0  ;;  %v619_v6 = vpop.permute.xlu0 %618  ;;  %1978 = vrot.lane.b32.xlu1 %v3195_v45, %s4496_s24  ;;  %v3532_v17 = vmul.f32 %v672_v49, %v3027_v58  ;;  %v680_v10 = vstv %s3464_s2  ;;  %v684_v20 = vstv %s3471_s22  ;;  %s3690_s2 = sld [smem:[#allocation10 + $0x4e]] }
  0xe6   :  { %v532_v7 = vadd.f32 %v531_v37, %v495_v50  ;;  %v536_v52 = vadd.f32 %v535_v53, %v499_v51  ;;  %v540_v2 = vadd.f32 %v539_v48, %v503_v44  ;;  %v596_v56 = vrot.slane %v589_v30, %v3222_v0  ;;  %v696_v59 = vpop.permute.xlu1 %695  ;;  %s3700_s22 = sld [smem:[#allocation10 + $0x7]] }
  0xe7   :  { %v568_v60 = vmul.f32 %v2576_v11, %v566_v5  ;;  %v622_v61 = vsel %vm547_vm9, %v619_v6, %v621_v13  ;;  %v623_v8 = vsel %vm547_vm9, %v621_v13, %v619_v6  ;;  %2014 = vrot.lane.b32.xlu0 %v3139_v34, %s4497_s12  ;;  %v3548_v55 = vmul.f32 %v676_v29, %v3027_v58  ;;  %s3943_s24 = sld [smem:[#allocation10 + $0x1d]] }
  0xe8   :  { %v603_v9 = vrot.slane %v596_v56, %v3222_v0  ;;  %v626_v54 = vcombine.low %v623_v8, %v622_v61  ;;  %v3554_v57 = vmul.f32 %v680_v10, %v3057_v23  ;;  %v3557_v63 = vmul.f32 %v684_v20, %v3057_v23 }
  0xe9   :  { %v571_v31 = vmul.f32 %v570_v19, %v568_v60  ;;  %v575_v49 = vmul.f32 %v574_v12, %v568_v60  ;;  %v579_v58 = vmul.f32 %v578_v33, %v568_v60  ;;  %v688_v50 = vstv %s3504_s8  ;;  %v694_v51 = vpop.permute.xlu0 %693  ;;  %2016 = vrot.lane.b32.xlu1 %v3150_v38, %s4497_s12  ;;  %s4499_s8 = smov 111  }
  0xea   :  { %v605_v44 = vmul.f32 %v2576_v11, %v603_v9  ;;  %v633_v18 = vrot.slane %v626_v54, %v3222_v0  ;;  %v698_v19 = vsel %vm697_vm10, %v694_v51, %v696_v59  ;;  %v699_v12 = vsel %vm697_vm10, %v696_v59, %v694_v51  ;;  %v734_v33 = vpop.permute.xlu1 %733 }
  0xeb   :  { %v572_v13 = vadd.f32 %v571_v31, %v532_v7  ;;  %v576_v26 = vadd.f32 %v575_v49, %v536_v52  ;;  %v580_v15 = vadd.f32 %v579_v58, %v540_v2  ;;  %v702_v28 = vcombine.low %v698_v19, %v699_v12  ;;  %2051 = vrot.lane.b32.xlu0 %v3161_v39, %s4497_s12  ;;  %v3604_v7 = vld [vmem:[%s4470_s1 + $0x5] ss:$8 sm:$0x3] }
  0xec   :  { %v608_v29 = vmul.f32 %v607_v27, %v605_v44  ;;  %v612_v37 = vmul.f32 %v611_v25, %v605_v44  ;;  %v616_v53 = vmul.f32 %v615_v62, %v605_v44  ;;  %v640_v48 = vrot.slane %v633_v18, %v3222_v0 }
  0xed   :  { %v3592_v30 = vmul.f32 %v688_v50, %v3057_v23  ;;  %v720_v5 = vstv %s3515_s23  ;;  %v724_v6 = vstv %s3526_s30  ;;  %v709_v10 = vrot.slane %v702_v28, %v3222_v0  ;;  %v732_v20 = vpop.permute.xlu0 %731  ;;  %2053 = vrot.lane.b32.xlu1 %v3174_v41, %s4497_s12  ;;  %s3710_s23 = sld [smem:[#allocation10 + $0x22]] }
  0xee   :  { %v609_v27 = vadd.f32 %v608_v29, %v572_v13  ;;  %v613_v25 = vadd.f32 %v612_v37, %v576_v26  ;;  %v617_v62 = vadd.f32 %v616_v53, %v580_v15  ;;  %v642_v23 = vmul.f32 %v2576_v11, %v640_v48  ;;  %v771_v52 = vpop.permute.xlu1 %770  ;;  %s3731_s30 = sld [smem:[#allocation10 + $0x2b]] }
  0xef   :  { %v728_v2 = vstv %s3536_s10  ;;  %v716_v56 = vrot.slane %v709_v10, %v3222_v0  ;;  %v735_v59 = vsel %vm697_vm10, %v732_v20, %v734_v33  ;;  %v736_v60 = vsel %vm697_vm10, %v734_v33, %v732_v20  ;;  %2088 = vrot.lane.b32.xlu0 %v3185_v42, %s4497_s12  ;;  %s3733_s10 = sld [smem:[#allocation10 + $0x46]] }
  0xf0   :  { %v645_v11 = vmul.f32 %v644_v21, %v642_v23  ;;  %v649_v61 = vmul.f32 %v648_v22, %v642_v23  ;;  %v653_v8 = vmul.f32 %v652_v47, %v642_v23  ;;  %v739_v9 = vcombine.low %v735_v59, %v736_v60 }
  0xf1   :  { %v718_v54 = vmul.f32 %v3604_v7, %v716_v56  ;;  %v757_v31 = vstv %s3539_s11  ;;  %v761_v49 = vstv %s3550_s13  ;;  %v765_v58 = vstv %s3559_s16  ;;  %v769_v50 = vpop.permute.xlu0 %768  ;;  %2090 = vrot.lane.b32.xlu1 %v3195_v45, %s4497_s12  ;;  %s3754_s13 = sld [smem:[#allocation10 + $0x19]] }
  0xf2   :  { %v646_v51 = vadd.f32 %v645_v11, %v609_v27  ;;  %v650_v44 = vadd.f32 %v649_v61, %v613_v25  ;;  %v654_v18 = vadd.f32 %v653_v8, %v617_v62  ;;  %v746_v21 = vrot.slane %v739_v9, %v3222_v0  ;;  %v810_v22 = vpop.permute.xlu1 %809  ;;  %s3863_s11 = sld [smem:[#allocation10 + $0x36]] }
  0xf3   :  { %v794_v19 = vstv %s3570_s17  ;;  %v798_v12 = vstv %s3577_s21  ;;  %v802_v47 = vstv %s3581_s28  ;;  %v772_v33 = vsel %vm697_vm10, %v769_v50, %v771_v52  ;;  %2126 = vrot.lane.b32.xlu0 %v3139_v34, %s4498_s14  ;;  %s3763_s21 = sld [smem:[#allocation10 + $0x34]] }
  0xf4   :  { %v658_v13 = vadd.f32 %v3482_v4, %v646_v51  ;;  %v662_v26 = vadd.f32 %v3485_v14, %v650_v44  ;;  %v666_v15 = vadd.f32 %v3498_v3, %v654_v18  ;;  %v753_v28 = vrot.slane %v746_v21, %v3222_v0  ;;  %v2605_v51 = vld [vmem:[%s4470_s1 + $0x6] ss:$8 sm:$0x3]  ;;  %s3868_s12 = sld [smem:[#allocation10 + $0x9]] }
  0xf5   :  { %v721_v29 = vmul.f32 %v720_v5, %v718_v54  ;;  %v725_v37 = vmul.f32 %v724_v6, %v718_v54  ;;  %v773_v53 = vsel %vm697_vm10, %v771_v52, %v769_v50  ;;  %v834_v48 = vstv %s3599_s9  ;;  %v808_v10 = vpop.permute.xlu0 %807  ;;  %2128 = vrot.lane.b32.xlu1 %v3150_v38, %s4498_s14  ;;  %s3874_s16 = sld [smem:[#allocation10 + $0x3f]] }
  0xf6   :  { %v670_v4 = vadd.f32 %v3501_v43, %v658_v13  ;;  %v674_v14 = vadd.f32 %v3532_v17, %v662_v26  ;;  %v678_v3 = vadd.f32 %v3548_v55, %v666_v15  ;;  %v755_v20 = vmul.f32 %v3604_v7, %v753_v28  ;;  %v848_v5 = vpop.permute.xlu1 %847  ;;  %s3880_s17 = sld [smem:[#allocation10 + $0x12]] }
  0xf7   :  { %v729_v6 = vmul.f32 %v728_v2, %v718_v54  ;;  %v776_v27 = vcombine.low %v772_v33, %v773_v53  ;;  %v812_v25 = vsel %vm811_vm11, %v808_v10, %v810_v22  ;;  %v813_v62 = vsel %vm811_vm11, %v810_v22, %v808_v10  ;;  %2163 = vrot.lane.b32.xlu0 %v3161_v39, %s4498_s14  ;;  %s3887_s28 = sld [smem:[#allocation10 + $0x48]] }
  0xf8   :  { %v682_v43 = vadd.f32 %v3554_v57, %v670_v4  ;;  %v686_v17 = vadd.f32 %v3557_v63, %v674_v14  ;;  %v690_v55 = vadd.f32 %v3592_v30, %v678_v3  ;;  %v758_v23 = vmul.f32 %v757_v31, %v755_v20  ;;  %s3889_s9 = sld [smem:[#allocation10 + $0x1]] }
  0xf9   :  { %v762_v52 = vmul.f32 %v761_v49, %v755_v20  ;;  %v766_v2 = vmul.f32 %v765_v58, %v755_v20  ;;  %v783_v56 = vrot.slane %v776_v27, %v3222_v0  ;;  %v816_v59 = vcombine.low %v812_v25, %v813_v62  ;;  %v846_v60 = vpop.permute.xlu0 %845  ;;  %2165 = vrot.lane.b32.xlu1 %v3174_v41, %s4498_s14 }
  0xfa   :  { %v722_v57 = vadd.f32 %v721_v29, %v682_v43  ;;  %v726_v11 = vadd.f32 %v725_v37, %v686_v17  ;;  %v730_v63 = vadd.f32 %v729_v6, %v690_v55  ;;  %v849_v30 = vsel %vm811_vm11, %v846_v60, %v848_v5  ;;  %v885_v61 = vpop.permute.xlu1 %884 }
  0xfb   :  { %v790_v8 = vrot.slane %v783_v56, %v3222_v0  ;;  %v838_v9 = vstv %s3634_s15  ;;  %v823_v54 = vrot.slane %v816_v59, %v3222_v0  ;;  %v850_v31 = vsel %vm811_vm11, %v848_v5, %v846_v60  ;;  %2200 = vrot.lane.b32.xlu0 %v3185_v42, %s4498_s14  ;;  %s3905_s15 = sld [smem:[#allocation10 + $0x25]] }
  0xfc   :  { %v759_v49 = vadd.f32 %v758_v23, %v722_v57  ;;  %v763_v58 = vadd.f32 %v762_v52, %v726_v11  ;;  %v767_v50 = vadd.f32 %v766_v2, %v730_v63  ;;  %v853_v44 = vcombine.low %v849_v30, %v850_v31 }
  0xfd   :  { %v792_v18 = vmul.f32 %v3604_v7, %v790_v8  ;;  %v842_v21 = vstv %s3640_s20  ;;  %v830_v22 = vrot.slane %v823_v54, %v3222_v0  ;;  %v871_v33 = vstv %s3647_s18  ;;  %v883_v13 = vpop.permute.xlu0 %882  ;;  %2202 = vrot.lane.b32.xlu1 %v3195_v45, %s4498_s14  ;;  %s4500_s20 = sld [smem:[#allocation18_spill]] }
  0xfe   :  { %v875_v26 = vstv %s3653_s26  ;;  %v860_v15 = vrot.slane %v853_v44, %v3222_v0  ;;  %v886_v28 = vsel %vm811_vm11, %v883_v13, %v885_v61  ;;  %v887_v7 = vsel %vm811_vm11, %v885_v61, %v883_v13  ;;  %v924_v29 = vpop.permute.xlu1 %923  ;;  %s3798_s18 = sld [smem:[#allocation10 + $0x3e]] }
  0xff   :  { %v795_v37 = vmul.f32 %v794_v19, %v792_v18  ;;  %v799_v53 = vmul.f32 %v798_v12, %v792_v18  ;;  %v803_v10 = vmul.f32 %v802_v47, %v792_v18  ;;  %v832_v4 = vmul.f32 %v2605_v51, %v830_v22  ;;  %2238 = vrot.lane.b32.xlu0 %v3139_v34, %s4499_s8  ;;  %s3802_s26 = sld [smem:[#allocation10 + $0x11]] }
 0x100   :  { %v879_v14 = vstv %s3661_s27  ;;  %v867_v3 = vrot.slane %v860_v15, %v3222_v0  ;;  %v908_v20 = vstv %s3666_s19  ;;  %v890_v5 = vcombine.low %v886_v28, %v887_v7  ;;  %s3808_s27 = sld [smem:[#allocation10 + $0x2c]] }
 0x101   :  { %v796_v6 = vadd.f32 %v795_v37, %v759_v49  ;;  %v800_v19 = vadd.f32 %v799_v53, %v763_v58  ;;  %v804_v27 = vadd.f32 %v803_v10, %v767_v50  ;;  %v835_v12 = vmul.f32 %v834_v48, %v832_v4  ;;  %v922_v47 = vpop.permute.xlu0 %921  ;;  %2240 = vrot.lane.b32.xlu1 %v3150_v38, %s4499_s8  ;;  %v3746_v58 = vld [vmem:[%s4470_s1 + $0x7] ss:$8 sm:$0x3]  ;;  %s3903_s14 = sld [smem:[#allocation10 + $0xa]] }
 0x102   :  { %v839_v34 = vmul.f32 %v838_v9, %v832_v4  ;;  %v843_v25 = vmul.f32 %v842_v21, %v832_v4  ;;  %v869_v62 = vmul.f32 %v2605_v51, %v867_v3  ;;  %v897_v43 = vrot.slane %v890_v5, %v3222_v0  ;;  %v962_v17 = vpop.permute.xlu1 %961  ;;  %v2358_v53 = vld [vmem:[%s4476_s7] sm:$0xff]  ;;  %s3791_s7 = sld [smem:[#allocation10 + $0x4f]] }
 0x103   :  { %v836_v55 = vadd.f32 %v835_v12, %v796_v6  ;;  %v912_v23 = vstv %s3681_s0  ;;  %v926_v52 = vsel %vm925_vm12, %v922_v47, %v924_v29  ;;  %v927_v48 = vsel %vm925_vm12, %v924_v29, %v922_v47  ;;  %2275 = vrot.lane.b32.xlu0 %v3161_v39, %s4499_s8  ;;  %s4012_s0 = sld [smem:[#allocation10 + $0x27]] }
 0x104   :  { %v840_v38 = vadd.f32 %v839_v34, %v800_v19  ;;  %v844_v2 = vadd.f32 %v843_v25, %v804_v27  ;;  %v872_v56 = vmul.f32 %v871_v33, %v869_v62  ;;  %v876_v59 = vmul.f32 %v875_v26, %v869_v62  ;;  %v3788_v19 = vld [vmem:[%s4500_s20] sm:$0xff]  ;;  %s3907_s20 = sld [smem:[#allocation10 + $0x40]] }
 0x105   :  { %v880_v60 = vmul.f32 %v879_v14, %v869_v62  ;;  %v916_v57 = vstv %s3690_s2  ;;  %v904_v11 = vrot.slane %v897_v43, %v3222_v0  ;;  %v930_v63 = vcombine.low %v926_v52, %v927_v48  ;;  %v960_v30 = vpop.permute.xlu0 %959  ;;  %2277 = vrot.lane.b32.xlu1 %v3174_v41, %s4499_s8  ;;  %s3819_s2 = sld [smem:[#allocation10 + $0x47]] }
 0x106   :  { %v873_v39 = vadd.f32 %v872_v56, %v836_v55  ;;  %v877_v61 = vadd.f32 %v876_v59, %v840_v38  ;;  %v963_v8 = vsel %vm925_vm12, %v960_v30, %v962_v17  ;;  %v964_v9 = vsel %vm925_vm12, %v962_v17, %v960_v30  ;;  %v999_v54 = vpop.permute.xlu1 %998  ;;  %s4026_s19 = sld [smem:[#allocation10 + $0x4]] }
 0x107   :  { %v881_v31 = vadd.f32 %v880_v60, %v844_v2  ;;  %v906_v49 = vmul.f32 %v2605_v51, %v904_v11  ;;  %v937_v50 = vrot.slane %v930_v63, %v3222_v0  ;;  %v967_v41 = vcombine.low %v963_v8, %v964_v9  ;;  %2312 = vrot.lane.b32.xlu0 %v3185_v42, %s4499_s8  ;;  %v3759_v51 = vld [vmem:[%s4475_s6] sm:$0xff] }
 0x108   :  { %v948_v44 = vstv %s3700_s22  ;;  %v952_v18 = vstv %s3710_s23  ;;  %v956_v21 = vstv %s3715_s29  ;;  %v985_v15 = vstv %s3722_s3  ;;  %s3828_s22 = sld [smem:[#allocation10 + $0x1a]] }
 0x109   :  { %v909_v22 = vmul.f32 %v908_v20, %v906_v49  ;;  %v913_v33 = vmul.f32 %v912_v23, %v906_v49  ;;  %v917_v13 = vmul.f32 %v916_v57, %v906_v49  ;;  %v944_v26 = vrot.slane %v937_v50, %v3222_v0  ;;  %v997_v42 = vpop.permute.xlu0 %996  ;;  %2314 = vrot.lane.b32.xlu1 %v3195_v45, %s4499_s8  ;;  %v2770_v49 = vld [vmem:[%s4475_s6] sm:$0xff]  ;;  %s3832_s6 = sld [smem:[#allocation10 + $0x35]] }
 0x10a   :  { %v974_v28 = vrot.slane %v967_v41, %v3222_v0  ;;  %v1000_v7 = vsel %vm925_vm12, %v997_v42, %v999_v54  ;;  %v1001_v29 = vsel %vm925_vm12, %v999_v54, %v997_v42  ;;  %v1038_v37 = vpop.permute.xlu1 %1037  ;;  %v989_v45 = vstv %s3731_s30  ;;  %s3834_s8 = sld [smem:[#allocation10 + $0x50]] }
 0x10b   :  { %v910_v10 = vadd.f32 %v909_v22, %v873_v39  ;;  %v914_v4 = vadd.f32 %v913_v33, %v877_v61  ;;  %v918_v14 = vadd.f32 %v917_v13, %v881_v31  ;;  %v946_v3 = vmul.f32 %v3746_v58, %v944_v26  ;;  %2378 = vperm.xlu0 %2759, %v3759_v51   ;;  %v2625_v31 = vld [vmem:[%s4470_s1 + $0x10] ss:$8 sm:$0x3]  ;;  %s3842_s23 = sld [smem:[#allocation11]] }
 0x10c   :  { %v993_v20 = vstv %s3733_s10  ;;  %v981_v5 = vrot.slane %v974_v28, %v3222_v0  ;;  %v1004_v6 = vcombine.low %v1000_v7, %v1001_v29  ;;  %v1022_v57 = vstv %s3754_s13  ;;  %s3845_s29 = sld [smem:[#allocation11 + $0x1]] }
 0x10d   :  { %v949_v27 = vmul.f32 %v948_v44, %v946_v3  ;;  %v953_v12 = vmul.f32 %v952_v18, %v946_v3  ;;  %v957_v47 = vmul.f32 %v956_v21, %v946_v3  ;;  %v1036_v34 = vpop.permute.xlu0 %1035  ;;  %2361 = vperm.xlu1 %2762, %v2358_v53   ;;  %v1026_v11 = vstv %s3763_s21  ;;  %s3851_s3 = sld [smem:[#allocation11 + $0x2]] }
 0x10e   :  { %v983_v25 = vmul.f32 %v3746_v58, %v981_v5  ;;  %v1011_v62 = vrot.slane %v1004_v6, %v3222_v0  ;;  %v1040_v43 = vsel %vm1039_vm13, %v1036_v34, %v1038_v37  ;;  %v1041_v17 = vsel %vm1039_vm13, %v1038_v37, %v1036_v34  ;;  %v1076_v55 = vpop.permute.xlu1 %1075  ;;  %s3855_s30 = sld [smem:[#allocation10]] }
 0x10f   :  { %v950_v23 = vadd.f32 %v949_v27, %v910_v10  ;;  %v954_v52 = vadd.f32 %v953_v12, %v914_v4  ;;  %v958_v48 = vadd.f32 %v957_v47, %v918_v14  ;;  %v1044_v38 = vcombine.low %v1040_v43, %v1041_v17  ;;  %1235 = vperm.xlu0 %2759, %v3788_v19   ;;  %s3858_s10 = sld [smem:[#allocation10 + $0x1b]] }
 0x110   :  { %v986_v2 = vmul.f32 %v985_v15, %v983_v25  ;;  %v990_v56 = vmul.f32 %v989_v45, %v983_v25  ;;  %v994_v59 = vmul.f32 %v993_v20, %v983_v25  ;;  %v1018_v60 = vrot.slane %v1011_v62, %v3222_v0  ;;  %s3871_s13 = sld [smem:[#allocation10 + $0x24]] }
 0x111   :  { %v1051_v63 = vrot.slane %v1044_v38, %v3222_v0  ;;  %v1074_v30 = vpop.permute.xlu0 %1073  ;;  %v2883_v39 = vmov 2   ;;  %v1062_v50 = vstv %s3778_s4  ;;  %v1066_v33 = vstv %s3783_s5  ;;  %s3883_s21 = sld [smem:[#allocation10 + $0x2d]] }
 0x112   :  { %2763 = vset.pattern.permute.xlu1 %v2883_v39  ;;  %v987_v61 = vadd.f32 %v986_v2, %v950_v23  ;;  %v991_v8 = vadd.f32 %v990_v56, %v954_v52  ;;  %v3810_v9 = vadd.f32 %v994_v59, %v958_v48  ;;  %v1020_v54 = vmul.f32 %v3746_v58, %v1018_v60  ;;  %v1113_v18 = vpop.permute.xlu1 %1112  ;;  %s3892_s4 = sld [smem:[#allocation10 + $0x1c]] }
 0x113   :  { %1214 = vperm.xlu1 %2763, %v2770_v49   ;;  %v1058_v41 = vrot.slane %v1051_v63, %v3222_v0  ;;  %v1077_v44 = vsel %vm1039_vm13, %v1074_v30, %v1076_v55  ;;  %v1078_v58 = vsel %vm1039_vm13, %v1076_v55, %v1074_v30  ;;  %2764 = vset.pattern.permute.xlu0 %v2881_v35  ;;  %v1030_v37 = vstv %s3791_s7  ;;  %s3897_s5 = sld [smem:[#allocation10 + $0x37]] }
 0x114   :  { %v1023_v21 = vmul.f32 %v1022_v57, %v1020_v54  ;;  %v1027_v22 = vmul.f32 %v1026_v11, %v1020_v54  ;;  %v1081_v13 = vcombine.low %v1077_v44, %v1078_v58  ;;  %2397 = vperm.xlu0 %2764, %v3759_v51   ;;  %v1070_v14 = vstv %s3798_s18  ;;  %s3914_s7 = sld [smem:[#allocation10 + $0x13]] }
 0x115   :  { %v1060_v26 = vmul.f32 %v2625_v31, %v1058_v41  ;;  %v1111_v42 = vpop.permute.xlu0 %1110  ;;  %v1099_v45 = vstv %s3802_s26  ;;  %v1103_v6 = vstv %s3808_s27  ;;  %v1031_v27 = vmul.f32 %v1030_v37, %v1020_v54  ;;  %s3916_s18 = sld [smem:[#allocation10 + $0x2e]] }
 0x116   :  { %v1088_v15 = vrot.slane %v1081_v13, %v3222_v0  ;;  %v1114_v28 = vsel %vm1039_vm13, %v1111_v42, %v1113_v18  ;;  %v1115_v7 = vsel %vm1039_vm13, %v1113_v18, %v1111_v42  ;;  %v1024_v29 = vadd.f32 %v1023_v21, %v987_v61  ;;  %s3921_s26 = sld [smem:[#allocation10 + $0x49]] }
 0x117   :  { %2416 = vperm.xlu1 %2763, %v3759_v51   ;;  %v1063_v53 = vmul.f32 %v1062_v50, %v1060_v26  ;;  %v1067_v10 = vmul.f32 %v1066_v33, %v1060_v26  ;;  %v1118_v4 = vcombine.low %v1114_v28, %v1115_v7  ;;  %v1028_v20 = vadd.f32 %v1027_v22, %v991_v8  ;;  %s3929_s27 = sld [smem:[#allocation10 + $0x2]] }
 0x118   :  { %v1095_v3 = vrot.slane %v1088_v15, %v3222_v0  ;;  %2456 = vperm.xlu0 %2764, %v3788_v19   ;;  %v1136_v25 = vstv %s3828_s22  ;;  %v1107_v62 = vstv %s3819_s2  ;;  %v1071_v43 = vmul.f32 %v1070_v14, %v1060_v26  ;;  %s3955_s22 = sld [smem:[#allocation10 + $0xb]]  ;;  %s2885_s2 = smov [#allocation12]  }
 0x119   :  { %v1125_v51 = vrot.slane %v1118_v4, %v3222_v0  ;;  %v1064_v5 = vadd.f32 %v1063_v53, %v1024_v29  ;;  %v1068_v47 = vadd.f32 %v1067_v10, %v1028_v20  ;;  %v1140_v55 = vstv %s3832_s6  ;;  %s3961_s6 = sld [smem:[#allocation10 + $0x26]] }
 0x11a   :  { %v1097_v12 = vmul.f32 %v2625_v31, %v1095_v3  ;;  %v2884_v52 = vmov 3   ;;  %v1144_v48 = vstv %s3834_s8  ;;  %v1032_v56 = vadd.f32 %v1031_v27, %v3810_v9  ;;  %v3934_v27 = vld [vmem:[%s4470_s1] ss:$8 sm:$0x3]  ;;  %s2515_s8 = sshll.u32 %s2885_s2, 4  ;;  %s2516_s8 = int_to_ptr.vmem [resolvable:$true] %s2515_s8 }
 0x11b   :  { %2765 = vset.pattern.permute.xlu1 %v2872_v1  ;;  %v1132_v34 = vrot.slane %v1125_v51, %v3222_v0  ;;  %v1379_v4 = vstv %s3842_s23  ;;  %v1381_v14 = vstv %s3845_s29  ;;  %v1383_v3 = vstv %s3851_s3  ;;  %s3969_s23 = sld [smem:[#allocation10 + $0x41]]  ;;  %p2840_p11 = scmp.lt.s32.totalorder %s2516_s8, %s2516_s8 }
 0x11c   :  { %2437 = vperm.xlu1 %2765, %v3788_v19   ;;  %v1100_v17 = vmul.f32 %v1099_v45, %v1097_v12  ;;  %v1104_v23 = vmul.f32 %v1103_v6, %v1097_v12  ;;  %2768 = vset.pattern.permute.xlu0 %v2884_v52  ;;  %v1108_v59 = vmul.f32 %v1107_v62, %v1097_v12  ;;  %v1422_v51 = vstv %s3855_s30  ;;  %s3972_s29 = sld [smem:[#allocation10 + $0x14]] }
 0x11d   :  { %v1134_v1 = vmul.f32 %v2625_v31, %v1132_v34  ;;  %1292 = vperm.xlu0 %2768, %v3788_v19   ;;  %v1072_v63 = vadd.f32 %v1071_v43, %v1032_v56  ;;  %v1426_v12 = vstv %s3858_s10  ;;  %v1522_v56 = vstv %s3883_s21  ;;  %s3977_s3 = sld [smem:[#allocation10 + $0x2f]] }
 0x11e   :  { %v1101_v38 = vadd.f32 %v1100_v17, %v1064_v5  ;;  %v1105_v2 = vadd.f32 %v1104_v23, %v1068_v47  ;;  %v1430_v47 = vstv %s3863_s11  ;;  %v1474_v23 = vstv %s3871_s13  ;;  %s3981_s30 = sld [smem:[#allocation10 + $0x4a]] }
 0x11f   :  { %v1177_v60 = vpop.permute.xlu1 %1176  ;;  %v1137_v57 = vmul.f32 %v1136_v25, %v1134_v1  ;;  %v1141_v11 = vmul.f32 %v1140_v55, %v1134_v1  ;;  %v1145_v30 = vmul.f32 %v1144_v48, %v1134_v1  ;;  %v1470_v55 = vstv %s3868_s12  ;;  %s3988_s10 = sld [smem:[#allocation10 + $0x3]] }
 0x120   :  { %2766 = vset.pattern.permute.xlu1 %v2881_v35  ;;  %v1109_v35 = vadd.f32 %v1108_v59, %v1072_v63  ;;  %v1560_v63 = vstv %s3892_s4  ;;  %s3990_s11 = sld [smem:[#allocation10 + $0x1e]] }
 0x121   :  { %1254 = vperm.xlu1 %2766, %v3788_v19   ;;  %v1138_v61 = vadd.f32 %v1137_v57, %v1101_v38  ;;  %v1142_v8 = vadd.f32 %v1141_v11, %v1105_v2  ;;  %v1478_v38 = vstv %s3874_s16  ;;  %v1518_v2 = vstv %s3880_s17  ;;  %s3996_s12 = sld [smem:[#allocation10 + $0x39]] }
 0x122   :  { %v1160_v9 = vpop.permute.xlu0 %1159  ;;  %v3894_v50 = vadd.f32 %v1145_v30, %v1109_v35  ;;  %v1556_v11 = vstv %s3889_s9  ;;  %s3999_s13 = sld [smem:[#allocation10 + $0xc]] }
 0x123   :  { %vm1147_vm14 = vcmp.gt.f32.partialorder %v1138_v61, 0.0  ;;  %v1148_v54 = vmul.f32 0.2, %v1138_v61  ;;  %vm1150_vm15 = vcmp.gt.f32.partialorder %v1142_v8, 0.0  ;;  %v1151_v31 = vmul.f32 0.2, %v1142_v8 }
 0x124   :  { %v1196_v49 = vpop.permute.xlu1 %1195  ;;  %s4017_s16 = sld [smem:[#allocation10 + $0x42]]  ;;  %vm1153_vm0 = vcmp.gt.f32.partialorder %v3894_v50, 0.0 }
 0x125   :  { %2767 = vset.pattern.permute.xlu1 %v2883_v39  ;;  %v1149_v41 = vsel %vm1147_vm14, %v1138_v61, %v1148_v54  ;;  %v1152_v44 = vsel %vm1150_vm15, %v1142_v8, %v1151_v31  ;;  %v1564_v61 = vstv %s3897_s5  ;;  %v1593_v8 = vstv %s3903_s14  ;;  %s4032_s17 = sld [smem:[#allocation10 + $0x15]] }
 0x126   :  { %1273 = vperm.xlu1 %2767, %v3788_v19   ;;  %v1167_v58 = vrot.slane %v1149_v41, %v2989_v16  ;;  %v1171_v18 = vrot.slane %v1149_v41, %v3001_v24  ;;  %v1397_v21 = vpop.permute.xlu0 %1396  ;;  %v1187_v22 = vrot.slane %v1152_v44, %v2989_v16  ;;  %v1191_v39 = vrot.slane %v1152_v44, %v3001_v24  ;;  %s4036_s21 = sld [smem:[#allocation10 + $0x1f]] }
 0x127   :  { %v1597_v44 = vstv %s3905_s15  ;;  %s4052_s9 = sld [smem:[#allocation10 + $0x4b]] }
 0x128   :  { %v1179_v33 = vmul.f32 %v1177_v60, %v1167_v58  ;;  %v1180_v13 = vmul.f32 %v1177_v60, %v1171_v18  ;;  %v1198_v26 = vmul.f32 %v1196_v49, %v1187_v22  ;;  %v1199_v42 = vmul.f32 %v1196_v49, %v1191_v39  ;;  %v1399_v15 = vpop.permute.xlu1 %1398  ;;  %s4055_s4 = sld [smem:[#allocation10 + $0x3a]] }
 0x129   :  { %v1400_v28 = vsel %vm183_vm6, %v1397_v21, %v1399_v15  ;;  %v1401_v7 = vsel %vm183_vm6, %v1399_v15, %v1397_v21  ;;  %v1601_v58 = vstv %s3907_s20  ;;  %v1630_v18 = vstv %s3914_s7  ;;  %s4072_s5 = sld [smem:[#allocation10 + $0xd]] }
 0x12a   :  { %2475 = vperm.xlu1 %2767, %v3788_v19   ;;  %v1181_v29 = vadd.f32 %v1179_v33, %v1160_v9  ;;  %v1182_v37 = vadd.f32 %v1180_v13, %v1160_v9  ;;  %v1445_v53 = vpop.permute.xlu0 %1444  ;;  %v1404_v10 = vcombine.low %v1401_v7, %v1400_v28  ;;  %v1634_v13 = vstv %s3916_s18  ;;  %s4075_s14 = sld [smem:[#allocation10 + $0x28]] }
 0x12b   :  { %s4122_s7 = sld [smem:[#allocation10 + $0x31]] }
 0x12c   :  { %v3923_v45 = vadd.f32 %v1198_v26, %v1181_v29  ;;  %v3925_v20 = vadd.f32 %v1199_v42, %v1182_v37  ;;  %v1411_v5 = vrot.slane %v1404_v10, %v3222_v0  ;;  %v1447_v6 = vpop.permute.xlu1 %1446  ;;  %s4126_s18 = sld [smem:[#allocation10 + $0x4c]] }
 0x12d   :  { %v1448_v34 = vsel %vm183_vm6, %v1445_v53, %v1447_v6  ;;  %v1449_v25 = vsel %vm183_vm6, %v1447_v6, %v1445_v53  ;;  %s4297_s15 = sld [smem:[#allocation10 + $0x7]] }
 0x12e   :  { %2769 = vset.pattern.permute.xlu1 %v2884_v52  ;;  %v1418_v43 = vrot.slane %v1411_v5, %v3222_v0  ;;  %v1493_v17 = vpop.permute.xlu0 %1492  ;;  %v1452_v1 = vcombine.low %v1449_v25, %v1448_v34  ;;  %v1526_v52 = vstv %s3887_s28  ;;  %s4045_s28 = sld [smem:[#allocation10 + $0x30]] }
 0x12f   :  { %2494 = vperm.xlu1 %2769, %v3788_v19   ;;  %s4302_s20 = sld [smem:[#allocation10 + $0x22]] }
 0x130   :  { %v1420_v59 = vmul.f32 %v1418_v43, %v3934_v27  ;;  %v1459_v60 = vrot.slane %v1452_v1, %v3222_v0  ;;  %v1495_v57 = vpop.permute.xlu1 %1494  ;;  %v4005_v43 = vld [vmem:[%s4470_s1 + $0x1] ss:$8 sm:$0x3] }
 0x131   :  { %v1496_v19 = vsel %vm183_vm6, %v1493_v17, %v1495_v57  ;;  %v1497_v30 = vsel %vm183_vm6, %v1495_v57, %v1493_v17 }
 0x132   :  { %v1423_v9 = vmul.f32 %v1422_v51, %v1420_v59  ;;  %v1427_v35 = vmul.f32 %v1426_v12, %v1420_v59  ;;  %v1431_v54 = vmul.f32 %v1430_v47, %v1420_v59  ;;  %v1466_v31 = vrot.slane %v1459_v60, %v3222_v0  ;;  %v1531_v49 = vpop.permute.xlu0 %1530 }
 0x133   :  { %v1500_v41 = vcombine.low %v1497_v30, %v1496_v19  ;;  %v1672_v51 = vstv %s3943_s24  ;;  %v1705_v59 = vstv %s3955_s22  ;;  %v1709_v60 = vstv %s3961_s6  ;;  %s4151_s24 = sld [smem:[#allocation10 + $0x3b]] }
 0x134   :  { %v1424_v21 = vadd.f32 %v1423_v9, %v1379_v4  ;;  %v1428_v22 = vadd.f32 %v1427_v35, %v1381_v14  ;;  %v1468_v39 = vmul.f32 %v1466_v31, %v3934_v27  ;;  %v1533_v33 = vpop.permute.xlu1 %1532  ;;  %v1432_v26 = vadd.f32 %v1431_v54, %v1383_v3  ;;  %s4168_s22 = sld [smem:[#allocation10 + $0x29]] }
 0x135   :  { %v1507_v42 = vrot.slane %v1500_v41, %v3222_v0  ;;  %v1534_v15 = vsel %vm319_vm7, %v1531_v49, %v1533_v33  ;;  %v1535_v28 = vsel %vm319_vm7, %v1533_v33, %v1531_v49  ;;  %v1638_v14 = vstv %s3921_s26  ;;  %s4133_s26 = sld [smem:[#allocation10 + $0x5]] }
 0x136   :  { %v1471_v7 = vmul.f32 %v1470_v55, %v1468_v39  ;;  %v1475_v29 = vmul.f32 %v1474_v23, %v1468_v39  ;;  %v1479_v37 = vmul.f32 %v1478_v38, %v1468_v39  ;;  %v1568_v53 = vpop.permute.xlu0 %1567  ;;  %v1538_v10 = vcombine.low %v1535_v28, %v1534_v15  ;;  %s4178_s6 = sld [smem:[#allocation10 + $0x44]] }
 0x137   :  { %v1514_v4 = vrot.slane %v1507_v42, %v3222_v0  ;;  %v1668_v3 = vstv %s3929_s27  ;;  %v1676_v23 = vstv %s3949_s25  ;;  %v1713_v9 = vstv %s3969_s23  ;;  %s4142_s27 = sld [smem:[#allocation10 + $0x20]] }
 0x138   :  { %v1472_v5 = vadd.f32 %v1471_v7, %v1424_v21  ;;  %v1476_v6 = vadd.f32 %v1475_v29, %v1428_v22  ;;  %v1480_v12 = vadd.f32 %v1479_v37, %v1432_v26  ;;  %v1545_v47 = vrot.slane %v1538_v10, %v3222_v0  ;;  %v1570_v34 = vpop.permute.xlu1 %1569  ;;  %s4154_s25 = sld [smem:[#allocation10 + $0xe]] }
 0x139   :  { %v1516_v25 = vmul.f32 %v1514_v4, %v3934_v27  ;;  %v1571_v17 = vsel %vm319_vm7, %v1568_v53, %v1570_v34  ;;  %v1572_v55 = vsel %vm319_vm7, %v1570_v34, %v1568_v53  ;;  %v1742_v49 = vstv %s3972_s29  ;;  %s4200_s29 = sld [smem:[#allocation10 + $0x32]] }
 0x13a   :  { %v1552_v1 = vrot.slane %v1545_v47, %v3222_v0  ;;  %v1605_v38 = vpop.permute.xlu0 %1604  ;;  %v1575_v27 = vcombine.low %v1572_v55, %v1571_v17  ;;  %v1746_v41 = vstv %s3977_s3  ;;  %v1750_v28 = vstv %s3981_s30  ;;  %s4203_s3 = sld [smem:[#allocation10 + $0x4d]] }
 0x13b   :  { %v1519_v57 = vmul.f32 %v1518_v2, %v1516_v25  ;;  %v1523_v19 = vmul.f32 %v1522_v56, %v1516_v25  ;;  %v1527_v30 = vmul.f32 %v1526_v52, %v1516_v25  ;;  %v1780_v7 = vstv %s3988_s10  ;;  %s4209_s30 = sld [smem:[#allocation10 + $0x6]] }
 0x13c   :  { %v1554_v35 = vmul.f32 %v4005_v43, %v1552_v1  ;;  %v1582_v54 = vrot.slane %v1575_v27, %v3222_v0  ;;  %v1607_v31 = vpop.permute.xlu1 %1606  ;;  %v1784_v29 = vstv %s3990_s11  ;;  %v1817_v1 = vstv %s3999_s13  ;;  %s4231_s10 = sld [smem:[#allocation10 + $0x3c]] }
 0x13d   :  { %v1520_v2 = vadd.f32 %v1519_v57, %v1472_v5  ;;  %v1524_v56 = vadd.f32 %v1523_v19, %v1476_v6  ;;  %v1528_v21 = vadd.f32 %v1527_v30, %v1480_v12  ;;  %v1608_v52 = vsel %vm319_vm7, %v1605_v38, %v1607_v31  ;;  %s4234_s11 = sld [smem:[#allocation10 + $0xf]] }
 0x13e   :  { %v1557_v22 = vmul.f32 %v1556_v11, %v1554_v35  ;;  %v1561_v39 = vmul.f32 %v1560_v63, %v1554_v35  ;;  %v1565_v33 = vmul.f32 %v1564_v61, %v1554_v35  ;;  %v1589_v26 = vrot.slane %v1582_v54, %v3222_v0  ;;  %v1643_v42 = vpop.permute.xlu0 %1642  ;;  %v4081_v35 = vld [vmem:[%s4470_s1 + $0x2] ss:$8 sm:$0x3]  ;;  %s4373_s23 = sld [smem:[#allocation10 + $0x4f]] }
 0x13f   :  { %v1609_v15 = vsel %vm319_vm7, %v1607_v31, %v1605_v38  ;;  %v1788_v6 = vstv %s3996_s12  ;;  %v1821_v38 = vstv %s4012_s0  ;;  %v1866_v27 = vstv %s4026_s19  ;;  %s4091_s19 = sld [smem:[#allocation10 + $0x43]] }
 0x140   :  { %v1558_v11 = vadd.f32 %v1557_v22, %v1520_v2  ;;  %v1562_v63 = vadd.f32 %v1561_v39, %v1524_v56  ;;  %v1566_v61 = vadd.f32 %v1565_v33, %v1528_v21  ;;  %v1591_v37 = vmul.f32 %v4005_v43, %v1589_v26  ;;  %v1645_v53 = vpop.permute.xlu1 %1644  ;;  %s4241_s12 = sld [smem:[#allocation10 + $0x2a]] }
 0x141   :  { %v1612_v10 = vcombine.low %v1609_v15, %v1608_v52  ;;  %v1646_v4 = vsel %vm433_vm8, %v1643_v42, %v1645_v53  ;;  %v1647_v5 = vsel %vm433_vm8, %v1645_v53, %v1643_v42  ;;  %v1870_v2 = vstv %s4036_s21  ;;  %s4099_s21 = sld [smem:[#allocation10 + $0x16]] }
 0x142   :  { %v1594_v12 = vmul.f32 %v1593_v8, %v1591_v37  ;;  %v1598_v47 = vmul.f32 %v1597_v44, %v1591_v37  ;;  %v1602_v34 = vmul.f32 %v1601_v58, %v1591_v37  ;;  %v1680_v25 = vpop.permute.xlu0 %1679  ;;  %v1650_v17 = vcombine.low %v1647_v5, %v1646_v4 }
 0x143   :  { %v1619_v55 = vrot.slane %v1612_v10, %v3222_v0  ;;  %v1825_v22 = vstv %s4017_s16  ;;  %v1854_v39 = vstv %s4032_s17  ;;  %v1858_v26 = vstv %s4045_s28  ;;  %s4272_s16 = sld [smem:[#allocation10 + $0x45]] }
 0x144   :  { %v1595_v57 = vadd.f32 %v1594_v12, %v1558_v11  ;;  %v1599_v19 = vadd.f32 %v1598_v47, %v1562_v63  ;;  %v1603_v30 = vadd.f32 %v1602_v34, %v1566_v61  ;;  %v1657_v8 = vrot.slane %v1650_v17, %v3222_v0  ;;  %v1682_v44 = vpop.permute.xlu1 %1681  ;;  %s4276_s17 = sld [smem:[#allocation10 + $0x18]] }
 0x145   :  { %v1626_v58 = vrot.slane %v1619_v55, %v3222_v0  ;;  %v1683_v54 = vsel %vm433_vm8, %v1680_v25, %v1682_v44  ;;  %v1684_v31 = vsel %vm433_vm8, %v1682_v44, %v1680_v25  ;;  %v1862_v42 = vstv %s4052_s9  ;;  %s4281_s28 = sld [smem:[#allocation10 + $0x33]] }
 0x146   :  { %v1664_v56 = vrot.slane %v1657_v8, %v3222_v0  ;;  %v1717_v21 = vpop.permute.xlu0 %1716  ;;  %v1687_v52 = vcombine.low %v1684_v31, %v1683_v54  ;;  %v4097_v15 = vmul.f32 %v1866_v27, %v3133_v32  ;;  %v4104_v37 = vmul.f32 %v1870_v2, %v3133_v32  ;;  %s4290_s9 = sld [smem:[#allocation10 + $0x4e]] }
 0x147   :  { %v1628_v33 = vmul.f32 %v4005_v43, %v1626_v58  ;;  %v1874_v53 = vstv %s4055_s4  ;;  %v1878_v27 = vstv %s4072_s5  ;;  %v1882_v8 = vstv %s4075_s14  ;;  %s4190_s5 = sld [smem:[#allocation10 + $0x17]] }
 0x148   :  { %v1666_v11 = vmul.f32 %v4081_v35, %v1664_v56  ;;  %v1694_v63 = vrot.slane %v1687_v52, %v3222_v0  ;;  %v1719_v61 = vpop.permute.xlu1 %1718  ;;  %v4147_v52 = vmul.f32 %v1874_v53, %v3133_v32  ;;  %s4214_s14 = sld [smem:[#allocation10 + $0x21]] }
 0x149   :  { %v1631_v10 = vmul.f32 %v1630_v18, %v1628_v33  ;;  %v1635_v43 = vmul.f32 %v1634_v13, %v1628_v33  ;;  %v1639_v4 = vmul.f32 %v1638_v14, %v1628_v33  ;;  %v1720_v5 = vsel %vm433_vm8, %v1717_v21, %v1719_v61  ;;  %s4376_s4 = sld [smem:[#allocation10 + $0x8]] }
 0x14a   :  { %v1669_v12 = vmul.f32 %v1668_v3, %v1666_v11  ;;  %v1673_v47 = vmul.f32 %v1672_v51, %v1666_v11  ;;  %v1677_v34 = vmul.f32 %v1676_v23, %v1666_v11  ;;  %v1701_v25 = vrot.slane %v1694_v63, %v3222_v0  ;;  %v1755_v17 = vpop.permute.xlu0 %1754 }
 0x14b   :  { %v1632_v18 = vadd.f32 %v1631_v10, %v1595_v57  ;;  %v1636_v13 = vadd.f32 %v1635_v43, %v1599_v19  ;;  %v1640_v14 = vadd.f32 %v1639_v4, %v1603_v30  ;;  %v1721_v55 = vsel %vm433_vm8, %v1719_v61, %v1717_v21 }
 0x14c   :  { %v1703_v3 = vmul.f32 %v4081_v35, %v1701_v25  ;;  %v1724_v51 = vcombine.low %v1721_v55, %v1720_v5  ;;  %v1757_v23 = vpop.permute.xlu1 %1756  ;;  %v1886_v33 = vstv %s4091_s19  ;;  %v1890_v11 = vstv %s4099_s21 }
 0x14d   :  { %v1670_v44 = vadd.f32 %v1669_v12, %v1632_v18  ;;  %v1674_v58 = vadd.f32 %v1673_v47, %v1636_v13  ;;  %v1678_v57 = vadd.f32 %v1677_v34, %v1640_v14  ;;  %v1758_v19 = vsel %vm547_vm9, %v1755_v17, %v1757_v23 }
 0x14e   :  { %v1706_v30 = vmul.f32 %v1705_v59, %v1703_v3  ;;  %v1710_v54 = vmul.f32 %v1709_v60, %v1703_v3  ;;  %v1714_v31 = vmul.f32 %v1713_v9, %v1703_v3  ;;  %v1731_v2 = vrot.slane %v1724_v51, %v3222_v0  ;;  %v1792_v56 = vpop.permute.xlu0 %1791  ;;  %v2678_v3 = vld [vmem:[%s4470_s1 + $0x3] ss:$8 sm:$0x3] }
 0x14f   :  { %v1759_v21 = vsel %vm547_vm9, %v1757_v23, %v1755_v17  ;;  %v4161_v43 = vmul.f32 %v1878_v27, %v3143_v36  ;;  %v4165_v47 = vmul.f32 %v1882_v8, %v3143_v36  ;;  %v1894_v34 = vstv %s4122_s7  ;;  %s4324_s7 = sld [smem:[#allocation10 + $0x3d]] }
 0x150   :  { %v1707_v59 = vadd.f32 %v1706_v30, %v1670_v44  ;;  %v1711_v60 = vadd.f32 %v1710_v54, %v1674_v58  ;;  %v1715_v63 = vadd.f32 %v1714_v31, %v1678_v57  ;;  %v1738_v9 = vrot.slane %v1731_v2, %v3222_v0  ;;  %v1794_v61 = vpop.permute.xlu1 %1793 }
 0x151   :  { %v1762_v10 = vcombine.low %v1759_v21, %v1758_v19  ;;  %v1795_v32 = vsel %vm547_vm9, %v1792_v56, %v1794_v61  ;;  %v1796_v53 = vsel %vm547_vm9, %v1794_v61, %v1792_v56  ;;  %v4172_v17 = vmul.f32 %v1886_v33, %v3143_v36 }
 0x152   :  { %v1740_v4 = vmul.f32 %v4081_v35, %v1738_v9  ;;  %v1829_v5 = vpop.permute.xlu0 %1828  ;;  %v1799_v12 = vcombine.low %v1796_v53, %v1795_v32  ;;  %v4175_v18 = vmul.f32 %v1890_v11, %v3166_v40  ;;  %v1898_v13 = vstv %s4126_s18  ;;  %s4333_s18 = sld [smem:[#allocation10 + $0x10]] }
 0x153   :  { %v1769_v25 = vrot.slane %v1762_v10, %v3222_v0  ;;  %v4206_v54 = vmul.f32 %v1898_v13, %v3166_v40  ;;  %v1928_v31 = vstv %s4133_s26  ;;  %v1932_v56 = vstv %s4142_s27  ;;  %s4346_s26 = sld [smem:[#allocation10 + $0x2b]] }
 0x154   :  { %v1743_v35 = vmul.f32 %v1742_v49, %v1740_v4  ;;  %v1747_v14 = vmul.f32 %v1746_v41, %v1740_v4  ;;  %v1751_v55 = vmul.f32 %v1750_v28, %v1740_v4  ;;  %v1806_v51 = vrot.slane %v1799_v12, %v3222_v0  ;;  %v1831_v36 = vpop.permute.xlu1 %1830  ;;  %s4353_s27 = sld [smem:[#allocation10 + $0x46]] }
 0x155   :  { %v1776_v23 = vrot.slane %v1769_v25, %v3222_v0  ;;  %v1832_v27 = vsel %vm547_vm9, %v1829_v5, %v1831_v36  ;;  %v1833_v49 = vsel %vm547_vm9, %v1831_v36, %v1829_v5  ;;  %v4198_v41 = vmul.f32 %v1894_v34, %v3166_v40 }
 0x156   :  { %v1744_v28 = vadd.f32 %v1743_v35, %v1707_v59  ;;  %v1748_v8 = vadd.f32 %v1747_v14, %v1711_v60  ;;  %v1752_v44 = vadd.f32 %v1751_v55, %v1715_v63  ;;  %v1813_v58 = vrot.slane %v1806_v51, %v3222_v0  ;;  %v1903_v57 = vpop.permute.xlu0 %1902 }
 0x157   :  { %v1778_v19 = vmul.f32 %v2678_v3, %v1776_v23  ;;  %v1836_v30 = vcombine.low %v1833_v49, %v1832_v27  ;;  %v1936_v21 = vstv %s4151_s24  ;;  %v1965_v11 = vstv %s4154_s25 }
 0x158   :  { %v1815_v2 = vmul.f32 %v2678_v3, %v1813_v58  ;;  %v1905_v33 = vpop.permute.xlu1 %1904  ;;  %v2002_v12 = vstv %s4190_s5  ;;  %v2006_v23 = vstv %s4200_s29  ;;  %s4380_s5 = sld [smem:[#allocation10 + $0x23]] }
 0x159   :  { %v1781_v59 = vmul.f32 %v1780_v7, %v1778_v19  ;;  %v1785_v60 = vmul.f32 %v1784_v29, %v1778_v19  ;;  %v1789_v63 = vmul.f32 %v1788_v6, %v1778_v19  ;;  %v1843_v40 = vrot.slane %v1836_v30, %v3222_v0  ;;  %s4387_s29 = sld [smem:[#allocation10 + $0x3e]] }
 0x15a   :  { %v1818_v9 = vmul.f32 %v1817_v1, %v1815_v2  ;;  %v1822_v61 = vmul.f32 %v1821_v38, %v1815_v2  ;;  %v1826_v10 = vmul.f32 %v1825_v22, %v1815_v2  ;;  %v1940_v32 = vpop.permute.xlu0 %1939  ;;  %v1906_v53 = vsel %vm697_vm10, %v1903_v57, %v1905_v33 }
 0x15b   :  { %v1782_v7 = vadd.f32 %v1781_v59, %v1744_v28  ;;  %v1786_v29 = vadd.f32 %v1785_v60, %v1748_v8  ;;  %v1790_v4 = vadd.f32 %v1789_v63, %v1752_v44  ;;  %v1850_v6 = vrot.slane %v1843_v40, %v3222_v0 }
 0x15c   :  { %v1907_v1 = vsel %vm697_vm10, %v1905_v33, %v1903_v57  ;;  %v1969_v38 = vstv %s4168_s22  ;;  %v1973_v22 = vstv %s4178_s6  ;;  %v1942_v5 = vpop.permute.xlu1 %1941  ;;  %v2040_v57 = vstv %s4209_s30  ;;  %s4367_s22 = sld [smem:[#allocation10 + $0x19]] }
 0x15d   :  { %v1819_v34 = vadd.f32 %v1818_v9, %v1782_v7  ;;  %v1823_v25 = vadd.f32 %v1822_v61, %v1786_v29  ;;  %v1827_v13 = vadd.f32 %v1826_v10, %v1790_v4  ;;  %v1852_v35 = vmul.f32 %v2678_v3, %v1850_v6  ;;  %s4369_s6 = sld [smem:[#allocation10 + $0x34]] }
 0x15e   :  { %v1910_v14 = vcombine.low %v1906_v53, %v1907_v1  ;;  %v1977_v55 = vpop.permute.xlu0 %1976  ;;  %v1943_v51 = vsel %vm697_vm10, %v1940_v32, %v1942_v5  ;;  %v1944_v36 = vsel %vm697_vm10, %v1942_v5, %v1940_v32  ;;  %v2010_v3 = vstv %s4203_s3  ;;  %s4396_s3 = sld [smem:[#allocation10 + $0x11]] }
 0x15f   :  { %v1855_v27 = vmul.f32 %v1854_v39, %v1852_v35  ;;  %v1859_v49 = vmul.f32 %v1858_v26, %v1852_v35  ;;  %v1863_v28 = vmul.f32 %v1862_v42, %v1852_v35  ;;  %v1947_v8 = vcombine.low %v1943_v51, %v1944_v36  ;;  %v2697_v39 = vld [vmem:[%s4470_s1 + $0x5] ss:$8 sm:$0x3]  ;;  %s4402_s30 = sld [smem:[#allocation10 + $0x2c]] }
 0x160   :  { %v1917_v44 = vrot.slane %v1910_v14, %v3222_v0  ;;  %v1979_v58 = vpop.permute.xlu1 %1978  ;;  %v2044_v19 = vstv %s4214_s14  ;;  %v2048_v40 = vstv %s4231_s10  ;;  %v2077_v4 = vstv %s4234_s11  ;;  %s4414_s11 = sld [smem:[#allocation10 + $0x1a]] }
 0x161   :  { %v1856_v30 = vadd.f32 %v1855_v27, %v1819_v34  ;;  %v1860_v2 = vadd.f32 %v1859_v49, %v1823_v25  ;;  %v1864_v33 = vadd.f32 %v1863_v28, %v1827_v13  ;;  %v1954_v26 = vrot.slane %v1947_v8, %v3222_v0 }
 0x162   :  { %v1924_v42 = vrot.slane %v1917_v44, %v3222_v0  ;;  %v2015_v59 = vpop.permute.xlu0 %2014  ;;  %v1980_v60 = vsel %vm697_vm10, %v1977_v55, %v1979_v58  ;;  %v1981_v63 = vsel %vm697_vm10, %v1979_v58, %v1977_v55  ;;  %v2081_v6 = vstv %s4241_s12  ;;  %s2835_s12 = scalar_lea.vmem %s2516_s8, 512 }
 0x163   :  { %v1868_v9 = vadd.f32 %v4097_v15, %v1856_v30  ;;  %v1872_v61 = vadd.f32 %v4104_v37, %v1860_v2  ;;  %v1876_v10 = vadd.f32 %v4147_v52, %v1864_v33  ;;  %v1961_v32 = vrot.slane %v1954_v26, %v3222_v0  ;;  %p2836_p10 = scmp.ne.s32.totalorder %s2516_s8, %s2835_s12  ;;  %p2841_p12 = scmp.lt.s32.totalorder %s2835_s12, %s2835_s12 }
 0x164   :  { %v1926_v53 = vmul.f32 %v2697_v39, %v1924_v42  ;;  %v1984_v7 = vcombine.low %v1980_v60, %v1981_v63  ;;  %v2017_v29 = vpop.permute.xlu1 %2016  ;;  %v2707_v42 = vld [vmem:[%s4470_s1 + $0x6] ss:$8 sm:$0x3] }
 0x165   :  { %v1880_v15 = vadd.f32 %v4161_v43, %v1868_v9  ;;  %v1884_v37 = vadd.f32 %v4165_v47, %v1872_v61  ;;  %v1888_v1 = vadd.f32 %v4172_v17, %v1876_v10  ;;  %v1963_v52 = vmul.f32 %v2697_v39, %v1961_v32  ;;  %p2842_p13 = por %p2841_p12, %p2840_p11 }
 0x166   :  { %v1929_v5 = vmul.f32 %v1928_v31, %v1926_v53  ;;  %v1933_v34 = vmul.f32 %v1932_v56, %v1926_v53  ;;  %v1937_v25 = vmul.f32 %v1936_v21, %v1926_v53  ;;  %v1991_v13 = vrot.slane %v1984_v7, %v3222_v0  ;;  %v2052_v35 = vpop.permute.xlu0 %2051 }
 0x167   :  { %v1892_v43 = vadd.f32 %v4175_v18, %v1880_v15  ;;  %v1896_v47 = vadd.f32 %v4198_v41, %v1884_v37  ;;  %v1900_v17 = vadd.f32 %v4206_v54, %v1888_v1  ;;  %v1966_v14 = vmul.f32 %v1965_v11, %v1963_v52  ;;  %p2843_p0 = pnand %p2842_p13, %p2836_p10 }
 0x168   :  { %v1970_v31 = vmul.f32 %v1969_v38, %v1963_v52  ;;  %v1974_v55 = vmul.f32 %v1973_v22, %v1963_v52  ;;  %v1998_v56 = vrot.slane %v1991_v13, %v3222_v0  ;;  %v2018_v21 = vsel %vm811_vm11, %v2015_v59, %v2017_v29  ;;  %v2054_v51 = vpop.permute.xlu1 %2053 }
 0x169   :  { %v1930_v18 = vadd.f32 %v1929_v5, %v1892_v43  ;;  %v1934_v41 = vadd.f32 %v1933_v34, %v1896_v47  ;;  %v1938_v36 = vadd.f32 %v1937_v25, %v1900_v17  ;;  %v2019_v54 = vsel %vm811_vm11, %v2017_v29, %v2015_v59 }
 0x16a   :  { %v2000_v11 = vmul.f32 %v2697_v39, %v1998_v56  ;;  %v2022_v38 = vcombine.low %v2018_v21, %v2019_v54  ;;  %v2089_v22 = vpop.permute.xlu0 %2088  ;;  %v2055_v27 = vsel %vm811_vm11, %v2052_v35, %v2054_v51  ;;  %v2056_v49 = vsel %vm811_vm11, %v2054_v51, %v2052_v35  ;;  %v4359_v54 = vld [vmem:[%s4470_s1 + $0x7] ss:$8 sm:$0x3] }
 0x16b   :  { %v1967_v28 = vadd.f32 %v1966_v14, %v1930_v18  ;;  %v1971_v8 = vadd.f32 %v1970_v31, %v1934_v41  ;;  %v1975_v44 = vadd.f32 %v1974_v55, %v1938_v36  ;;  %v2059_v58 = vcombine.low %v2055_v27, %v2056_v49 }
 0x16c   :  { %v2003_v30 = vmul.f32 %v2002_v12, %v2000_v11  ;;  %v2007_v2 = vmul.f32 %v2006_v23, %v2000_v11  ;;  %v2011_v33 = vmul.f32 %v2010_v3, %v2000_v11  ;;  %v2029_v39 = vrot.slane %v2022_v38, %v3222_v0  ;;  %v2091_v26 = vpop.permute.xlu1 %2090 }
 0x16d   :  { %v2085_v59 = vstv %s4272_s16  ;;  %v2066_v60 = vrot.slane %v2059_v58, %v3222_v0  ;;  %v2092_v12 = vsel %vm811_vm11, %v2089_v22, %v2091_v26  ;;  %v2093_v23 = vsel %vm811_vm11, %v2091_v26, %v2089_v22 }
 0x16e   :  { %v2004_v3 = vadd.f32 %v2003_v30, %v1967_v28  ;;  %v2008_v63 = vadd.f32 %v2007_v2, %v1971_v8  ;;  %v2012_v9 = vadd.f32 %v2011_v33, %v1975_v44  ;;  %v2036_v61 = vrot.slane %v2029_v39, %v3222_v0  ;;  %v2127_v10 = vpop.permute.xlu0 %2126 }
 0x16f   :  { %v2073_v32 = vrot.slane %v2066_v60, %v3222_v0  ;;  %v2114_v53 = vstv %s4276_s17  ;;  %v2118_v7 = vstv %s4281_s28  ;;  %v2096_v29 = vcombine.low %v2092_v12, %v2093_v23 }
 0x170   :  { %v2038_v15 = vmul.f32 %v2707_v42, %v2036_v61  ;;  %v2122_v37 = vstv %s4290_s9  ;;  %v2152_v1 = vstv %s4297_s15  ;;  %v2156_v52 = vstv %s4302_s20  ;;  %v2129_v5 = vpop.permute.xlu1 %2128 }
 0x171   :  { %v2075_v34 = vmul.f32 %v2707_v42, %v2073_v32  ;;  %v2103_v25 = vrot.slane %v2096_v29, %v3222_v0  ;;  %v2130_v13 = vsel %vm925_vm12, %v2127_v10, %v2129_v5  ;;  %v2131_v35 = vsel %vm925_vm12, %v2129_v5, %v2127_v10 }
 0x172   :  { %v2041_v43 = vmul.f32 %v2040_v57, %v2038_v15  ;;  %v2045_v47 = vmul.f32 %v2044_v19, %v2038_v15  ;;  %v2049_v17 = vmul.f32 %v2048_v40, %v2038_v15  ;;  %v2164_v14 = vpop.permute.xlu0 %2163  ;;  %v2134_v31 = vcombine.low %v2130_v13, %v2131_v35 }
 0x173   :  { %v2078_v55 = vmul.f32 %v2077_v4, %v2075_v34  ;;  %v2082_v56 = vmul.f32 %v2081_v6, %v2075_v34  ;;  %v2086_v21 = vmul.f32 %v2085_v59, %v2075_v34  ;;  %v2110_v51 = vrot.slane %v2103_v25, %v3222_v0 }
 0x174   :  { %v2042_v18 = vadd.f32 %v2041_v43, %v2004_v3  ;;  %v2046_v57 = vadd.f32 %v2045_v47, %v2008_v63  ;;  %v2050_v41 = vadd.f32 %v2049_v17, %v2012_v9  ;;  %v2141_v19 = vrot.slane %v2134_v31, %v3222_v0  ;;  %v2166_v40 = vpop.permute.xlu1 %2165 }
 0x175   :  { %v2112_v36 = vmul.f32 %v2707_v42, %v2110_v51  ;;  %v2160_v4 = vstv %s4324_s7  ;;  %v2167_v6 = vsel %vm925_vm12, %v2164_v14, %v2166_v40  ;;  %v2168_v11 = vsel %vm925_vm12, %v2166_v40, %v2164_v14 }
 0x176   :  { %v2079_v38 = vadd.f32 %v2078_v55, %v2042_v18  ;;  %v2083_v22 = vadd.f32 %v2082_v56, %v2046_v57  ;;  %v2087_v27 = vadd.f32 %v2086_v21, %v2050_v41  ;;  %v2148_v49 = vrot.slane %v2141_v19, %v3222_v0  ;;  %v2201_v28 = vpop.permute.xlu0 %2200  ;;  %v2727_v19 = vld [vmem:[%s4470_s1 + $0x10] ss:$8 sm:$0x3]  ;;  %s4419_s1 = sld [smem:[#allocation10 + $0x35]] }
 0x177   :  { %v2115_v8 = vmul.f32 %v2114_v53, %v2112_v36  ;;  %v2119_v44 = vmul.f32 %v2118_v7, %v2112_v36  ;;  %v2123_v58 = vmul.f32 %v2122_v37, %v2112_v36  ;;  %v2171_v30 = vcombine.low %v2167_v6, %v2168_v11 }
 0x178   :  { %v2150_v2 = vmul.f32 %v4359_v54, %v2148_v49  ;;  %v2189_v33 = vstv %s4333_s18  ;;  %v2203_v39 = vpop.permute.xlu1 %2202  ;;  %v2193_v61 = vstv %s4346_s26  ;;  %v2197_v10 = vstv %s4353_s27 }
 0x179   :  { %v2116_v26 = vadd.f32 %v2115_v8, %v2079_v38  ;;  %v2120_v42 = vadd.f32 %v2119_v44, %v2083_v22  ;;  %v2124_v59 = vadd.f32 %v2123_v58, %v2087_v27  ;;  %v2178_v60 = vrot.slane %v2171_v30, %v3222_v0 }
 0x17a   :  { %v2153_v12 = vmul.f32 %v2152_v1, %v2150_v2  ;;  %v2157_v23 = vmul.f32 %v2156_v52, %v2150_v2  ;;  %v2161_v3 = vmul.f32 %v2160_v4, %v2150_v2  ;;  %v2239_v63 = vpop.permute.xlu0 %2238  ;;  %v2204_v9 = vsel %vm925_vm12, %v2201_v28, %v2203_v39 }
 0x17b   :  { %v2185_v32 = vrot.slane %v2178_v60, %v3222_v0  ;;  %v2205_v53 = vsel %vm925_vm12, %v2203_v39, %v2201_v28  ;;  %v2226_v14 = vstv %s4367_s22  ;;  %v2230_v31 = vstv %s4369_s6 }
 0x17c   :  { %v2154_v7 = vadd.f32 %v2153_v12, %v2116_v26  ;;  %v2158_v29 = vadd.f32 %v2157_v23, %v2120_v42  ;;  %v2162_v15 = vadd.f32 %v2161_v3, %v2124_v59  ;;  %v2208_v37 = vcombine.low %v2204_v9, %v2205_v53  ;;  %v2241_v1 = vpop.permute.xlu1 %2240 }
 0x17d   :  { %v2187_v52 = vmul.f32 %v4359_v54, %v2185_v32  ;;  %v2242_v5 = vsel %vm1039_vm13, %v2239_v63, %v2241_v1  ;;  %v2243_v34 = vsel %vm1039_vm13, %v2241_v1, %v2239_v63  ;;  %v2234_v55 = vstv %s4373_s23 }
 0x17e   :  { %v2215_v25 = vrot.slane %v2208_v37, %v3222_v0  ;;  %v2276_v13 = vpop.permute.xlu0 %2275  ;;  %v2246_v35 = vcombine.low %v2242_v5, %v2243_v34  ;;  %v2264_v4 = vstv %s4376_s4  ;;  %v2268_v38 = vstv %s4380_s5 }
 0x17f   :  { %v2190_v43 = vmul.f32 %v2189_v33, %v2187_v52  ;;  %v2194_v47 = vmul.f32 %v2193_v61, %v2187_v52  ;;  %v2198_v17 = vmul.f32 %v2197_v10, %v2187_v52  ;;  %v2272_v22 = vstv %s4387_s29 }
 0x180   :  { %v2222_v56 = vrot.slane %v2215_v25, %v3222_v0  ;;  %v2253_v21 = vrot.slane %v2246_v35, %v3222_v0  ;;  %v2278_v51 = vpop.permute.xlu1 %2277  ;;  %v1154_v28 = vmul.f32 0.2, %v3894_v50  ;;  %v2301_v9 = vstv %s4396_s3 }
 0x181   :  { %v2191_v18 = vadd.f32 %v2190_v43, %v2154_v7  ;;  %v2195_v57 = vadd.f32 %v2194_v47, %v2158_v29  ;;  %v2199_v41 = vadd.f32 %v2198_v17, %v2162_v15  ;;  %v2279_v40 = vsel %vm1039_vm13, %v2276_v13, %v2278_v51 }
 0x182   :  { %v2224_v36 = vmul.f32 %v4359_v54, %v2222_v56  ;;  %v2260_v6 = vrot.slane %v2253_v21, %v3222_v0  ;;  %v2280_v11 = vsel %vm1039_vm13, %v2278_v51, %v2276_v13  ;;  %v2313_v27 = vpop.permute.xlu0 %2312  ;;  %v1155_v46 = vsel %vm1153_vm0, %v3894_v50, %v1154_v28  ;;  %v2771_v28 = vld [vmem:[#allocation2] ss:$4 sm:$0x3] }
 0x183   :  { %v2283_v49 = vcombine.low %v2279_v40, %v2280_v11  ;;  %v2305_v32 = vstv %s4402_s30  ;;  %v2338_v5 = vstv %s4414_s11  ;;  %v2342_v34 = vstv %s4419_s1 }
 0x184   :  { %v2227_v8 = vmul.f32 %v2226_v14, %v2224_v36  ;;  %v2231_v44 = vmul.f32 %v2230_v31, %v2224_v36  ;;  %v2235_v54 = vmul.f32 %v2234_v55, %v2224_v36  ;;  %v2262_v58 = vmul.f32 %v2727_v19, %v2260_v6  ;;  %v2315_v30 = vpop.permute.xlu1 %2314 }
 0x185   :  { %v2290_v2 = vrot.slane %v2283_v49, %v3222_v0  ;;  %v2316_v33 = vsel %vm1039_vm13, %v2313_v27, %v2315_v30  ;;  %v2317_v39 = vsel %vm1039_vm13, %v2315_v30, %v2313_v27  ;;  %v1206_v25 = vrot.slane %v1155_v46, %v2989_v16 }
 0x186   :  { %v2228_v26 = vadd.f32 %v2227_v8, %v2191_v18  ;;  %v2265_v42 = vmul.f32 %v2264_v4, %v2262_v58  ;;  %v2269_v59 = vmul.f32 %v2268_v38, %v2262_v58  ;;  %v2273_v60 = vmul.f32 %v2272_v22, %v2262_v58  ;;  %v2379_v7 = vpop.permute.xlu0 %2378 }
 0x187   :  { %v2297_v12 = vrot.slane %v2290_v2, %v3222_v0  ;;  %v2320_v23 = vcombine.low %v2316_v33, %v2317_v39  ;;  %v2236_v3 = vadd.f32 %v2235_v54, %v2199_v41  ;;  %v2232_v63 = vadd.f32 %v2231_v44, %v2195_v57 }
 0x188   :  { %v2362_v61 = vpop.permute.xlu1 %2361  ;;  %v2266_v10 = vadd.f32 %v2265_v42, %v2228_v26  ;;  %v1210_v13 = vrot.slane %v1155_v46, %v3001_v24  ;;  %v1230_v8 = vrot.slane %v2771_v28, %v3001_v24  ;;  %v2772_v42 = vld [vmem:[#allocation2 + $0x1] ss:$4 sm:$0x3] }
 0x189   :  { %v2299_v53 = vmul.f32 %v2727_v19, %v2297_v12  ;;  %v2327_v29 = vrot.slane %v2320_v23, %v3222_v0  ;;  %v2274_v15 = vadd.f32 %v2273_v60, %v2236_v3  ;;  %v2270_v37 = vadd.f32 %v2269_v59, %v2232_v63  ;;  %v2773_v3 = vld [vmem:[#allocation2 + $0x2] ss:$4 sm:$0x3] }
 0x18a   :  { %v1236_v21 = vpop.permute.xlu0 %1235  ;;  %v1246_v59 = vrot.slane %v2772_v42, %v2989_v16  ;;  %v1250_v60 = vrot.slane %v2772_v42, %v3001_v24  ;;  %v1265_v63 = vrot.slane %v2773_v3, %v2989_v16 }
 0x18b   :  { %v2302_v1 = vmul.f32 %v2301_v9, %v2299_v53  ;;  %v2334_v52 = vrot.slane %v2327_v29, %v3222_v0  ;;  %v2310_v35 = vmul.f32 %v2299_v53, %v1107_v62  ;;  %v2306_v50 = vmul.f32 %v2305_v32, %v2299_v53  ;;  %v2774_v53 = vld [vmem:[#allocation2 + $0x3] ss:$4 sm:$0x3] }
 0x18c   :  { %v1269_v9 = vrot.slane %v2773_v3, %v3001_v24  ;;  %v1288_v29 = vrot.slane %v2774_v53, %v3001_v24 }
 0x18d   :  { %v2336_v43 = vmul.f32 %v2727_v19, %v2334_v52  ;;  %v2303_v47 = vadd.f32 %v2302_v1, %v2266_v10  ;;  %v2311_v55 = vadd.f32 %v2310_v35, %v2274_v15  ;;  %v2307_v56 = vadd.f32 %v2306_v50, %v2270_v37  ;;  %v2775_v35 = vld [vmem:[#allocation2 + $0x8] ss:$4 sm:$0x3] }
 0x18e   :  { %v1215_v17 = vpop.permute.xlu1 %1214  ;;  %v1239_v37 = vmul.f32 %v1236_v21, %v1230_v8  ;;  %v2428_v50 = vrot.slane %v2775_v35, %v2989_v16 }
 0x18f   :  { %v1217_v14 = vmul.f32 %v1215_v17, %v1206_v25  ;;  %v1218_v31 = vmul.f32 %v1215_v17, %v1210_v13  ;;  %v2339_v51 = vmul.f32 %v2338_v5, %v2336_v43  ;;  %v2347_v0 = vmul.f32 %v2336_v43, %v1144_v48  ;;  %v2398_v11 = vpop.permute.xlu0 %2397 }
 0x190   :  { %v2343_v18 = vmul.f32 %v2342_v34, %v2336_v43  ;;  %v2432_v43 = vrot.slane %v2775_v35, %v3001_v24 }
 0x191   :  { %v1219_v57 = vadd.f32 %v1217_v14, %v3923_v45  ;;  %v1220_v41 = vadd.f32 %v1218_v31, %v3925_v20  ;;  %v2340_v40 = vadd.f32 %v2339_v51, %v2303_v47  ;;  %v2348_v62 = vadd.f32 %v2347_v0, %v2311_v55  ;;  %v2776_v55 = vld [vmem:[#allocation2 + $0x9] ss:$4 sm:$0x3] }
 0x192   :  { %v2417_v36 = vpop.permute.xlu1 %2416  ;;  %v2344_v4 = vadd.f32 %v2343_v18, %v2307_v56  ;;  %v1226_v20 = vrot.slane %v2771_v28, %v2989_v16  ;;  %v2448_v56 = vrot.slane %v2776_v55, %v2989_v16 }
 0x193   :  { %vm2349_vm1 = vcmp.gt.f32.partialorder %v2340_v40, 0.0  ;;  %v2350_v19 = vmul.f32 0.2, %v2340_v40  ;;  %vm2355_vm2 = vcmp.gt.f32.partialorder %v2348_v62, 0.0  ;;  %v2356_v6 = vmul.f32 0.2, %v2348_v62  ;;  %v2457_v54 = vpop.permute.xlu0 %2456 }
 0x194   :  { %vm2352_vm3 = vcmp.gt.f32.partialorder %v2344_v4, 0.0  ;;  %v2353_v38 = vmul.f32 0.2, %v2344_v4  ;;  %v1238_v15 = vmul.f32 %v1236_v21, %v1226_v20  ;;  %v1241_v31 = vadd.f32 %v1239_v37, %v1220_v41 }
 0x195   :  { %v2351_v22 = vsel %vm2349_vm1, %v2340_v40, %v2350_v19  ;;  %v2357_v27 = vsel %vm2355_vm2, %v2348_v62, %v2356_v6  ;;  %v2452_v21 = vrot.slane %v2776_v55, %v3001_v24 }
 0x196   :  { %v2369_v48 = vrot.slane %v2351_v22, %v2989_v16  ;;  %v2373_v49 = vrot.slane %v2351_v22, %v3001_v24  ;;  %v2354_v44 = vsel %vm2352_vm3, %v2344_v4, %v2353_v38  ;;  %v2408_v2 = vrot.slane %v2357_v27, %v2989_v16 }
 0x197   :  { %v2438_v45 = vpop.permute.xlu1 %2437  ;;  %v2412_v33 = vrot.slane %v2357_v27, %v3001_v24  ;;  %v2389_v39 = vrot.slane %v2354_v44, %v2989_v16  ;;  %v2393_v26 = vrot.slane %v2354_v44, %v3001_v24  ;;  %v1240_v14 = vadd.f32 %v1238_v15, %v1219_v57 }
 0x198   :  { %v2381_v58 = vmul.f32 %v2379_v7, %v2369_v48  ;;  %v2382_v30 = vmul.f32 %v2379_v7, %v2373_v49  ;;  %v1284_v7 = vrot.slane %v2774_v53, %v2989_v16  ;;  %v2419_v1 = vmul.f32 %v2417_v36, %v2408_v2  ;;  %v1293_v13 = vpop.permute.xlu0 %1292  ;;  %v2778_v2 = vld [vmem:[#allocation2 + $0xb] ss:$4 sm:$0x3] }
 0x199   :  { %v2400_v10 = vmul.f32 %v2398_v11, %v2389_v39  ;;  %v2401_v46 = vmul.f32 %v2398_v11, %v2393_v26  ;;  %v2420_v52 = vmul.f32 %v2417_v36, %v2412_v33  ;;  %v1296_v18 = vmul.f32 %v1293_v13, %v1288_v29  ;;  %v2777_v11 = vld [vmem:[#allocation2 + $0xa] ss:$4 sm:$0x3] }
 0x19a   :  { %v2383_v12 = vadd.f32 %v2381_v58, %v2362_v61  ;;  %v2384_v23 = vadd.f32 %v2382_v30, %v2362_v61  ;;  %v1295_v0 = vmul.f32 %v1293_v13, %v1284_v7  ;;  %v2440_v19 = vmul.f32 %v2438_v45, %v2428_v50 }
 0x19b   :  { %v2441_v6 = vmul.f32 %v2438_v45, %v2432_v43  ;;  %v2467_v38 = vrot.slane %v2777_v11, %v2989_v16  ;;  %v2471_v57 = vrot.slane %v2777_v11, %v3001_v24  ;;  %v2459_v49 = vmul.f32 %v2457_v54, %v2448_v56 }
 0x19c   :  { %v1255_v32 = vpop.permute.xlu1 %1254  ;;  %v2402_v5 = vadd.f32 %v2400_v10, %v2383_v12  ;;  %v2403_v34 = vadd.f32 %v2401_v46, %v2384_v23  ;;  %v2460_v28 = vmul.f32 %v2457_v54, %v2452_v21  ;;  %v2486_v33 = vrot.slane %v2778_v2, %v2989_v16 }
 0x19d   :  { %v1257_v61 = vmul.f32 %v1255_v32, %v1246_v59  ;;  %v1258_v25 = vmul.f32 %v1255_v32, %v1250_v60  ;;  %v2490_v45 = vrot.slane %v2778_v2, %v3001_v24 }
 0x19e   :  { %v2421_v47 = vadd.f32 %v2419_v1, %v2402_v5  ;;  %v2422_v17 = vadd.f32 %v2420_v52, %v2403_v34 }
 0x19f   :  { %v1259_v40 = vadd.f32 %v1257_v61, %v1240_v14  ;;  %v1260_v36 = vadd.f32 %v1258_v25, %v1241_v31 }
 0x1a0   :  { %v2442_v27 = vadd.f32 %v2440_v19, %v2421_v47  ;;  %v2443_v48 = vadd.f32 %v2441_v6, %v2422_v17 }
 0x1a1   :  { %v1274_v51 = vpop.permute.xlu1 %1273 }
 0x1a2   :  { %v1276_v62 = vmul.f32 %v1274_v51, %v1265_v63  ;;  %v1277_v4 = vmul.f32 %v1274_v51, %v1269_v9  ;;  %v2461_v42 = vadd.f32 %v2459_v49, %v2442_v27  ;;  %v2462_v59 = vadd.f32 %v2460_v28, %v2443_v48 }
 0x1a4   :  { %v1278_v41 = vadd.f32 %v1276_v62, %v1259_v40  ;;  %v1279_v22 = vadd.f32 %v1277_v4, %v1260_v36 }
 0x1a5   :  { %v2476_v20 = vpop.permute.xlu1 %2475 }
 0x1a6   :  { %v1297_v8 = vadd.f32 %v1295_v0, %v1278_v41  ;;  %v1298_v44 = vadd.f32 %v1296_v18, %v1279_v22  ;;  %v2478_v58 = vmul.f32 %v2476_v20, %v2467_v38  ;;  %v2479_v30 = vmul.f32 %v2476_v20, %v2471_v57 }
 0x1a8   :  { %vm1299_vm4 = vcmp.gt.f32.partialorder %v1297_v8, 0.0  ;;  %vm1300_vm5 = vcmp.gt.f32.partialorder %v1298_v44, 0.0  ;;  %v1301_v39 = vmul.f32 0.2, %v1297_v8  ;;  %v1302_v26 = vmul.f32 0.2, %v1298_v44 }
 0x1a9   :  { %v2480_v54 = vadd.f32 %v2478_v58, %v2461_v42  ;;  %v2481_v3 = vadd.f32 %v2479_v30, %v2462_v59 }
 0x1aa   :  { %v1303_v60 = vsel %vm1299_vm4, %v1297_v8, %v1301_v39  ;;  %v1304_v12 = vsel %vm1300_vm5, %v1298_v44, %v1302_v26  ;;  %v2495_v23 = vpop.permute.xlu1 %2494 }
 0x1ab   :  { %1305 = vst [vmem:[#allocation12] sm:$0xff] %v1303_v60  ;;  %1306 = vst [vmem:[#allocation12 + $0x8] sm:$0xff] %v1304_v12  ;;  %v2497_v63 = vmul.f32 %v2495_v23, %v2486_v33  ;;  %v2498_v9 = vmul.f32 %v2495_v23, %v2490_v45 }
 0x1ad   :  { %v2499_v10 = vadd.f32 %v2497_v63, %v2480_v54  ;;  %v2500_v46 = vadd.f32 %v2498_v9, %v2481_v3 }
 0x1af   :  { %vm2501_vm6 = vcmp.gt.f32.partialorder %v2499_v10, 0.0  ;;  %vm2502_vm7 = vcmp.gt.f32.partialorder %v2500_v46, 0.0  ;;  %v2503_v16 = vmul.f32 0.2, %v2499_v10  ;;  %v2504_v24 = vmul.f32 0.2, %v2500_v46 }
 0x1b1   :  { %v2505_v32 = vsel %vm2501_vm6, %v2499_v10, %v2503_v16  ;;  %v2506_v53 = vsel %vm2502_vm7, %v2500_v46, %v2504_v24 }
 0x1b2   :  { %2508 = vst [vmem:[#allocation12 + $0x10] sm:$0xff] %v2505_v32  ;;  %2509 = vst [vmem:[#allocation12 + $0x18] sm:$0xff] %v2506_v53 }
 0x1b3   :  { %2846 = shalt.err (!%p2843_p0)
}
 0x1b4   :  { %s2886_s13 = smov 256   ;;  %s4501_s0 = smov 16  }
 0x1b5   :  { %s4502_s28 = sld [smem:[#allocation19_spill]] }
 0x1bb   :  { %2521 = dma.vmem_to_hbm [thread:$0]  %s2516_s8, 512, %s4502_s28, [#allocation4], %s2886_s13, %s2886_s13, %s4501_s0  }
 0x1bc   :  { %2863 = dma.done.wait [#allocation4], 512  }
 0x1bd   :  { %2864 = vsyncadd [#allocation4], 4294966784 }
 0x1be   :  { %2525 = vsyncpa [#allocation3], 1 }
 0x1bf   :  { %2526 = vsyncpa [#allocation4], 1 }
 0x1c0   :  { %2527 = vsyncpa [#allocation5], 1 }
 0x1c1   :  { %2528 = vsyncpa [#allocation9], 1 }
 0x1c2   :  { %2529 = vsyncpa [#allocation6], 1 }

</bundles_post_ra>
